<compile_context>
chip_gen: v7x
topology: tpu7x:2x2x1
jax: 0.10.0
libtpu: 0.0.40
codegen_flags: <defaults>
</compile_context>

<pallas_src>
import functools

import jax
import jax.numpy as jnp
from jax.experimental import pallas as pl
from jax.experimental.pallas import tpu as pltpu

_LANE = 128
_EPS = 1e-5
_HALO = 8  # >= max total halo of any branch (branch 3: 3+1+1+1 = 6), sublane aligned


def _rup(x, m):
    return (x + m - 1) // m * m


# --------------------------------------------------------------------------------------
# Fused kernel: whole TextDeepCNN forward for one (batch, L-tile) grid cell.
# --------------------------------------------------------------------------------------
def _text_deep_cnn_kernel(x_ref, *refs, layer_counts, seq_len, tile_l, halo):
    """refs = nl weight refs (K, Cin_pad, Cout_pad) bf16   (BN scale folded in),
              nl shift refs  (1, Cout_pad) f32             (bias + BN shift folded),
              output ref     (1, tile_l, n_branches * Cf_pad).
       x_ref = (1, L_t + 2*halo, Cin_pad) zero-padded input, full padded length."""
    nl = sum(layer_counts)
    w_refs = refs[:nl]
    s_refs = refs[nl:2 * nl]
    o_ref = refs[2 * nl]

    row0 = pl.program_id(1) * tile_l            # first output row of this tile
    if tile_l % 8 == 0:
        row0 = pl.multiple_of(row0, 8)

    outs = []
    li = 0
    for nb in layer_counts:                     # static loop over branches
        ws = w_refs[li:li + nb]
        ss = s_refs[li:li + nb]
        li += nb
        pads = [(w.shape[0] - 1) // 2 for w in ws]
        hb = sum(pads)                          # total halo this branch consumes
        # Input slab covering global rows [row0 - hb, row0 + tile_l + hb); the padded
        # input is offset by `halo` rows, so the slab starts at row0 + halo - hb.
        h = x_ref[0, pl.ds(row0 + (halo - hb), tile_l + 2 * hb), :]
        r = hb                                  # remaining halo after each layer
        for w_ref, s_ref, p in zip(ws, ss, pads):
            k_taps = w_ref.shape[0]
            s_out = h.shape[0] - (k_taps - 1)
            h16 = h.astype(jnp.bfloat16)        # bf16 into the MXU, f32 accumulate
            acc = jnp.zeros((s_out, w_ref.shape[2]), jnp.float32)
            for k in range(k_taps):             # K is tiny & static (1, 3 or 7)
                acc = acc + jnp.dot(h16[k:k + s_out, :], w_ref[k],
                                    preferred_element_type=jnp.float32)
            h = jnp.maximum(acc + s_ref[...], 0.0)   # folded bias/BN + ReLU (f32)
            r -= p
            if r > 0:
                # PyTorch zero-pads every conv's input: rows of this intermediate
                # lying outside the real sequence [0, seq_len) must read as zero
                # before they feed the next conv.
                pos = jax.lax.broadcasted_iota(jnp.int32, h.shape, 0) + (row0 - r)
                h = jnp.where((pos >= 0) & (pos < seq_len), h, 0.0)
        outs.append(h)                          # (tile_l, Cf_pad), already >= 0
    o_ref[0] = jnp.concatenate(outs, axis=-1).astype(o_ref.dtype)


# --------------------------------------------------------------------------------------
# Parameter construction (PyTorch-equivalent random init, then fold + pad for the kernel)
# --------------------------------------------------------------------------------------
def _init_conv_bn(key, cin, cout, ksize):
    kw, kb, kg, kbeta, km, kv = jax.random.split(key, 6)
    # Conv weight stored tap-major (K, Cin, Cout)  (PyTorch layout is (Cout, Cin, K)).
    w = 0.1 * jax.random.normal(kw, (ksize, cin, cout), jnp.float32)
    b = 0.1 * jax.random.normal(kb, (cout,), jnp.float32)
    gamma = 1.0 + 0.05 * jax.random.normal(kg, (cout,), jnp.float32)
    beta = 0.05 * jax.random.normal(kbeta, (cout,), jnp.float32)
    rmean = 0.05 * jax.random.normal(km, (cout,), jnp.float32)
    rvar = 1.0 + 0.1 * jax.random.uniform(kv, (cout,), jnp.float32)
    return dict(w=w, b=b, gamma=gamma, beta=beta, rmean=rmean, rvar=rvar)


def _fold_and_pad(layer):
    """Fold conv bias + eval-mode BN into (bf16 weight, f32 shift); pad channels to 128."""
    w, b = layer["w"], layer["b"]
    scale = layer["gamma"] / jnp.sqrt(layer["rvar"] + _EPS)
    shift = (b - layer["rmean"]) * scale + layer["beta"]
    wf = w * scale[None, None, :]
    k, cin, cout = w.shape
    cin_p, cout_p = _rup(cin, _LANE), _rup(cout, _LANE)
    w_pad = jnp.zeros((k, cin_p, cout_p), jnp.float32).at[:, :cin, :cout].set(wf)
    s_pad = jnp.zeros((1, cout_p), jnp.float32).at[:, :cout].set(shift)
    return w_pad.astype(jnp.bfloat16), s_pad


def branch_defs(fea_size, filter_num):
    # (cin, cout, kernel_size) per layer, per branch — mirrors the nn.Sequential defs.
    return (
        [(fea_size, fea_size * 2, 1), (fea_size * 2, filter_num, 1)],
        [(fea_size, fea_size * 2, 3), (fea_size * 2, fea_size * 2, 3),
         (fea_size * 2, filter_num, 3)],
        [(fea_size, fea_size * 2, 7), (fea_size * 2, fea_size * 4, 3),
         (fea_size * 4, fea_size * 4, 3), (fea_size * 4, filter_num, 3)],
    )


def make_text_deep_cnn_params(fea_size, filter_num, key):
    raw = []
    for bdef in branch_defs(fea_size, filter_num):
        layers = []
        for (cin, cout, k) in bdef:
            key, sub = jax.random.split(key)
            layers.append(_init_conv_bn(sub, cin, cout, k))
        raw.append(layers)
    folded = [[_fold_and_pad(layer) for layer in branch] for branch in raw]
    return raw, folded


# --------------------------------------------------------------------------------------
# Forward wrapper
# --------------------------------------------------------------------------------------
@functools.partial(jax.jit, static_argnames=("filter_num",))
def text_deep_cnn_forward(x, folded_params, *, filter_num):
    """x: (B, L, feaSize) f32 -> (B, L, 3*filterNum) f32 (matches PyTorch output)."""
    B, L, fea = x.shape
    n_branches = len(folded_params)
    ws = [w for branch in folded_params for (w, _) in branch]
    shifts = [s for branch in folded_params for (_, s) in branch]
    layer_counts = tuple(len(branch) for branch in folded_params)

    cin_p = ws[0].shape[1]
    cf_p = _rup(filter_num, _LANE)

    # Length tiling: one tile for short sequences, 512-row tiles (8-aligned) otherwise.
    tile_l = L if L <= 512 else 512
    L_t = _rup(L, tile_l)
    n_tiles = L_t // tile_l
    lpad_total = L_t + 2 * _HALO

    # Single wrapper-side pad for the whole fused net (length halo + lane padding).
    xp = jnp.pad(x, ((0, 0), (_HALO, L_t - L + _HALO), (0, cin_p - fea)))

    in_specs = [pl.BlockSpec((1, lpad_total, cin_p), lambda b, j: (b, 0, 0))]
    for w in ws:      # constant index maps -> weights fetched once, stay VMEM-resident
        in_specs.append(pl.BlockSpec(w.shape, lambda b, j: (0, 0, 0)))
    for s in shifts:
        in_specs.append(pl.BlockSpec(s.shape, lambda b, j: (0, 0)))
    out_specs = pl.BlockSpec((1, tile_l, n_branches * cf_p), lambda b, j: (b, j, 0))

    kernel = functools.partial(
        _text_deep_cnn_kernel,
        layer_counts=layer_counts, seq_len=L, tile_l=tile_l, halo=_HALO)

    out_padded = pl.pallas_call(
        kernel,
        out_shape=jax.ShapeDtypeStruct((B, L_t, n_branches * cf_p), x.dtype),
        grid=(B, n_tiles),
        in_specs=in_specs,
        out_specs=out_specs,
        compiler_params=pltpu.CompilerParams(
            dimension_semantics=("parallel", "parallel"),
            vmem_limit_bytes=64 * 1024 * 1024),
    )(xp, *ws, *shifts)

    if cf_p == filter_num:                      # already exactly the PyTorch concat
        return out_padded[:, :L, :]
    return jnp.concatenate(
        [out_padded[:, :L, i * cf_p:i * cf_p + filter_num] for i in range(n_branches)],
        axis=-1)


# --------------------------------------------------------------------------------------
# Pure-JAX f32 reference (no folding, no padding) for a correctness check.
# --------------------------------------------------------------------------------------
def text_deep_cnn_reference(x, raw_params):
    outs = []
    for branch in raw_params:
        h = x
        for layer in branch:
            k = layer["w"].shape[0]
            y = jax.lax.conv_general_dilated(
                h, layer["w"], window_strides=(1,), padding=[(k // 2, k // 2)],
                dimension_numbers=("NWC", "WIO", "NWC"))
            y = y + layer["b"]
            y = (y - layer["rmean"]) / jnp.sqrt(layer["rvar"] + _EPS)
            y = y * layer["gamma"] + layer["beta"]
            h = jnp.maximum(y, 0.0)
        outs.append(h)
    return jnp.concatenate(outs, axis=-1)


if __name__ == "__main__":
    B, L, FEA, FILT = 2, 16, 8, 16
    key = jax.random.PRNGKey(0)
    kx, kp = jax.random.split(key)
    x = jax.random.normal(kx, (B, L, FEA), jnp.float32)

    raw_params, folded_params = make_text_deep_cnn_params(FEA, FILT, kp)

    out = text_deep_cnn_forward(x, folded_params, filter_num=FILT)
    out = jax.block_until_ready(out)

    assert out.shape == (B, L, 3 * FILT), out.shape
    assert bool(jnp.all(jnp.isfinite(out)))
    assert bool(jnp.all(out >= 0.0))            # every branch ends in ReLU

    ref = text_deep_cnn_reference(x, raw_params)
    max_err = float(jnp.max(jnp.abs(out - ref)))
    assert max_err < 1e-1, f"max abs err vs f32 reference: {max_err}"

    print("KERNEL_OK")
</pallas_src>

<mosaic_0001>
module attributes {stable_mosaic.version = 11 : i64} {
  func.func @_text_deep_cnn_kernel(%arg0: i32, %arg1: i32, %arg2: memref<1x32x128xf32, #tpu.memory_space<vmem>>, %arg3: memref<1x128x128xbf16, #tpu.memory_space<vmem>>, %arg4: memref<1x128x128xbf16, #tpu.memory_space<vmem>>, %arg5: memref<3x128x128xbf16, #tpu.memory_space<vmem>>, %arg6: memref<3x128x128xbf16, #tpu.memory_space<vmem>>, %arg7: memref<3x128x128xbf16, #tpu.memory_space<vmem>>, %arg8: memref<7x128x128xbf16, #tpu.memory_space<vmem>>, %arg9: memref<3x128x128xbf16, #tpu.memory_space<vmem>>, %arg10: memref<3x128x128xbf16, #tpu.memory_space<vmem>>, %arg11: memref<3x128x128xbf16, #tpu.memory_space<vmem>>, %arg12: memref<1x128xf32, #tpu.memory_space<vmem>>, %arg13: memref<1x128xf32, #tpu.memory_space<vmem>>, %arg14: memref<1x128xf32, #tpu.memory_space<vmem>>, %arg15: memref<1x128xf32, #tpu.memory_space<vmem>>, %arg16: memref<1x128xf32, #tpu.memory_space<vmem>>, %arg17: memref<1x128xf32, #tpu.memory_space<vmem>>, %arg18: memref<1x128xf32, #tpu.memory_space<vmem>>, %arg19: memref<1x128xf32, #tpu.memory_space<vmem>>, %arg20: memref<1x128xf32, #tpu.memory_space<vmem>>, %arg21: memref<1x16x384xf32, #tpu.memory_space<vmem>>) attributes {dimension_semantics = [#tpu.dimension_semantics<parallel>, #tpu.dimension_semantics<parallel>], iteration_bounds = array<i64: 2, 1>, scalar_prefetch = 0 : i64, scratch_operands = 0 : i64, tpu.core_type = #tpu.core_type<tc>, window_params = [{transform_indices = @transform_0, window_bounds = array<i64: 1, 32, 128>}, {pipeline_mode = #tpu.pipeline_mode<synchronous>, transform_indices = @transform_1, window_bounds = array<i64: 1, 128, 128>}, {pipeline_mode = #tpu.pipeline_mode<synchronous>, transform_indices = @transform_2, window_bounds = array<i64: 1, 128, 128>}, {pipeline_mode = #tpu.pipeline_mode<synchronous>, transform_indices = @transform_3, window_bounds = array<i64: 3, 128, 128>}, {pipeline_mode = #tpu.pipeline_mode<synchronous>, transform_indices = @transform_4, window_bounds = array<i64: 3, 128, 128>}, {pipeline_mode = #tpu.pipeline_mode<synchronous>, transform_indices = @transform_5, window_bounds = array<i64: 3, 128, 128>}, {pipeline_mode = #tpu.pipeline_mode<synchronous>, transform_indices = @transform_6, window_bounds = array<i64: 7, 128, 128>}, {pipeline_mode = #tpu.pipeline_mode<synchronous>, transform_indices = @transform_7, window_bounds = array<i64: 3, 128, 128>}, {pipeline_mode = #tpu.pipeline_mode<synchronous>, transform_indices = @transform_8, window_bounds = array<i64: 3, 128, 128>}, {pipeline_mode = #tpu.pipeline_mode<synchronous>, transform_indices = @transform_9, window_bounds = array<i64: 3, 128, 128>}, {pipeline_mode = #tpu.pipeline_mode<synchronous>, transform_indices = @transform_10, window_bounds = array<i64: 1, 128>}, {pipeline_mode = #tpu.pipeline_mode<synchronous>, transform_indices = @transform_11, window_bounds = array<i64: 1, 128>}, {pipeline_mode = #tpu.pipeline_mode<synchronous>, transform_indices = @transform_12, window_bounds = array<i64: 1, 128>}, {pipeline_mode = #tpu.pipeline_mode<synchronous>, transform_indices = @transform_13, window_bounds = array<i64: 1, 128>}, {pipeline_mode = #tpu.pipeline_mode<synchronous>, transform_indices = @transform_14, window_bounds = array<i64: 1, 128>}, {pipeline_mode = #tpu.pipeline_mode<synchronous>, transform_indices = @transform_15, window_bounds = array<i64: 1, 128>}, {pipeline_mode = #tpu.pipeline_mode<synchronous>, transform_indices = @transform_16, window_bounds = array<i64: 1, 128>}, {pipeline_mode = #tpu.pipeline_mode<synchronous>, transform_indices = @transform_17, window_bounds = array<i64: 1, 128>}, {pipeline_mode = #tpu.pipeline_mode<synchronous>, transform_indices = @transform_18, window_bounds = array<i64: 1, 128>}, {transform_indices = @transform_19, window_bounds = array<i64: 1, 16, 384>}]} {
    %c16_i32 = arith.constant 16 : i32
    %0 = arith.muli %arg1, %c16_i32 : i32
    %1 = tpu.assume_multiple %0, 8 : i32
    %c8_i32 = arith.constant 8 : i32
    %2 = arith.addi %1, %c8_i32 : i32
    %c0 = arith.constant 0 : index
    %3 = arith.index_cast %2 : i32 to index
    %c0_0 = arith.constant 0 : index
    %4 = vector.load %arg2[%c0, %3, %c0_0] : memref<1x32x128xf32, #tpu.memory_space<vmem>>, vector<1x16x128xf32>
    %5 = vector.shape_cast %4 : vector<1x16x128xf32> to vector<16x128xf32>
    %6 = arith.truncf %5 : vector<16x128xf32> to vector<16x128xbf16>
    %cst = arith.constant 0.000000e+00 : f32
    %7 = vector.broadcast %cst : f32 to vector<16x128xf32>
    %c0_1 = arith.constant 0 : index
    %c0_2 = arith.constant 0 : index
    %c0_3 = arith.constant 0 : index
    %8 = vector.load %arg3[%c0_1, %c0_2, %c0_3] : memref<1x128x128xbf16, #tpu.memory_space<vmem>>, vector<1x128x128xbf16>
    %9 = vector.shape_cast %8 : vector<1x128x128xbf16> to vector<128x128xbf16>
    %cst_4 = arith.constant dense<0.000000e+00> : vector<16x128xf32>
    %10 = tpu.matmul %6, %9, %cst_4 {dimension_numbers = #tpu.dot_dimension_numbers<[1], [0], [0], [1], [0, 0, 1, 1], [], []>} : vector<16x128xbf16>, vector<128x128xbf16>, vector<16x128xf32> -> vector<16x128xf32>
    %11 = arith.addf %7, %10 : vector<16x128xf32>
    %c0_5 = arith.constant 0 : index
    %c0_6 = arith.constant 0 : index
    %12 = vector.load %arg12[%c0_5, %c0_6] : memref<1x128xf32, #tpu.memory_space<vmem>>, vector<1x128xf32>
    %13 = vector.broadcast %12 : vector<1x128xf32> to vector<16x128xf32>
    %14 = arith.addf %11, %13 : vector<16x128xf32>
    %cst_7 = arith.constant 0.000000e+00 : f32
    %15 = vector.broadcast %cst_7 : f32 to vector<16x128xf32>
    %16 = arith.maximumf %14, %15 : vector<16x128xf32>
    %17 = arith.truncf %16 : vector<16x128xf32> to vector<16x128xbf16>
    %cst_8 = arith.constant 0.000000e+00 : f32
    %18 = vector.broadcast %cst_8 : f32 to vector<16x128xf32>
    %c0_9 = arith.constant 0 : index
    %c0_10 = arith.constant 0 : index
    %c0_11 = arith.constant 0 : index
    %19 = vector.load %arg4[%c0_9, %c0_10, %c0_11] : memref<1x128x128xbf16, #tpu.memory_space<vmem>>, vector<1x128x128xbf16>
    %20 = vector.shape_cast %19 : vector<1x128x128xbf16> to vector<128x128xbf16>
    %cst_12 = arith.constant dense<0.000000e+00> : vector<16x128xf32>
    %21 = tpu.matmul %17, %20, %cst_12 {dimension_numbers = #tpu.dot_dimension_numbers<[1], [0], [0], [1], [0, 0, 1, 1], [], []>} : vector<16x128xbf16>, vector<128x128xbf16>, vector<16x128xf32> -> vector<16x128xf32>
    %22 = arith.addf %18, %21 : vector<16x128xf32>
    %c0_13 = arith.constant 0 : index
    %c0_14 = arith.constant 0 : index
    %23 = vector.load %arg13[%c0_13, %c0_14] : memref<1x128xf32, #tpu.memory_space<vmem>>, vector<1x128xf32>
    %24 = vector.broadcast %23 : vector<1x128xf32> to vector<16x128xf32>
    %25 = arith.addf %22, %24 : vector<16x128xf32>
    %cst_15 = arith.constant 0.000000e+00 : f32
    %26 = vector.broadcast %cst_15 : f32 to vector<16x128xf32>
    %27 = arith.maximumf %25, %26 : vector<16x128xf32>
    %c5_i32 = arith.constant 5 : i32
    %28 = arith.addi %1, %c5_i32 : i32
    %c0_16 = arith.constant 0 : index
    %29 = arith.index_cast %28 : i32 to index
    %c0_17 = arith.constant 0 : index
    %30 = vector.load %arg2[%c0_16, %29, %c0_17] : memref<1x32x128xf32, #tpu.memory_space<vmem>>, vector<1x22x128xf32>
    %31 = vector.shape_cast %30 : vector<1x22x128xf32> to vector<22x128xf32>
    %32 = arith.truncf %31 : vector<22x128xf32> to vector<22x128xbf16>
    %cst_18 = arith.constant 0.000000e+00 : f32
    %33 = vector.broadcast %cst_18 : f32 to vector<20x128xf32>
    %34 = vector.extract_strided_slice %32 {offsets = [0, 0], sizes = [20, 128], strides = [1, 1]} : vector<22x128xbf16> to vector<20x128xbf16>
    %c0_19 = arith.constant 0 : index
    %c0_20 = arith.constant 0 : index
    %c0_21 = arith.constant 0 : index
    %35 = vector.load %arg5[%c0_19, %c0_20, %c0_21] : memref<3x128x128xbf16, #tpu.memory_space<vmem>>, vector<1x128x128xbf16>
    %36 = vector.shape_cast %35 : vector<1x128x128xbf16> to vector<128x128xbf16>
    %cst_22 = arith.constant dense<0.000000e+00> : vector<20x128xf32>
    %37 = tpu.matmul %34, %36, %cst_22 {dimension_numbers = #tpu.dot_dimension_numbers<[1], [0], [0], [1], [0, 0, 1, 1], [], []>} : vector<20x128xbf16>, vector<128x128xbf16>, vector<20x128xf32> -> vector<20x128xf32>
    %38 = arith.addf %33, %37 : vector<20x128xf32>
    %39 = vector.extract_strided_slice %32 {offsets = [1, 0], sizes = [20, 128], strides = [1, 1]} : vector<22x128xbf16> to vector<20x128xbf16>
    %c1 = arith.constant 1 : index
    %c0_23 = arith.constant 0 : index
    %c0_24 = arith.constant 0 : index
    %40 = vector.load %arg5[%c1, %c0_23, %c0_24] : memref<3x128x128xbf16, #tpu.memory_space<vmem>>, vector<1x128x128xbf16>
    %41 = vector.shape_cast %40 : vector<1x128x128xbf16> to vector<128x128xbf16>
    %cst_25 = arith.constant dense<0.000000e+00> : vector<20x128xf32>
    %42 = tpu.matmul %39, %41, %cst_25 {dimension_numbers = #tpu.dot_dimension_numbers<[1], [0], [0], [1], [0, 0, 1, 1], [], []>} : vector<20x128xbf16>, vector<128x128xbf16>, vector<20x128xf32> -> vector<20x128xf32>
    %43 = arith.addf %38, %42 : vector<20x128xf32>
    %44 = vector.extract_strided_slice %32 {offsets = [2, 0], sizes = [20, 128], strides = [1, 1]} : vector<22x128xbf16> to vector<20x128xbf16>
    %c2 = arith.constant 2 : index
    %c0_26 = arith.constant 0 : index
    %c0_27 = arith.constant 0 : index
    %45 = vector.load %arg5[%c2, %c0_26, %c0_27] : memref<3x128x128xbf16, #tpu.memory_space<vmem>>, vector<1x128x128xbf16>
    %46 = vector.shape_cast %45 : vector<1x128x128xbf16> to vector<128x128xbf16>
    %cst_28 = arith.constant dense<0.000000e+00> : vector<20x128xf32>
    %47 = tpu.matmul %44, %46, %cst_28 {dimension_numbers = #tpu.dot_dimension_numbers<[1], [0], [0], [1], [0, 0, 1, 1], [], []>} : vector<20x128xbf16>, vector<128x128xbf16>, vector<20x128xf32> -> vector<20x128xf32>
    %48 = arith.addf %43, %47 : vector<20x128xf32>
    %c0_29 = arith.constant 0 : index
    %c0_30 = arith.constant 0 : index
    %49 = vector.load %arg14[%c0_29, %c0_30] : memref<1x128xf32, #tpu.memory_space<vmem>>, vector<1x128xf32>
    %50 = vector.broadcast %49 : vector<1x128xf32> to vector<20x128xf32>
    %51 = arith.addf %48, %50 : vector<20x128xf32>
    %cst_31 = arith.constant 0.000000e+00 : f32
    %52 = vector.broadcast %cst_31 : f32 to vector<20x128xf32>
    %53 = arith.maximumf %51, %52 : vector<20x128xf32>
    %54 = tpu.iota {dimensions = array<i32: 0>} : vector<20x128xi32>
    %c2_i32 = arith.constant 2 : i32
    %55 = arith.subi %1, %c2_i32 : i32
    %56 = vector.broadcast %55 : i32 to vector<20x128xi32>
    %57 = arith.addi %54, %56 : vector<20x128xi32>
    %c0_i32 = arith.constant 0 : i32
    %58 = vector.broadcast %c0_i32 : i32 to vector<20x128xi32>
    %59 = arith.cmpi sge, %57, %58 : vector<20x128xi32>
    %c16_i32_32 = arith.constant 16 : i32
    %60 = vector.broadcast %c16_i32_32 : i32 to vector<20x128xi32>
    %61 = arith.cmpi slt, %57, %60 : vector<20x128xi32>
    %62 = arith.andi %59, %61 : vector<20x128xi1>
    %cst_33 = arith.constant 0.000000e+00 : f32
    %63 = vector.broadcast %cst_33 : f32 to vector<20x128xf32>
    %64 = arith.select %62, %53, %63 : vector<20x128xi1>, vector<20x128xf32>
    %65 = arith.truncf %64 : vector<20x128xf32> to vector<20x128xbf16>
    %cst_34 = arith.constant 0.000000e+00 : f32
    %66 = vector.broadcast %cst_34 : f32 to vector<18x128xf32>
    %67 = vector.extract_strided_slice %65 {offsets = [0, 0], sizes = [18, 128], strides = [1, 1]} : vector<20x128xbf16> to vector<18x128xbf16>
    %c0_35 = arith.constant 0 : index
    %c0_36 = arith.constant 0 : index
    %c0_37 = arith.constant 0 : index
    %68 = vector.load %arg6[%c0_35, %c0_36, %c0_37] : memref<3x128x128xbf16, #tpu.memory_space<vmem>>, vector<1x128x128xbf16>
    %69 = vector.shape_cast %68 : vector<1x128x128xbf16> to vector<128x128xbf16>
    %cst_38 = arith.constant dense<0.000000e+00> : vector<18x128xf32>
    %70 = tpu.matmul %67, %69, %cst_38 {dimension_numbers = #tpu.dot_dimension_numbers<[1], [0], [0], [1], [0, 0, 1, 1], [], []>} : vector<18x128xbf16>, vector<128x128xbf16>, vector<18x128xf32> -> vector<18x128xf32>
    %71 = arith.addf %66, %70 : vector<18x128xf32>
    %72 = vector.extract_strided_slice %65 {offsets = [1, 0], sizes = [18, 128], strides = [1, 1]} : vector<20x128xbf16> to vector<18x128xbf16>
    %c1_39 = arith.constant 1 : index
    %c0_40 = arith.constant 0 : index
    %c0_41 = arith.constant 0 : index
    %73 = vector.load %arg6[%c1_39, %c0_40, %c0_41] : memref<3x128x128xbf16, #tpu.memory_space<vmem>>, vector<1x128x128xbf16>
    %74 = vector.shape_cast %73 : vector<1x128x128xbf16> to vector<128x128xbf16>
    %cst_42 = arith.constant dense<0.000000e+00> : vector<18x128xf32>
    %75 = tpu.matmul %72, %74, %cst_42 {dimension_numbers = #tpu.dot_dimension_numbers<[1], [0], [0], [1], [0, 0, 1, 1], [], []>} : vector<18x128xbf16>, vector<128x128xbf16>, vector<18x128xf32> -> vector<18x128xf32>
    %76 = arith.addf %71, %75 : vector<18x128xf32>
    %77 = vector.extract_strided_slice %65 {offsets = [2, 0], sizes = [18, 128], strides = [1, 1]} : vector<20x128xbf16> to vector<18x128xbf16>
    %c2_43 = arith.constant 2 : index
    %c0_44 = arith.constant 0 : index
    %c0_45 = arith.constant 0 : index
    %78 = vector.load %arg6[%c2_43, %c0_44, %c0_45] : memref<3x128x128xbf16, #tpu.memory_space<vmem>>, vector<1x128x128xbf16>
    %79 = vector.shape_cast %78 : vector<1x128x128xbf16> to vector<128x128xbf16>
    %cst_46 = arith.constant dense<0.000000e+00> : vector<18x128xf32>
    %80 = tpu.matmul %77, %79, %cst_46 {dimension_numbers = #tpu.dot_dimension_numbers<[1], [0], [0], [1], [0, 0, 1, 1], [], []>} : vector<18x128xbf16>, vector<128x128xbf16>, vector<18x128xf32> -> vector<18x128xf32>
    %81 = arith.addf %76, %80 : vector<18x128xf32>
    %c0_47 = arith.constant 0 : index
    %c0_48 = arith.constant 0 : index
    %82 = vector.load %arg15[%c0_47, %c0_48] : memref<1x128xf32, #tpu.memory_space<vmem>>, vector<1x128xf32>
    %83 = vector.broadcast %82 : vector<1x128xf32> to vector<18x128xf32>
    %84 = arith.addf %81, %83 : vector<18x128xf32>
    %cst_49 = arith.constant 0.000000e+00 : f32
    %85 = vector.broadcast %cst_49 : f32 to vector<18x128xf32>
    %86 = arith.maximumf %84, %85 : vector<18x128xf32>
    %87 = tpu.iota {dimensions = array<i32: 0>} : vector<18x128xi32>
    %c1_i32 = arith.constant 1 : i32
    %88 = arith.subi %1, %c1_i32 : i32
    %89 = vector.broadcast %88 : i32 to vector<18x128xi32>
    %90 = arith.addi %87, %89 : vector<18x128xi32>
    %c0_i32_50 = arith.constant 0 : i32
    %91 = vector.broadcast %c0_i32_50 : i32 to vector<18x128xi32>
    %92 = arith.cmpi sge, %90, %91 : vector<18x128xi32>
    %c16_i32_51 = arith.constant 16 : i32
    %93 = vector.broadcast %c16_i32_51 : i32 to vector<18x128xi32>
    %94 = arith.cmpi slt, %90, %93 : vector<18x128xi32>
    %95 = arith.andi %92, %94 : vector<18x128xi1>
    %cst_52 = arith.constant 0.000000e+00 : f32
    %96 = vector.broadcast %cst_52 : f32 to vector<18x128xf32>
    %97 = arith.select %95, %86, %96 : vector<18x128xi1>, vector<18x128xf32>
    %98 = arith.truncf %97 : vector<18x128xf32> to vector<18x128xbf16>
    %cst_53 = arith.constant 0.000000e+00 : f32
    %99 = vector.broadcast %cst_53 : f32 to vector<16x128xf32>
    %100 = vector.extract_strided_slice %98 {offsets = [0, 0], sizes = [16, 128], strides = [1, 1]} : vector<18x128xbf16> to vector<16x128xbf16>
    %c0_54 = arith.constant 0 : index
    %c0_55 = arith.constant 0 : index
    %c0_56 = arith.constant 0 : index
    %101 = vector.load %arg7[%c0_54, %c0_55, %c0_56] : memref<3x128x128xbf16, #tpu.memory_space<vmem>>, vector<1x128x128xbf16>
    %102 = vector.shape_cast %101 : vector<1x128x128xbf16> to vector<128x128xbf16>
    %cst_57 = arith.constant dense<0.000000e+00> : vector<16x128xf32>
    %103 = tpu.matmul %100, %102, %cst_57 {dimension_numbers = #tpu.dot_dimension_numbers<[1], [0], [0], [1], [0, 0, 1, 1], [], []>} : vector<16x128xbf16>, vector<128x128xbf16>, vector<16x128xf32> -> vector<16x128xf32>
    %104 = arith.addf %99, %103 : vector<16x128xf32>
    %105 = vector.extract_strided_slice %98 {offsets = [1, 0], sizes = [16, 128], strides = [1, 1]} : vector<18x128xbf16> to vector<16x128xbf16>
    %c1_58 = arith.constant 1 : index
    %c0_59 = arith.constant 0 : index
    %c0_60 = arith.constant 0 : index
    %106 = vector.load %arg7[%c1_58, %c0_59, %c0_60] : memref<3x128x128xbf16, #tpu.memory_space<vmem>>, vector<1x128x128xbf16>
    %107 = vector.shape_cast %106 : vector<1x128x128xbf16> to vector<128x128xbf16>
    %cst_61 = arith.constant dense<0.000000e+00> : vector<16x128xf32>
    %108 = tpu.matmul %105, %107, %cst_61 {dimension_numbers = #tpu.dot_dimension_numbers<[1], [0], [0], [1], [0, 0, 1, 1], [], []>} : vector<16x128xbf16>, vector<128x128xbf16>, vector<16x128xf32> -> vector<16x128xf32>
    %109 = arith.addf %104, %108 : vector<16x128xf32>
    %110 = vector.extract_strided_slice %98 {offsets = [2, 0], sizes = [16, 128], strides = [1, 1]} : vector<18x128xbf16> to vector<16x128xbf16>
    %c2_62 = arith.constant 2 : index
    %c0_63 = arith.constant 0 : index
    %c0_64 = arith.constant 0 : index
    %111 = vector.load %arg7[%c2_62, %c0_63, %c0_64] : memref<3x128x128xbf16, #tpu.memory_space<vmem>>, vector<1x128x128xbf16>
    %112 = vector.shape_cast %111 : vector<1x128x128xbf16> to vector<128x128xbf16>
    %cst_65 = arith.constant dense<0.000000e+00> : vector<16x128xf32>
    %113 = tpu.matmul %110, %112, %cst_65 {dimension_numbers = #tpu.dot_dimension_numbers<[1], [0], [0], [1], [0, 0, 1, 1], [], []>} : vector<16x128xbf16>, vector<128x128xbf16>, vector<16x128xf32> -> vector<16x128xf32>
    %114 = arith.addf %109, %113 : vector<16x128xf32>
    %c0_66 = arith.constant 0 : index
    %c0_67 = arith.constant 0 : index
    %115 = vector.load %arg16[%c0_66, %c0_67] : memref<1x128xf32, #tpu.memory_space<vmem>>, vector<1x128xf32>
    %116 = vector.broadcast %115 : vector<1x128xf32> to vector<16x128xf32>
    %117 = arith.addf %114, %116 : vector<16x128xf32>
    %cst_68 = arith.constant 0.000000e+00 : f32
    %118 = vector.broadcast %cst_68 : f32 to vector<16x128xf32>
    %119 = arith.maximumf %117, %118 : vector<16x128xf32>
    %c2_i32_69 = arith.constant 2 : i32
    %120 = arith.addi %1, %c2_i32_69 : i32
    %c0_70 = arith.constant 0 : index
    %121 = arith.index_cast %120 : i32 to index
    %c0_71 = arith.constant 0 : index
    %122 = vector.load %arg2[%c0_70, %121, %c0_71] : memref<1x32x128xf32, #tpu.memory_space<vmem>>, vector<1x28x128xf32>
    %123 = vector.shape_cast %122 : vector<1x28x128xf32> to vector<28x128xf32>
    %124 = arith.truncf %123 : vector<28x128xf32> to vector<28x128xbf16>
    %cst_72 = arith.constant 0.000000e+00 : f32
    %125 = vector.broadcast %cst_72 : f32 to vector<22x128xf32>
    %126 = vector.extract_strided_slice %124 {offsets = [0, 0], sizes = [22, 128], strides = [1, 1]} : vector<28x128xbf16> to vector<22x128xbf16>
    %c0_73 = arith.constant 0 : index
    %c0_74 = arith.constant 0 : index
    %c0_75 = arith.constant 0 : index
    %127 = vector.load %arg8[%c0_73, %c0_74, %c0_75] : memref<7x128x128xbf16, #tpu.memory_space<vmem>>, vector<1x128x128xbf16>
    %128 = vector.shape_cast %127 : vector<1x128x128xbf16> to vector<128x128xbf16>
    %cst_76 = arith.constant dense<0.000000e+00> : vector<22x128xf32>
    %129 = tpu.matmul %126, %128, %cst_76 {dimension_numbers = #tpu.dot_dimension_numbers<[1], [0], [0], [1], [0, 0, 1, 1], [], []>} : vector<22x128xbf16>, vector<128x128xbf16>, vector<22x128xf32> -> vector<22x128xf32>
    %130 = arith.addf %125, %129 : vector<22x128xf32>
    %131 = vector.extract_strided_slice %124 {offsets = [1, 0], sizes = [22, 128], strides = [1, 1]} : vector<28x128xbf16> to vector<22x128xbf16>
    %c1_77 = arith.constant 1 : index
    %c0_78 = arith.constant 0 : index
    %c0_79 = arith.constant 0 : index
    %132 = vector.load %arg8[%c1_77, %c0_78, %c0_79] : memref<7x128x128xbf16, #tpu.memory_space<vmem>>, vector<1x128x128xbf16>
    %133 = vector.shape_cast %132 : vector<1x128x128xbf16> to vector<128x128xbf16>
    %cst_80 = arith.constant dense<0.000000e+00> : vector<22x128xf32>
    %134 = tpu.matmul %131, %133, %cst_80 {dimension_numbers = #tpu.dot_dimension_numbers<[1], [0], [0], [1], [0, 0, 1, 1], [], []>} : vector<22x128xbf16>, vector<128x128xbf16>, vector<22x128xf32> -> vector<22x128xf32>
    %135 = arith.addf %130, %134 : vector<22x128xf32>
    %136 = vector.extract_strided_slice %124 {offsets = [2, 0], sizes = [22, 128], strides = [1, 1]} : vector<28x128xbf16> to vector<22x128xbf16>
    %c2_81 = arith.constant 2 : index
    %c0_82 = arith.constant 0 : index
    %c0_83 = arith.constant 0 : index
    %137 = vector.load %arg8[%c2_81, %c0_82, %c0_83] : memref<7x128x128xbf16, #tpu.memory_space<vmem>>, vector<1x128x128xbf16>
    %138 = vector.shape_cast %137 : vector<1x128x128xbf16> to vector<128x128xbf16>
    %cst_84 = arith.constant dense<0.000000e+00> : vector<22x128xf32>
    %139 = tpu.matmul %136, %138, %cst_84 {dimension_numbers = #tpu.dot_dimension_numbers<[1], [0], [0], [1], [0, 0, 1, 1], [], []>} : vector<22x128xbf16>, vector<128x128xbf16>, vector<22x128xf32> -> vector<22x128xf32>
    %140 = arith.addf %135, %139 : vector<22x128xf32>
    %141 = vector.extract_strided_slice %124 {offsets = [3, 0], sizes = [22, 128], strides = [1, 1]} : vector<28x128xbf16> to vector<22x128xbf16>
    %c3 = arith.constant 3 : index
    %c0_85 = arith.constant 0 : index
    %c0_86 = arith.constant 0 : index
    %142 = vector.load %arg8[%c3, %c0_85, %c0_86] : memref<7x128x128xbf16, #tpu.memory_space<vmem>>, vector<1x128x128xbf16>
    %143 = vector.shape_cast %142 : vector<1x128x128xbf16> to vector<128x128xbf16>
    %cst_87 = arith.constant dense<0.000000e+00> : vector<22x128xf32>
    %144 = tpu.matmul %141, %143, %cst_87 {dimension_numbers = #tpu.dot_dimension_numbers<[1], [0], [0], [1], [0, 0, 1, 1], [], []>} : vector<22x128xbf16>, vector<128x128xbf16>, vector<22x128xf32> -> vector<22x128xf32>
    %145 = arith.addf %140, %144 : vector<22x128xf32>
    %146 = vector.extract_strided_slice %124 {offsets = [4, 0], sizes = [22, 128], strides = [1, 1]} : vector<28x128xbf16> to vector<22x128xbf16>
    %c4 = arith.constant 4 : index
    %c0_88 = arith.constant 0 : index
    %c0_89 = arith.constant 0 : index
    %147 = vector.load %arg8[%c4, %c0_88, %c0_89] : memref<7x128x128xbf16, #tpu.memory_space<vmem>>, vector<1x128x128xbf16>
    %148 = vector.shape_cast %147 : vector<1x128x128xbf16> to vector<128x128xbf16>
    %cst_90 = arith.constant dense<0.000000e+00> : vector<22x128xf32>
    %149 = tpu.matmul %146, %148, %cst_90 {dimension_numbers = #tpu.dot_dimension_numbers<[1], [0], [0], [1], [0, 0, 1, 1], [], []>} : vector<22x128xbf16>, vector<128x128xbf16>, vector<22x128xf32> -> vector<22x128xf32>
    %150 = arith.addf %145, %149 : vector<22x128xf32>
    %151 = vector.extract_strided_slice %124 {offsets = [5, 0], sizes = [22, 128], strides = [1, 1]} : vector<28x128xbf16> to vector<22x128xbf16>
    %c5 = arith.constant 5 : index
    %c0_91 = arith.constant 0 : index
    %c0_92 = arith.constant 0 : index
    %152 = vector.load %arg8[%c5, %c0_91, %c0_92] : memref<7x128x128xbf16, #tpu.memory_space<vmem>>, vector<1x128x128xbf16>
    %153 = vector.shape_cast %152 : vector<1x128x128xbf16> to vector<128x128xbf16>
    %cst_93 = arith.constant dense<0.000000e+00> : vector<22x128xf32>
    %154 = tpu.matmul %151, %153, %cst_93 {dimension_numbers = #tpu.dot_dimension_numbers<[1], [0], [0], [1], [0, 0, 1, 1], [], []>} : vector<22x128xbf16>, vector<128x128xbf16>, vector<22x128xf32> -> vector<22x128xf32>
    %155 = arith.addf %150, %154 : vector<22x128xf32>
    %156 = vector.extract_strided_slice %124 {offsets = [6, 0], sizes = [22, 128], strides = [1, 1]} : vector<28x128xbf16> to vector<22x128xbf16>
    %c6 = arith.constant 6 : index
    %c0_94 = arith.constant 0 : index
    %c0_95 = arith.constant 0 : index
    %157 = vector.load %arg8[%c6, %c0_94, %c0_95] : memref<7x128x128xbf16, #tpu.memory_space<vmem>>, vector<1x128x128xbf16>
    %158 = vector.shape_cast %157 : vector<1x128x128xbf16> to vector<128x128xbf16>
    %cst_96 = arith.constant dense<0.000000e+00> : vector<22x128xf32>
    %159 = tpu.matmul %156, %158, %cst_96 {dimension_numbers = #tpu.dot_dimension_numbers<[1], [0], [0], [1], [0, 0, 1, 1], [], []>} : vector<22x128xbf16>, vector<128x128xbf16>, vector<22x128xf32> -> vector<22x128xf32>
    %160 = arith.addf %155, %159 : vector<22x128xf32>
    %c0_97 = arith.constant 0 : index
    %c0_98 = arith.constant 0 : index
    %161 = vector.load %arg17[%c0_97, %c0_98] : memref<1x128xf32, #tpu.memory_space<vmem>>, vector<1x128xf32>
    %162 = vector.broadcast %161 : vector<1x128xf32> to vector<22x128xf32>
    %163 = arith.addf %160, %162 : vector<22x128xf32>
    %cst_99 = arith.constant 0.000000e+00 : f32
    %164 = vector.broadcast %cst_99 : f32 to vector<22x128xf32>
    %165 = arith.maximumf %163, %164 : vector<22x128xf32>
    %166 = tpu.iota {dimensions = array<i32: 0>} : vector<22x128xi32>
    %c3_i32 = arith.constant 3 : i32
    %167 = arith.subi %1, %c3_i32 : i32
    %168 = vector.broadcast %167 : i32 to vector<22x128xi32>
    %169 = arith.addi %166, %168 : vector<22x128xi32>
    %c0_i32_100 = arith.constant 0 : i32
    %170 = vector.broadcast %c0_i32_100 : i32 to vector<22x128xi32>
    %171 = arith.cmpi sge, %169, %170 : vector<22x128xi32>
    %c16_i32_101 = arith.constant 16 : i32
    %172 = vector.broadcast %c16_i32_101 : i32 to vector<22x128xi32>
    %173 = arith.cmpi slt, %169, %172 : vector<22x128xi32>
    %174 = arith.andi %171, %173 : vector<22x128xi1>
    %cst_102 = arith.constant 0.000000e+00 : f32
    %175 = vector.broadcast %cst_102 : f32 to vector<22x128xf32>
    %176 = arith.select %174, %165, %175 : vector<22x128xi1>, vector<22x128xf32>
    %177 = arith.truncf %176 : vector<22x128xf32> to vector<22x128xbf16>
    %cst_103 = arith.constant 0.000000e+00 : f32
    %178 = vector.broadcast %cst_103 : f32 to vector<20x128xf32>
    %179 = vector.extract_strided_slice %177 {offsets = [0, 0], sizes = [20, 128], strides = [1, 1]} : vector<22x128xbf16> to vector<20x128xbf16>
    %c0_104 = arith.constant 0 : index
    %c0_105 = arith.constant 0 : index
    %c0_106 = arith.constant 0 : index
    %180 = vector.load %arg9[%c0_104, %c0_105, %c0_106] : memref<3x128x128xbf16, #tpu.memory_space<vmem>>, vector<1x128x128xbf16>
    %181 = vector.shape_cast %180 : vector<1x128x128xbf16> to vector<128x128xbf16>
    %cst_107 = arith.constant dense<0.000000e+00> : vector<20x128xf32>
    %182 = tpu.matmul %179, %181, %cst_107 {dimension_numbers = #tpu.dot_dimension_numbers<[1], [0], [0], [1], [0, 0, 1, 1], [], []>} : vector<20x128xbf16>, vector<128x128xbf16>, vector<20x128xf32> -> vector<20x128xf32>
    %183 = arith.addf %178, %182 : vector<20x128xf32>
    %184 = vector.extract_strided_slice %177 {offsets = [1, 0], sizes = [20, 128], strides = [1, 1]} : vector<22x128xbf16> to vector<20x128xbf16>
    %c1_108 = arith.constant 1 : index
    %c0_109 = arith.constant 0 : index
    %c0_110 = arith.constant 0 : index
    %185 = vector.load %arg9[%c1_108, %c0_109, %c0_110] : memref<3x128x128xbf16, #tpu.memory_space<vmem>>, vector<1x128x128xbf16>
    %186 = vector.shape_cast %185 : vector<1x128x128xbf16> to vector<128x128xbf16>
    %cst_111 = arith.constant dense<0.000000e+00> : vector<20x128xf32>
    %187 = tpu.matmul %184, %186, %cst_111 {dimension_numbers = #tpu.dot_dimension_numbers<[1], [0], [0], [1], [0, 0, 1, 1], [], []>} : vector<20x128xbf16>, vector<128x128xbf16>, vector<20x128xf32> -> vector<20x128xf32>
    %188 = arith.addf %183, %187 : vector<20x128xf32>
    %189 = vector.extract_strided_slice %177 {offsets = [2, 0], sizes = [20, 128], strides = [1, 1]} : vector<22x128xbf16> to vector<20x128xbf16>
    %c2_112 = arith.constant 2 : index
    %c0_113 = arith.constant 0 : index
    %c0_114 = arith.constant 0 : index
    %190 = vector.load %arg9[%c2_112, %c0_113, %c0_114] : memref<3x128x128xbf16, #tpu.memory_space<vmem>>, vector<1x128x128xbf16>
    %191 = vector.shape_cast %190 : vector<1x128x128xbf16> to vector<128x128xbf16>
    %cst_115 = arith.constant dense<0.000000e+00> : vector<20x128xf32>
    %192 = tpu.matmul %189, %191, %cst_115 {dimension_numbers = #tpu.dot_dimension_numbers<[1], [0], [0], [1], [0, 0, 1, 1], [], []>} : vector<20x128xbf16>, vector<128x128xbf16>, vector<20x128xf32> -> vector<20x128xf32>
    %193 = arith.addf %188, %192 : vector<20x128xf32>
    %c0_116 = arith.constant 0 : index
    %c0_117 = arith.constant 0 : index
    %194 = vector.load %arg18[%c0_116, %c0_117] : memref<1x128xf32, #tpu.memory_space<vmem>>, vector<1x128xf32>
    %195 = vector.broadcast %194 : vector<1x128xf32> to vector<20x128xf32>
    %196 = arith.addf %193, %195 : vector<20x128xf32>
    %cst_118 = arith.constant 0.000000e+00 : f32
    %197 = vector.broadcast %cst_118 : f32 to vector<20x128xf32>
    %198 = arith.maximumf %196, %197 : vector<20x128xf32>
    %199 = tpu.iota {dimensions = array<i32: 0>} : vector<20x128xi32>
    %c2_i32_119 = arith.constant 2 : i32
    %200 = arith.subi %1, %c2_i32_119 : i32
    %201 = vector.broadcast %200 : i32 to vector<20x128xi32>
    %202 = arith.addi %199, %201 : vector<20x128xi32>
    %c0_i32_120 = arith.constant 0 : i32
    %203 = vector.broadcast %c0_i32_120 : i32 to vector<20x128xi32>
    %204 = arith.cmpi sge, %202, %203 : vector<20x128xi32>
    %c16_i32_121 = arith.constant 16 : i32
    %205 = vector.broadcast %c16_i32_121 : i32 to vector<20x128xi32>
    %206 = arith.cmpi slt, %202, %205 : vector<20x128xi32>
    %207 = arith.andi %204, %206 : vector<20x128xi1>
    %cst_122 = arith.constant 0.000000e+00 : f32
    %208 = vector.broadcast %cst_122 : f32 to vector<20x128xf32>
    %209 = arith.select %207, %198, %208 : vector<20x128xi1>, vector<20x128xf32>
    %210 = arith.truncf %209 : vector<20x128xf32> to vector<20x128xbf16>
    %cst_123 = arith.constant 0.000000e+00 : f32
    %211 = vector.broadcast %cst_123 : f32 to vector<18x128xf32>
    %212 = vector.extract_strided_slice %210 {offsets = [0, 0], sizes = [18, 128], strides = [1, 1]} : vector<20x128xbf16> to vector<18x128xbf16>
    %c0_124 = arith.constant 0 : index
    %c0_125 = arith.constant 0 : index
    %c0_126 = arith.constant 0 : index
    %213 = vector.load %arg10[%c0_124, %c0_125, %c0_126] : memref<3x128x128xbf16, #tpu.memory_space<vmem>>, vector<1x128x128xbf16>
    %214 = vector.shape_cast %213 : vector<1x128x128xbf16> to vector<128x128xbf16>
    %cst_127 = arith.constant dense<0.000000e+00> : vector<18x128xf32>
    %215 = tpu.matmul %212, %214, %cst_127 {dimension_numbers = #tpu.dot_dimension_numbers<[1], [0], [0], [1], [0, 0, 1, 1], [], []>} : vector<18x128xbf16>, vector<128x128xbf16>, vector<18x128xf32> -> vector<18x128xf32>
    %216 = arith.addf %211, %215 : vector<18x128xf32>
    %217 = vector.extract_strided_slice %210 {offsets = [1, 0], sizes = [18, 128], strides = [1, 1]} : vector<20x128xbf16> to vector<18x128xbf16>
    %c1_128 = arith.constant 1 : index
    %c0_129 = arith.constant 0 : index
    %c0_130 = arith.constant 0 : index
    %218 = vector.load %arg10[%c1_128, %c0_129, %c0_130] : memref<3x128x128xbf16, #tpu.memory_space<vmem>>, vector<1x128x128xbf16>
    %219 = vector.shape_cast %218 : vector<1x128x128xbf16> to vector<128x128xbf16>
    %cst_131 = arith.constant dense<0.000000e+00> : vector<18x128xf32>
    %220 = tpu.matmul %217, %219, %cst_131 {dimension_numbers = #tpu.dot_dimension_numbers<[1], [0], [0], [1], [0, 0, 1, 1], [], []>} : vector<18x128xbf16>, vector<128x128xbf16>, vector<18x128xf32> -> vector<18x128xf32>
    %221 = arith.addf %216, %220 : vector<18x128xf32>
    %222 = vector.extract_strided_slice %210 {offsets = [2, 0], sizes = [18, 128], strides = [1, 1]} : vector<20x128xbf16> to vector<18x128xbf16>
    %c2_132 = arith.constant 2 : index
    %c0_133 = arith.constant 0 : index
    %c0_134 = arith.constant 0 : index
    %223 = vector.load %arg10[%c2_132, %c0_133, %c0_134] : memref<3x128x128xbf16, #tpu.memory_space<vmem>>, vector<1x128x128xbf16>
    %224 = vector.shape_cast %223 : vector<1x128x128xbf16> to vector<128x128xbf16>
    %cst_135 = arith.constant dense<0.000000e+00> : vector<18x128xf32>
    %225 = tpu.matmul %222, %224, %cst_135 {dimension_numbers = #tpu.dot_dimension_numbers<[1], [0], [0], [1], [0, 0, 1, 1], [], []>} : vector<18x128xbf16>, vector<128x128xbf16>, vector<18x128xf32> -> vector<18x128xf32>
    %226 = arith.addf %221, %225 : vector<18x128xf32>
    %c0_136 = arith.constant 0 : index
    %c0_137 = arith.constant 0 : index
    %227 = vector.load %arg19[%c0_136, %c0_137] : memref<1x128xf32, #tpu.memory_space<vmem>>, vector<1x128xf32>
    %228 = vector.broadcast %227 : vector<1x128xf32> to vector<18x128xf32>
    %229 = arith.addf %226, %228 : vector<18x128xf32>
    %cst_138 = arith.constant 0.000000e+00 : f32
    %230 = vector.broadcast %cst_138 : f32 to vector<18x128xf32>
    %231 = arith.maximumf %229, %230 : vector<18x128xf32>
    %232 = tpu.iota {dimensions = array<i32: 0>} : vector<18x128xi32>
    %c1_i32_139 = arith.constant 1 : i32
    %233 = arith.subi %1, %c1_i32_139 : i32
    %234 = vector.broadcast %233 : i32 to vector<18x128xi32>
    %235 = arith.addi %232, %234 : vector<18x128xi32>
    %c0_i32_140 = arith.constant 0 : i32
    %236 = vector.broadcast %c0_i32_140 : i32 to vector<18x128xi32>
    %237 = arith.cmpi sge, %235, %236 : vector<18x128xi32>
    %c16_i32_141 = arith.constant 16 : i32
    %238 = vector.broadcast %c16_i32_141 : i32 to vector<18x128xi32>
    %239 = arith.cmpi slt, %235, %238 : vector<18x128xi32>
    %240 = arith.andi %237, %239 : vector<18x128xi1>
    %cst_142 = arith.constant 0.000000e+00 : f32
    %241 = vector.broadcast %cst_142 : f32 to vector<18x128xf32>
    %242 = arith.select %240, %231, %241 : vector<18x128xi1>, vector<18x128xf32>
    %243 = arith.truncf %242 : vector<18x128xf32> to vector<18x128xbf16>
    %cst_143 = arith.constant 0.000000e+00 : f32
    %244 = vector.broadcast %cst_143 : f32 to vector<16x128xf32>
    %245 = vector.extract_strided_slice %243 {offsets = [0, 0], sizes = [16, 128], strides = [1, 1]} : vector<18x128xbf16> to vector<16x128xbf16>
    %c0_144 = arith.constant 0 : index
    %c0_145 = arith.constant 0 : index
    %c0_146 = arith.constant 0 : index
    %246 = vector.load %arg11[%c0_144, %c0_145, %c0_146] : memref<3x128x128xbf16, #tpu.memory_space<vmem>>, vector<1x128x128xbf16>
    %247 = vector.shape_cast %246 : vector<1x128x128xbf16> to vector<128x128xbf16>
    %cst_147 = arith.constant dense<0.000000e+00> : vector<16x128xf32>
    %248 = tpu.matmul %245, %247, %cst_147 {dimension_numbers = #tpu.dot_dimension_numbers<[1], [0], [0], [1], [0, 0, 1, 1], [], []>} : vector<16x128xbf16>, vector<128x128xbf16>, vector<16x128xf32> -> vector<16x128xf32>
    %249 = arith.addf %244, %248 : vector<16x128xf32>
    %250 = vector.extract_strided_slice %243 {offsets = [1, 0], sizes = [16, 128], strides = [1, 1]} : vector<18x128xbf16> to vector<16x128xbf16>
    %c1_148 = arith.constant 1 : index
    %c0_149 = arith.constant 0 : index
    %c0_150 = arith.constant 0 : index
    %251 = vector.load %arg11[%c1_148, %c0_149, %c0_150] : memref<3x128x128xbf16, #tpu.memory_space<vmem>>, vector<1x128x128xbf16>
    %252 = vector.shape_cast %251 : vector<1x128x128xbf16> to vector<128x128xbf16>
    %cst_151 = arith.constant dense<0.000000e+00> : vector<16x128xf32>
    %253 = tpu.matmul %250, %252, %cst_151 {dimension_numbers = #tpu.dot_dimension_numbers<[1], [0], [0], [1], [0, 0, 1, 1], [], []>} : vector<16x128xbf16>, vector<128x128xbf16>, vector<16x128xf32> -> vector<16x128xf32>
    %254 = arith.addf %249, %253 : vector<16x128xf32>
    %255 = vector.extract_strided_slice %243 {offsets = [2, 0], sizes = [16, 128], strides = [1, 1]} : vector<18x128xbf16> to vector<16x128xbf16>
    %c2_152 = arith.constant 2 : index
    %c0_153 = arith.constant 0 : index
    %c0_154 = arith.constant 0 : index
    %256 = vector.load %arg11[%c2_152, %c0_153, %c0_154] : memref<3x128x128xbf16, #tpu.memory_space<vmem>>, vector<1x128x128xbf16>
    %257 = vector.shape_cast %256 : vector<1x128x128xbf16> to vector<128x128xbf16>
    %cst_155 = arith.constant dense<0.000000e+00> : vector<16x128xf32>
    %258 = tpu.matmul %255, %257, %cst_155 {dimension_numbers = #tpu.dot_dimension_numbers<[1], [0], [0], [1], [0, 0, 1, 1], [], []>} : vector<16x128xbf16>, vector<128x128xbf16>, vector<16x128xf32> -> vector<16x128xf32>
    %259 = arith.addf %254, %258 : vector<16x128xf32>
    %c0_156 = arith.constant 0 : index
    %c0_157 = arith.constant 0 : index
    %260 = vector.load %arg20[%c0_156, %c0_157] : memref<1x128xf32, #tpu.memory_space<vmem>>, vector<1x128xf32>
    %261 = vector.broadcast %260 : vector<1x128xf32> to vector<16x128xf32>
    %262 = arith.addf %259, %261 : vector<16x128xf32>
    %cst_158 = arith.constant 0.000000e+00 : f32
    %263 = vector.broadcast %cst_158 : f32 to vector<16x128xf32>
    %264 = arith.maximumf %262, %263 : vector<16x128xf32>
    %265 = tpu.concatenate %27, %119, %264 in 1 : vector<16x128xf32>, vector<16x128xf32>, vector<16x128xf32> -> vector<16x384xf32>
    %c0_159 = arith.constant 0 : index
    %c0_160 = arith.constant 0 : index
    %c0_161 = arith.constant 0 : index
    %266 = vector.load %arg21[%c0_159, %c0_160, %c0_161] : memref<1x16x384xf32, #tpu.memory_space<vmem>>, vector<1x16x384xf32>
    %267 = vector.shape_cast %266 : vector<1x16x384xf32> to vector<16x384xf32>
    %268 = vector.shape_cast %265 : vector<16x384xf32> to vector<1x16x384xf32>
    tpu.vector_store %arg21[%c0_159, %c0_160, %c0_161], %268 {strides = array<i32>} : memref<1x16x384xf32, #tpu.memory_space<vmem>>, vector<1x16x384xf32>,
    return
  }
  func.func @transform_0(%arg0: i32, %arg1: i32) -> (i32, i32, i32) {
    %c0_i32 = arith.constant 0 : i32
    %c0_i32_0 = arith.constant 0 : i32
    %c0_i32_1 = arith.constant 0 : i32
    return %arg0, %c0_i32, %c0_i32_0 : i32, i32, i32
  }
  func.func @transform_1(%arg0: i32, %arg1: i32) -> (i32, i32, i32) {
    %c0_i32 = arith.constant 0 : i32
    %c0_i32_0 = arith.constant 0 : i32
    %c0_i32_1 = arith.constant 0 : i32
    %c0_i32_2 = arith.constant 0 : i32
    return %c0_i32, %c0_i32_0, %c0_i32_1 : i32, i32, i32
  }
  func.func @transform_2(%arg0: i32, %arg1: i32) -> (i32, i32, i32) {
    %c0_i32 = arith.constant 0 : i32
    %c0_i32_0 = arith.constant 0 : i32
    %c0_i32_1 = arith.constant 0 : i32
    %c0_i32_2 = arith.constant 0 : i32
    return %c0_i32, %c0_i32_0, %c0_i32_1 : i32, i32, i32
  }
  func.func @transform_3(%arg0: i32, %arg1: i32) -> (i32, i32, i32) {
    %c0_i32 = arith.constant 0 : i32
    %c0_i32_0 = arith.constant 0 : i32
    %c0_i32_1 = arith.constant 0 : i32
    %c0_i32_2 = arith.constant 0 : i32
    return %c0_i32, %c0_i32_0, %c0_i32_1 : i32, i32, i32
  }
  func.func @transform_4(%arg0: i32, %arg1: i32) -> (i32, i32, i32) {
    %c0_i32 = arith.constant 0 : i32
    %c0_i32_0 = arith.constant 0 : i32
    %c0_i32_1 = arith.constant 0 : i32
    %c0_i32_2 = arith.constant 0 : i32
    return %c0_i32, %c0_i32_0, %c0_i32_1 : i32, i32, i32
  }
  func.func @transform_5(%arg0: i32, %arg1: i32) -> (i32, i32, i32) {
    %c0_i32 = arith.constant 0 : i32
    %c0_i32_0 = arith.constant 0 : i32
    %c0_i32_1 = arith.constant 0 : i32
    %c0_i32_2 = arith.constant 0 : i32
    return %c0_i32, %c0_i32_0, %c0_i32_1 : i32, i32, i32
  }
  func.func @transform_6(%arg0: i32, %arg1: i32) -> (i32, i32, i32) {
    %c0_i32 = arith.constant 0 : i32
    %c0_i32_0 = arith.constant 0 : i32
    %c0_i32_1 = arith.constant 0 : i32
    %c0_i32_2 = arith.constant 0 : i32
    return %c0_i32, %c0_i32_0, %c0_i32_1 : i32, i32, i32
  }
  func.func @transform_7(%arg0: i32, %arg1: i32) -> (i32, i32, i32) {
    %c0_i32 = arith.constant 0 : i32
    %c0_i32_0 = arith.constant 0 : i32
    %c0_i32_1 = arith.constant 0 : i32
    %c0_i32_2 = arith.constant 0 : i32
    return %c0_i32, %c0_i32_0, %c0_i32_1 : i32, i32, i32
  }
  func.func @transform_8(%arg0: i32, %arg1: i32) -> (i32, i32, i32) {
    %c0_i32 = arith.constant 0 : i32
    %c0_i32_0 = arith.constant 0 : i32
    %c0_i32_1 = arith.constant 0 : i32
    %c0_i32_2 = arith.constant 0 : i32
    return %c0_i32, %c0_i32_0, %c0_i32_1 : i32, i32, i32
  }
  func.func @transform_9(%arg0: i32, %arg1: i32) -> (i32, i32, i32) {
    %c0_i32 = arith.constant 0 : i32
    %c0_i32_0 = arith.constant 0 : i32
    %c0_i32_1 = arith.constant 0 : i32
    %c0_i32_2 = arith.constant 0 : i32
    return %c0_i32, %c0_i32_0, %c0_i32_1 : i32, i32, i32
  }
  func.func @transform_10(%arg0: i32, %arg1: i32) -> (i32, i32) {
    %c0_i32 = arith.constant 0 : i32
    %c0_i32_0 = arith.constant 0 : i32
    %c0_i32_1 = arith.constant 0 : i32
    return %c0_i32, %c0_i32_0 : i32, i32
  }
  func.func @transform_11(%arg0: i32, %arg1: i32) -> (i32, i32) {
    %c0_i32 = arith.constant 0 : i32
    %c0_i32_0 = arith.constant 0 : i32
    %c0_i32_1 = arith.constant 0 : i32
    return %c0_i32, %c0_i32_0 : i32, i32
  }
  func.func @transform_12(%arg0: i32, %arg1: i32) -> (i32, i32) {
    %c0_i32 = arith.constant 0 : i32
    %c0_i32_0 = arith.constant 0 : i32
    %c0_i32_1 = arith.constant 0 : i32
    return %c0_i32, %c0_i32_0 : i32, i32
  }
  func.func @transform_13(%arg0: i32, %arg1: i32) -> (i32, i32) {
    %c0_i32 = arith.constant 0 : i32
    %c0_i32_0 = arith.constant 0 : i32
    %c0_i32_1 = arith.constant 0 : i32
    return %c0_i32, %c0_i32_0 : i32, i32
  }
  func.func @transform_14(%arg0: i32, %arg1: i32) -> (i32, i32) {
    %c0_i32 = arith.constant 0 : i32
    %c0_i32_0 = arith.constant 0 : i32
    %c0_i32_1 = arith.constant 0 : i32
    return %c0_i32, %c0_i32_0 : i32, i32
  }
  func.func @transform_15(%arg0: i32, %arg1: i32) -> (i32, i32) {
    %c0_i32 = arith.constant 0 : i32
    %c0_i32_0 = arith.constant 0 : i32
    %c0_i32_1 = arith.constant 0 : i32
    return %c0_i32, %c0_i32_0 : i32, i32
  }
  func.func @transform_16(%arg0: i32, %arg1: i32) -> (i32, i32) {
    %c0_i32 = arith.constant 0 : i32
    %c0_i32_0 = arith.constant 0 : i32
    %c0_i32_1 = arith.constant 0 : i32
    return %c0_i32, %c0_i32_0 : i32, i32
  }
  func.func @transform_17(%arg0: i32, %arg1: i32) -> (i32, i32) {
    %c0_i32 = arith.constant 0 : i32
    %c0_i32_0 = arith.constant 0 : i32
    %c0_i32_1 = arith.constant 0 : i32
    return %c0_i32, %c0_i32_0 : i32, i32
  }
  func.func @transform_18(%arg0: i32, %arg1: i32) -> (i32, i32) {
    %c0_i32 = arith.constant 0 : i32
    %c0_i32_0 = arith.constant 0 : i32
    %c0_i32_1 = arith.constant 0 : i32
    return %c0_i32, %c0_i32_0 : i32, i32
  }
  func.func @transform_19(%arg0: i32, %arg1: i32) -> (i32, i32, i32) {
    %c0_i32 = arith.constant 0 : i32
    %c0_i32_0 = arith.constant 0 : i32
    return %arg0, %arg1, %c0_i32 : i32, i32, i32
  }
}

</mosaic_0001>

<bundles_post_ra>
// kernel: text_deep_cnn_forward.1
= control target key start
LH: loop header
LB: loop body
LE: loop exit
PB: predicated region body
PF: predicated region fallthrough
CT: control target
= control target key end

     0   :  { %s7819_s0 = inlined_call_operand.hbm [shape: f32[2,32,128], index: 0, kind: input, shape index: {}]   ;;  %s7820_s1 = inlined_call_operand.hbm [shape: bf16[1,128,128], index: 1, kind: input, shape index: {}]   ;;  %s7821_s2 = inlined_call_operand.hbm [shape: bf16[1,128,128], index: 2, kind: input, shape index: {}]   ;;  %s7822_s3 = inlined_call_operand.hbm [shape: bf16[3,128,128], index: 3, kind: input, shape index: {}]   ;;  %s7823_s4 = inlined_call_operand.hbm [shape: bf16[3,128,128], index: 4, kind: input, shape index: {}]   ;;  %s7824_s5 = inlined_call_operand.hbm [shape: bf16[3,128,128], index: 5, kind: input, shape index: {}]   ;;  %s7825_s6 = inlined_call_operand.hbm [shape: bf16[7,128,128], index: 6, kind: input, shape index: {}]   ;;  %s7826_s7 = inlined_call_operand.hbm [shape: bf16[3,128,128], index: 7, kind: input, shape index: {}]   ;;  %s7827_s8 = inlined_call_operand.hbm [shape: bf16[3,128,128], index: 8, kind: input, shape index: {}]   ;;  %s7828_s9 = inlined_call_operand.hbm [shape: bf16[3,128,128], index: 9, kind: input, shape index: {}]   ;;  %s7829_s10 = inlined_call_operand.hbm [shape: f32[1,128], index: 10, kind: input, shape index: {}]   ;;  %s7830_s11 = inlined_call_operand.hbm [shape: f32[1,128], index: 11, kind: input, shape index: {}]   ;;  %s7831_s12 = inlined_call_operand.hbm [shape: f32[1,128], index: 12, kind: input, shape index: {}]   ;;  %s7832_s13 = inlined_call_operand.hbm [shape: f32[1,128], index: 13, kind: input, shape index: {}]   ;;  %s7833_s14 = inlined_call_operand.hbm [shape: f32[1,128], index: 14, kind: input, shape index: {}]   ;;  %s7834_s15 = inlined_call_operand.hbm [shape: f32[1,128], index: 15, kind: input, shape index: {}]   ;;  %s7835_s16 = inlined_call_operand.hbm [shape: f32[1,128], index: 16, kind: input, shape index: {}]   ;;  %s7836_s17 = inlined_call_operand.hbm [shape: f32[1,128], index: 17, kind: input, shape index: {}]   ;;  %s7837_s18 = inlined_call_operand.hbm [shape: f32[1,128], index: 18, kind: input, shape index: {}]   ;;  %s7838_s19 = inlined_call_operand.hbm [shape: f32[2,16,384], index: 19, kind: output, shape index: {}]  }
   0x1   :  { %7864 = sst [smem:[#allocation52_spill]] %s7819_s0 }
   0x2   :  { %7865 = sst [smem:[#allocation53_spill]] %s7820_s1 }
   0x3   :  { %7866 = sst [smem:[#allocation54_spill]] %s7821_s2 }
   0x4   :  { %7867 = sst [smem:[#allocation55_spill]] %s7822_s3 }
   0x5   :  { %7868 = sst [smem:[#allocation56_spill]] %s7823_s4 }
   0x6   :  { %7869 = sst [smem:[#allocation57_spill]] %s7824_s5 }
   0x7   :  { %7870 = sst [smem:[#allocation58_spill]] %s7825_s6 }
   0x8   :  { %7871 = sst [smem:[#allocation59_spill]] %s7826_s7 }
   0x9   :  { %7872 = sst [smem:[#allocation60_spill]] %s7835_s16 }
   0xa   :  { %7873 = sst [smem:[#allocation61_spill]] %s7837_s18 }
   0xb   :  { %7874 = sst [smem:[#allocation62_spill]] %s7838_s19 }
   0xc   :  { %24 = vsyncpa [#allocation3], 0 }
   0xd   :  { %26 = vsyncpa [#allocation3 + $0x1], 0 }
   0xe   :  { %27 = vsyncpa [#allocation6], 0 }
   0xf   :  { %28 = vsyncpa [#allocation9], 0 }
  0x10   :  { %29 = vsyncpa [#allocation12], 0 }
  0x11   :  { %30 = vsyncpa [#allocation15], 0 }
  0x12   :  { %31 = vsyncpa [#allocation18], 0 }
  0x13   :  { %32 = vsyncpa [#allocation21], 0 }
  0x14   :  { %33 = vsyncpa [#allocation24], 0 }
  0x15   :  { %34 = vsyncpa [#allocation27], 0 }
  0x16   :  { %35 = vsyncpa [#allocation30], 0 }
  0x17   :  { %36 = vsyncpa [#allocation4], 0 }
  0x18   :  { %38 = vsyncpa [#allocation4 + $0x1], 0  ;;  %s6936_s0 = smov 0   ;;  %s6938_s30 = smov 0  }
  0x19   :  { %s6940_s20 = smov 0   ;;  %s6942_s21 = smov 0  }
  0x1a   :  { %s6944_s1 = smov 0   ;;  %s6946_s22 = smov 0  }
  0x1b LB: > { %7875 = sst [smem:[#allocation44_spill]] %s6785_s0  ;;  %s7843_s2 = sadd.s32 4294967295, %s6805_s22   ;;  %s6805_s22 = sphi %s6946_s22, %s44_s22   ;;  %s6801_s1 = sphi %s6944_s1, %s7936_s1   ;;  %s6797_s21 = sphi %s6942_s21, %s7933_s21   ;;  %s6793_s20 = sphi %s6940_s20, %s7935_s20   ;;  %s6789_s30 = sphi %s6938_s30, %s7934_s30   ;;  %s6785_s0 = sphi %s6936_s0, %s7930_s0  }
  0x1c   : > { %7876 = sst [smem:[#allocation45_spill]] %s6789_s30  ;;  %p4576_p0 = scmp.ge.s32.totalorder %s6805_s22, 1 }
  0x1d   : > { %7877 = sst [smem:[#allocation46_spill]] %s6793_s20  ;;  %p6970_p1 = scmp.eq.s32.totalorder %s7843_s2, 0 }
  0x1e   : > { %7878 = sst [smem:[#allocation47_spill]] %s6797_s21  ;;  %p493_p2 = scmp.lt.s32.totalorder %s6805_s22, 3 }
  0x1f   : > { %7879 = sst [smem:[#allocation48_spill]] %s6801_s1  ;;  %s6807_s25 = smov [#allocation5]  }
  0x20   : > { %7880 = sst [smem:[#allocation49_spill]] %s6805_s22  ;;  %p6975_p3 = pnand %p4576_p0, %p493_p2 }
  0x21   : > { %s7881_s23 = scalar_select %p6970_p1, 1, 0 }
  0x22   : > { %s7883_s24 = scalar_select %p6975_p3, 1, 0 }
  0x23   : > { %7882 = sst [smem:[#allocation50_spill]] %s7881_s23  ;;  %s505_s3 = sshll.u32 %s6807_s25, 4  ;;  %s6979_s3 = int_to_ptr.vmem [resolvable:$true] %s505_s3 }
  0x24   : > { %7884 = sst [smem:[#allocation51_spill]] %s7883_s24  ;;  %p5761_p4 = pneg %p6975_p3 }
  0x25   : > { %s6808_s27 = smov [#allocation8]   ;;  %s6809_s29 = smov [#allocation11]  }
  0x26   : > { %p6986_p6 = pnand %p5761_p4, %p6970_p1  ;;  %s531_s28 = sshll.u32 %s6808_s27, 4  ;;  %s6990_s28 = int_to_ptr.vmem [resolvable:$true] %s531_s28 }
  0x27   : > { %s6992_s2 = sshll.u32 %s6809_s29, 4  ;;  %s7886_s21 = sld [smem:[#allocation53_spill]]  ;;  %s558_s2 = int_to_ptr.vmem [resolvable:$true] %s6992_s2 }
  0x28   : > { %p7002_p8 = pneg %p6986_p6 }
  0x2d   : > { %s7887_s18 = smov %s7886_s21  ;;  %s6153_s0 = scalar_lea.hbm %s7886_s21, 1024 }
  0x2e   : > { %p6154_p7 = scmp.ne.s32.totalorder %s7887_s18, %s6153_s0  ;;  %p6160_p11 = scmp.lt.u32.totalorder %s6153_s0, %s7887_s18 }
  0x30   : > { %p6156_p9 = pnand %p7002_p8, %p6154_p7 }
  0x32   : > { %p6157_p10 = pneg %p6156_p9 }
  0x34   : > { %p6162_p12 = pnand %p6160_p11, %p6157_p10 }
  0x36   : > { %6165 = shalt.err (!%p6162_p12)
}
  0x37   : > { %s6166_s19 = scalar_lea.vmem %s6979_s3, 1024  ;;  %p6174_p4 = scmp.lt.s32.totalorder %s6979_s3, %s6979_s3 }
  0x38   : > { %p6167_p13 = scmp.ne.s32.totalorder %s6979_s3, %s6166_s19  ;;  %p6175_p5 = scmp.lt.s32.totalorder %s6166_s19, %s6166_s19 }
  0x3a   : > { %p6169_p0 = pnand %p6167_p13, %p7002_p8  ;;  %p6176_p7 = por %p6175_p5, %p6174_p4 }
  0x3c   : > { %p6170_p2 = pneg %p6169_p0 }
  0x3e   : > { %p6177_p9 = pnand %p6176_p7, %p6170_p2 }
  0x40   : > { %6180 = shalt.err (!%p6177_p9)
}
  0x41   : > { %s7860_s30 = smov 64   ;;  %s6811_s0 = smov 4  }
  0x42   : > { %5764 = dma.hbm_to_vmem [thread:$0]  (!%p6986_p6), %s7887_s18, 1024, %s6979_s3, [#allocation6], %s7860_s30, %s7860_s30, %s6811_s0  }
  0x43   : > { %s7889_s29 = sld [smem:[#allocation55_spill]] }
  0x49   : > { %s6181_s19 = scalar_lea.hbm %s7889_s29, 3072 }
  0x4a   : > { %p6182_p5 = scmp.ne.s32.totalorder %s7889_s29, %s6181_s19  ;;  %p6188_p12 = scmp.lt.u32.totalorder %s6181_s19, %s7889_s29 }
  0x4c   : > { %p6184_p10 = pnand %p6182_p5, %p7002_p8 }
  0x4e   : > { %p6185_p11 = pneg %p6184_p10 }
  0x50   : > { %p6190_p13 = pnand %p6188_p12, %p6185_p11 }
  0x52   : > { %6193 = shalt.err (!%p6190_p13)
}
  0x53   : > { %s6194_s3 = scalar_lea.vmem %s6990_s28, 3072  ;;  %p6202_p7 = scmp.lt.s32.totalorder %s6990_s28, %s6990_s28 }
  0x54   : > { %p6195_p0 = scmp.ne.s32.totalorder %s6990_s28, %s6194_s3  ;;  %p6203_p9 = scmp.lt.s32.totalorder %s6194_s3, %s6194_s3 }
  0x56   : > { %p6197_p2 = pnand %p6195_p0, %p7002_p8  ;;  %p6204_p5 = por %p6203_p9, %p6202_p7 }
  0x58   : > { %p6198_p4 = pneg %p6197_p2 }
  0x5a   : > { %p6205_p10 = pnand %p6204_p5, %p6198_p4 }
  0x5c   : > { %6208 = shalt.err (!%p6205_p10)
}
  0x5d   : > { %5770 = dma.hbm_to_vmem [thread:$0]  (!%p6986_p6), %s7889_s29, 3072, %s6990_s28, [#allocation9], %s7860_s30, %s7860_s30, %s6811_s0  }
  0x5e   : > { %s7890_s5 = sld [smem:[#allocation57_spill]] }
  0x64   : > { %s6209_s21 = scalar_lea.hbm %s7890_s5, 3072 }
  0x65   : > { %p6210_p11 = scmp.ne.s32.totalorder %s7890_s5, %s6209_s21  ;;  %p6216_p0 = scmp.lt.u32.totalorder %s6209_s21, %s7890_s5 }
  0x67   : > { %p6212_p12 = pnand %p6210_p11, %p7002_p8 }
  0x69   : > { %p6213_p13 = pneg %p6212_p12 }
  0x6b   : > { %p6218_p2 = pnand %p6216_p0, %p6213_p13 }
  0x6d   : > { %6221 = shalt.err (!%p6218_p2)
}
  0x6e   : > { %s6222_s3 = scalar_lea.vmem %s558_s2, 3072  ;;  %p6230_p5 = scmp.lt.s32.totalorder %s558_s2, %s558_s2 }
  0x6f   : > { %p6223_p4 = scmp.ne.s32.totalorder %s558_s2, %s6222_s3  ;;  %p6231_p10 = scmp.lt.s32.totalorder %s6222_s3, %s6222_s3 }
  0x71   : > { %p6225_p7 = pnand %p6223_p4, %p7002_p8  ;;  %p6232_p3 = por %p6231_p10, %p6230_p5 }
  0x73   : > { %p6226_p9 = pneg %p6225_p7 }
  0x75   : > { %p6233_p1 = pnand %p6232_p3, %p6226_p9 }
  0x77   : > { %6236 = shalt.err (!%p6233_p1)
}
  0x78   : > { %5776 = dma.hbm_to_vmem [thread:$0]  (!%p6986_p6), %s7890_s5, 3072, %s558_s2, [#allocation12], %s7860_s30, %s7860_s30, %s6811_s0  }
  0x79   : > { %s6812_s20 = smov [#allocation14]   ;;  %s6813_s22 = smov [#allocation17]  }
  0x7a   : > { %s583_s1 = sshll.u32 %s6812_s20, 4  ;;  %s609_s21 = sshll.u32 %s6813_s22, 4  ;;  %s584_s1 = int_to_ptr.vmem [resolvable:$true] %s583_s1  ;;  %s610_s21 = int_to_ptr.vmem [resolvable:$true] %s609_s21 }
  0x7b   : > { %s7891_s7 = sld [smem:[#allocation59_spill]] }
  0x81   : > { %s6237_s27 = scalar_lea.hbm %s7891_s7, 3072 }
  0x82   : > { %p6238_p1 = scmp.ne.s32.totalorder %s7891_s7, %s6237_s27  ;;  %p6244_p12 = scmp.lt.u32.totalorder %s6237_s27, %s7891_s7 }
  0x84   : > { %p6240_p3 = pnand %p6238_p1, %p7002_p8 }
  0x86   : > { %p6241_p11 = pneg %p6240_p3 }
  0x88   : > { %p6246_p13 = pnand %p6244_p12, %p6241_p11 }
  0x8a   : > { %6249 = shalt.err (!%p6246_p13)
}
  0x8b   : > { %s6250_s2 = scalar_lea.vmem %s584_s1, 3072  ;;  %p6258_p7 = scmp.lt.s32.totalorder %s584_s1, %s584_s1 }
  0x8c   : > { %p6251_p0 = scmp.ne.s32.totalorder %s584_s1, %s6250_s2  ;;  %p6259_p9 = scmp.lt.s32.totalorder %s6250_s2, %s6250_s2 }
  0x8e   : > { %p6253_p2 = pnand %p6251_p0, %p7002_p8  ;;  %p6260_p5 = por %p6259_p9, %p6258_p7 }
  0x90   : > { %p6254_p4 = pneg %p6253_p2 }
  0x92   : > { %p6261_p10 = pnand %p6260_p5, %p6254_p4 }
  0x94   : > { %6264 = shalt.err (!%p6261_p10)
}
  0x95   : > { %5782 = dma.hbm_to_vmem [thread:$0]  (!%p6986_p6), %s7891_s7, 3072, %s584_s1, [#allocation15], %s7860_s30, %s7860_s30, %s6811_s0  }
  0x96   : > { %s6265_s24 = scalar_lea.hbm %s7828_s9, 3072 }
  0x97   : > { %p6266_p1 = scmp.ne.s32.totalorder %s7828_s9, %s6265_s24  ;;  %p6272_p12 = scmp.lt.u32.totalorder %s6265_s24, %s7828_s9 }
  0x99   : > { %p6268_p3 = pnand %p6266_p1, %p7002_p8 }
  0x9b   : > { %p6269_p11 = pneg %p6268_p3 }
  0x9d   : > { %p6274_p13 = pnand %p6272_p12, %p6269_p11 }
  0x9f   : > { %6277 = shalt.err (!%p6274_p13)
}
  0xa0   : > { %s6278_s28 = scalar_lea.vmem %s610_s21, 3072  ;;  %p6286_p7 = scmp.lt.s32.totalorder %s610_s21, %s610_s21 }
  0xa1   : > { %p6279_p0 = scmp.ne.s32.totalorder %s610_s21, %s6278_s28  ;;  %p6287_p9 = scmp.lt.s32.totalorder %s6278_s28, %s6278_s28 }
  0xa3   : > { %p6281_p2 = pnand %p6279_p0, %p7002_p8  ;;  %p6288_p5 = por %p6287_p9, %p6286_p7 }
  0xa5   : > { %p6282_p4 = pneg %p6281_p2 }
  0xa7   : > { %p6289_p10 = pnand %p6288_p5, %p6282_p4 }
  0xa9   : > { %6292 = shalt.err (!%p6289_p10)
}
  0xaa   : > { %5788 = dma.hbm_to_vmem [thread:$0]  (!%p6986_p6), %s7828_s9, 3072, %s610_s21, [#allocation18], %s7860_s30, %s7860_s30, %s6811_s0  }
  0xab   : > { %s6814_s18 = smov [#allocation20]   ;;  %s6815_s20 = smov [#allocation23]  }
  0xac   : > { %s634_s16 = sshll.u32 %s6814_s18, 4  ;;  %s656_s22 = sshll.u32 %s6815_s20, 4  ;;  %s635_s16 = int_to_ptr.vmem [resolvable:$true] %s634_s16  ;;  %s657_s22 = int_to_ptr.vmem [resolvable:$true] %s656_s22 }
  0xad   : > { %s6293_s27 = scalar_lea.hbm %s7830_s11, 16 }
  0xae   : > { %p6294_p1 = scmp.ne.s32.totalorder %s7830_s11, %s6293_s27  ;;  %p6300_p12 = scmp.lt.u32.totalorder %s6293_s27, %s7830_s11 }
  0xb0   : > { %p6296_p3 = pnand %p6294_p1, %p7002_p8 }
  0xb2   : > { %p6297_p11 = pneg %p6296_p3 }
  0xb4   : > { %p6302_p13 = pnand %p6300_p12, %p6297_p11 }
  0xb6   : > { %6305 = shalt.err (!%p6302_p13)
}
  0xb7   : > { %s6306_s21 = scalar_lea.vmem %s635_s16, 16  ;;  %s6313_s2 = scalar_lea.vmem %s635_s16, 32 }
  0xb8   : > { %p6307_p0 = scmp.ne.s32.totalorder %s635_s16, %s6306_s21  ;;  %p6314_p7 = scmp.lt.s32.totalorder %s635_s16, %s635_s16 }
  0xb9   : > { %p6315_p9 = scmp.lt.s32.totalorder %s6313_s2, %s6306_s21 }
  0xba   : > { %p6309_p2 = pnand %p6307_p0, %p7002_p8 }
  0xbb   : > { %p6316_p5 = por %p6315_p9, %p6314_p7 }
  0xbc   : > { %p6310_p4 = pneg %p6309_p2 }
  0xbe   : > { %p6317_p10 = pnand %p6316_p5, %p6310_p4 }
  0xc0   : > { %6320 = shalt.err (!%p6317_p10)
}
  0xc1   : > { %5794 = dma.hbm_to_vmem [thread:$0]  (!%p6986_p6), %s7830_s11, 16, %s635_s16, [#allocation21]  }
  0xc2   : > { %s6321_s27 = scalar_lea.hbm %s7832_s13, 16 }
  0xc3   : > { %p6322_p1 = scmp.ne.s32.totalorder %s7832_s13, %s6321_s27  ;;  %p6328_p12 = scmp.lt.u32.totalorder %s6321_s27, %s7832_s13 }
  0xc5   : > { %p6324_p3 = pnand %p6322_p1, %p7002_p8 }
  0xc7   : > { %p6325_p11 = pneg %p6324_p3 }
  0xc9   : > { %p6330_p13 = pnand %p6328_p12, %p6325_p11 }
  0xcb   : > { %6333 = shalt.err (!%p6330_p13)
}
  0xcc   : > { %s6334_s21 = scalar_lea.vmem %s657_s22, 16  ;;  %s6341_s16 = scalar_lea.vmem %s657_s22, 32 }
  0xcd   : > { %p6335_p0 = scmp.ne.s32.totalorder %s657_s22, %s6334_s21  ;;  %p6342_p7 = scmp.lt.s32.totalorder %s657_s22, %s657_s22 }
  0xce   : > { %p6343_p9 = scmp.lt.s32.totalorder %s6341_s16, %s6334_s21 }
  0xcf   : > { %p6337_p2 = pnand %p6335_p0, %p7002_p8 }
  0xd0   : > { %p6344_p5 = por %p6343_p9, %p6342_p7 }
  0xd1   : > { %p6338_p4 = pneg %p6337_p2 }
  0xd3   : > { %p6345_p10 = pnand %p6344_p5, %p6338_p4 }
  0xd5   : > { %6348 = shalt.err (!%p6345_p10)
}
  0xd6   : > { %5800 = dma.hbm_to_vmem [thread:$0]  (!%p6986_p6), %s7832_s13, 16, %s657_s22, [#allocation24]  }
  0xd7   : > { %s6816_s20 = smov [#allocation26]   ;;  %s6817_s25 = smov [#allocation29]  }
  0xd8   : > { %s678_s24 = sshll.u32 %s6816_s20, 4  ;;  %s700_s27 = sshll.u32 %s6817_s25, 4  ;;  %s679_s24 = int_to_ptr.vmem [resolvable:$true] %s678_s24  ;;  %s701_s27 = int_to_ptr.vmem [resolvable:$true] %s700_s27 }
  0xd9   : > { %s6349_s28 = scalar_lea.hbm %s7834_s15, 16 }
  0xda   : > { %p6350_p1 = scmp.ne.s32.totalorder %s7834_s15, %s6349_s28  ;;  %p6356_p12 = scmp.lt.u32.totalorder %s6349_s28, %s7834_s15 }
  0xdc   : > { %p6352_p3 = pnand %p6350_p1, %p7002_p8 }
  0xde   : > { %p6353_p11 = pneg %p6352_p3 }
  0xe0   : > { %p6358_p13 = pnand %p6356_p12, %p6353_p11 }
  0xe2   : > { %6361 = shalt.err (!%p6358_p13)
}
  0xe3   : > { %s6362_s22 = scalar_lea.vmem %s679_s24, 16  ;;  %s6369_s18 = scalar_lea.vmem %s679_s24, 32 }
  0xe4   : > { %p6363_p0 = scmp.ne.s32.totalorder %s679_s24, %s6362_s22  ;;  %p6370_p7 = scmp.lt.s32.totalorder %s679_s24, %s679_s24 }
  0xe5   : > { %p6371_p9 = scmp.lt.s32.totalorder %s6369_s18, %s6362_s22 }
  0xe6   : > { %p6365_p2 = pnand %p6363_p0, %p7002_p8 }
  0xe7   : > { %p6372_p5 = por %p6371_p9, %p6370_p7 }
  0xe8   : > { %p6366_p4 = pneg %p6365_p2 }
  0xea   : > { %p6373_p10 = pnand %p6372_p5, %p6366_p4 }
  0xec   : > { %6376 = shalt.err (!%p6373_p10)
}
  0xed   : > { %5806 = dma.hbm_to_vmem [thread:$0]  (!%p6986_p6), %s7834_s15, 16, %s679_s24, [#allocation27]  }
  0xee   : > { %s6377_s28 = scalar_lea.hbm %s7836_s17, 16 }
  0xef   : > { %p6378_p1 = scmp.ne.s32.totalorder %s7836_s17, %s6377_s28  ;;  %p6384_p12 = scmp.lt.u32.totalorder %s6377_s28, %s7836_s17 }
  0xf1   : > { %p6380_p3 = pnand %p6378_p1, %p7002_p8 }
  0xf3   : > { %p6381_p11 = pneg %p6380_p3 }
  0xf5   : > { %p6386_p13 = pnand %p6384_p12, %p6381_p11 }
  0xf7   : > { %6389 = shalt.err (!%p6386_p13)
}
  0xf8   : > { %s6390_s22 = scalar_lea.vmem %s701_s27, 16  ;;  %s6397_s24 = scalar_lea.vmem %s701_s27, 32 }
  0xf9   : > { %p6391_p0 = scmp.ne.s32.totalorder %s701_s27, %s6390_s22  ;;  %p6398_p7 = scmp.lt.s32.totalorder %s701_s27, %s701_s27 }
  0xfa   : > { %p6399_p9 = scmp.lt.s32.totalorder %s6397_s24, %s6390_s22 }
  0xfb   : > { %p6393_p2 = pnand %p6391_p0, %p7002_p8 }
  0xfc   : > { %p6400_p5 = por %p6399_p9, %p6398_p7 }
  0xfd   : > { %p6394_p4 = pneg %p6393_p2 }
  0xff   : > { %p6401_p10 = pnand %p6400_p5, %p6394_p4 }
 0x101   : > { %6404 = shalt.err (!%p6401_p10)
}
 0x102   : > { %5812 = dma.hbm_to_vmem [thread:$0]  (!%p6986_p6), %s7836_s17, 16, %s701_s27, [#allocation30]  }
 0x103   : > { %s6818_s25 = smov [#allocation7]   ;;  %s6819_s3 = smov [#allocation10]  }
 0x104   : > { %s518_s19 = sshll.u32 %s6818_s25, 4  ;;  %s544_s28 = sshll.u32 %s6819_s3, 4  ;;  %s519_s19 = int_to_ptr.vmem [resolvable:$true] %s518_s19  ;;  %s545_s28 = int_to_ptr.vmem [resolvable:$true] %s544_s28 }
 0x105   : > { %s7892_s16 = sld [smem:[#allocation54_spill]] }
 0x10b   : > { %s6405_s2 = scalar_lea.hbm %s7892_s16, 1024 }
 0x10c   : > { %p6406_p1 = scmp.ne.s32.totalorder %s7892_s16, %s6405_s2  ;;  %p6412_p12 = scmp.lt.u32.totalorder %s6405_s2, %s7892_s16 }
 0x10e   : > { %p6408_p3 = pnand %p6406_p1, %p7002_p8 }
 0x110   : > { %p6409_p11 = pneg %p6408_p3 }
 0x112   : > { %p6414_p13 = pnand %p6412_p12, %p6409_p11 }
 0x114   : > { %6417 = shalt.err (!%p6414_p13)
}
 0x115   : > { %s6418_s27 = scalar_lea.vmem %s519_s19, 1024  ;;  %p6426_p7 = scmp.lt.s32.totalorder %s519_s19, %s519_s19 }
 0x116   : > { %p6419_p0 = scmp.ne.s32.totalorder %s519_s19, %s6418_s27  ;;  %p6427_p9 = scmp.lt.s32.totalorder %s6418_s27, %s6418_s27 }
 0x118   : > { %p6421_p2 = pnand %p6419_p0, %p7002_p8  ;;  %p6428_p5 = por %p6427_p9, %p6426_p7 }
 0x11a   : > { %p6422_p4 = pneg %p6421_p2 }
 0x11c   : > { %p6429_p10 = pnand %p6428_p5, %p6422_p4 }
 0x11e   : > { %6432 = shalt.err (!%p6429_p10)
}
 0x11f   : > { %s7893_s20 = smov 64   ;;  %s7894_s4 = sld [smem:[#allocation56_spill]] }
 0x120   : > { %5767 = dma.hbm_to_vmem [thread:$0]  (!%p6986_p6), %s7892_s16, 1024, %s519_s19, [#allocation6], %s7893_s20, %s7893_s20, %s6811_s0  }
 0x125   : > { %s6433_s21 = scalar_lea.hbm %s7894_s4, 3072 }
 0x126   : > { %p6434_p1 = scmp.ne.s32.totalorder %s7894_s4, %s6433_s21  ;;  %p6440_p12 = scmp.lt.u32.totalorder %s6433_s21, %s7894_s4 }
 0x128   : > { %p6436_p3 = pnand %p6434_p1, %p7002_p8 }
 0x12a   : > { %p6437_p11 = pneg %p6436_p3 }
 0x12c   : > { %p6442_p13 = pnand %p6440_p12, %p6437_p11 }
 0x12e   : > { %6445 = shalt.err (!%p6442_p13)
}
 0x12f   : > { %s6446_s27 = scalar_lea.vmem %s545_s28, 3072  ;;  %p6454_p7 = scmp.lt.s32.totalorder %s545_s28, %s545_s28 }
 0x130   : > { %p6447_p0 = scmp.ne.s32.totalorder %s545_s28, %s6446_s27  ;;  %p6455_p9 = scmp.lt.s32.totalorder %s6446_s27, %s6446_s27 }
 0x132   : > { %p6449_p2 = pnand %p6447_p0, %p7002_p8  ;;  %p6456_p5 = por %p6455_p9, %p6454_p7 }
 0x134   : > { %p6450_p4 = pneg %p6449_p2 }
 0x136   : > { %p6457_p10 = pnand %p6456_p5, %p6450_p4 }
 0x138   : > { %6460 = shalt.err (!%p6457_p10)
}
 0x139   : > { %5773 = dma.hbm_to_vmem [thread:$0]  (!%p6986_p6), %s7894_s4, 3072, %s545_s28, [#allocation9], %s7893_s20, %s7893_s20, %s6811_s0  }
 0x13a   : > { %s6820_s25 = smov [#allocation13]   ;;  %s6821_s1 = smov [#allocation16]  }
 0x13b   : > { %s570_s3 = sshll.u32 %s6820_s25, 4  ;;  %s596_s21 = sshll.u32 %s6821_s1, 4  ;;  %s571_s3 = int_to_ptr.vmem [resolvable:$true] %s570_s3  ;;  %s597_s21 = int_to_ptr.vmem [resolvable:$true] %s596_s21 }
 0x13c   : > { %s7895_s6 = sld [smem:[#allocation58_spill]] }
 0x142   : > { %s6461_s24 = scalar_lea.hbm %s7895_s6, 7168 }
 0x143   : > { %p6462_p1 = scmp.ne.s32.totalorder %s7895_s6, %s6461_s24  ;;  %p6468_p12 = scmp.lt.u32.totalorder %s6461_s24, %s7895_s6 }
 0x145   : > { %p6464_p3 = pnand %p6462_p1, %p7002_p8 }
 0x147   : > { %p6465_p11 = pneg %p6464_p3 }
 0x149   : > { %p6470_p13 = pnand %p6468_p12, %p6465_p11 }
 0x14b   : > { %6473 = shalt.err (!%p6470_p13)
}
 0x14c   : > { %s6474_s28 = scalar_lea.vmem %s571_s3, 7168  ;;  %p6482_p7 = scmp.lt.s32.totalorder %s571_s3, %s571_s3 }
 0x14d   : > { %p6475_p0 = scmp.ne.s32.totalorder %s571_s3, %s6474_s28  ;;  %p6483_p9 = scmp.lt.s32.totalorder %s6474_s28, %s6474_s28 }
 0x14f   : > { %p6477_p2 = pnand %p6475_p0, %p7002_p8  ;;  %p6484_p5 = por %p6483_p9, %p6482_p7 }
 0x151   : > { %p6478_p4 = pneg %p6477_p2 }
 0x153   : > { %p6485_p10 = pnand %p6484_p5, %p6478_p4 }
 0x155   : > { %6488 = shalt.err (!%p6485_p10)
}
 0x156   : > { %5779 = dma.hbm_to_vmem [thread:$0]  (!%p6986_p6), %s7895_s6, 7168, %s571_s3, [#allocation12], %s7893_s20, %s7893_s20, %s6811_s0  }
 0x157   : > { %s6489_s2 = scalar_lea.hbm %s7827_s8, 3072 }
 0x158   : > { %p6490_p1 = scmp.ne.s32.totalorder %s7827_s8, %s6489_s2  ;;  %p6496_p12 = scmp.lt.u32.totalorder %s6489_s2, %s7827_s8 }
 0x15a   : > { %p6492_p3 = pnand %p6490_p1, %p7002_p8 }
 0x15c   : > { %p6493_p11 = pneg %p6492_p3 }
 0x15e   : > { %p6498_p13 = pnand %p6496_p12, %p6493_p11 }
 0x160   : > { %6501 = shalt.err (!%p6498_p13)
}
 0x161   : > { %s6502_s19 = scalar_lea.vmem %s597_s21, 3072  ;;  %p6510_p7 = scmp.lt.s32.totalorder %s597_s21, %s597_s21 }
 0x162   : > { %p6503_p0 = scmp.ne.s32.totalorder %s597_s21, %s6502_s19  ;;  %p6511_p9 = scmp.lt.s32.totalorder %s6502_s19, %s6502_s19 }
 0x164   : > { %p6505_p2 = pnand %p6503_p0, %p7002_p8  ;;  %p6512_p5 = por %p6511_p9, %p6510_p7 }
 0x166   : > { %p6506_p4 = pneg %p6505_p2 }
 0x168   : > { %p6513_p10 = pnand %p6512_p5, %p6506_p4 }
 0x16a   : > { %6516 = shalt.err (!%p6513_p10)
}
 0x16b   : > { %5785 = dma.hbm_to_vmem [thread:$0]  (!%p6986_p6), %s7827_s8, 3072, %s597_s21, [#allocation15], %s7893_s20, %s7893_s20, %s6811_s0  }
 0x16c   : > { %s6822_s5 = smov [#allocation19]   ;;  %s6823_s25 = smov [#allocation22]  }
 0x16d   : > { %s623_s30 = sshll.u32 %s6822_s5, 4  ;;  %s645_s1 = sshll.u32 %s6823_s25, 4  ;;  %s624_s30 = int_to_ptr.vmem [resolvable:$true] %s623_s30  ;;  %s646_s1 = int_to_ptr.vmem [resolvable:$true] %s645_s1 }
 0x16e   : > { %s6517_s24 = scalar_lea.hbm %s7829_s10, 16 }
 0x16f   : > { %p6518_p1 = scmp.ne.s32.totalorder %s7829_s10, %s6517_s24  ;;  %p6524_p12 = scmp.lt.u32.totalorder %s6517_s24, %s7829_s10 }
 0x171   : > { %p6520_p3 = pnand %p6518_p1, %p7002_p8 }
 0x173   : > { %p6521_p11 = pneg %p6520_p3 }
 0x175   : > { %p6526_p13 = pnand %p6524_p12, %p6521_p11 }
 0x177   : > { %6529 = shalt.err (!%p6526_p13)
}
 0x178   : > { %s6530_s0 = scalar_lea.vmem %s624_s30, 16  ;;  %s6537_s20 = scalar_lea.vmem %s624_s30, 32 }
 0x179   : > { %p6531_p0 = scmp.ne.s32.totalorder %s624_s30, %s6530_s0  ;;  %p6538_p7 = scmp.lt.s32.totalorder %s624_s30, %s624_s30 }
 0x17a   : > { %p6539_p9 = scmp.lt.s32.totalorder %s6537_s20, %s6530_s0 }
 0x17b   : > { %p6533_p2 = pnand %p6531_p0, %p7002_p8 }
 0x17c   : > { %p6540_p5 = por %p6539_p9, %p6538_p7 }
 0x17d   : > { %p6534_p4 = pneg %p6533_p2 }
 0x17f   : > { %p6541_p10 = pnand %p6540_p5, %p6534_p4 }
 0x181   : > { %6544 = shalt.err (!%p6541_p10)
}
 0x182   : > { %5791 = dma.hbm_to_vmem [thread:$0]  (!%p6986_p6), %s7829_s10, 16, %s624_s30, [#allocation18]  }
 0x183   : > { %s6545_s2 = scalar_lea.hbm %s7831_s12, 16 }
 0x184   : > { %p6546_p1 = scmp.ne.s32.totalorder %s7831_s12, %s6545_s2  ;;  %p6552_p12 = scmp.lt.u32.totalorder %s6545_s2, %s7831_s12 }
 0x186   : > { %p6548_p3 = pnand %p6546_p1, %p7002_p8 }
 0x188   : > { %p6549_p11 = pneg %p6548_p3 }
 0x18a   : > { %p6554_p13 = pnand %p6552_p12, %p6549_p11 }
 0x18c   : > { %6557 = shalt.err (!%p6554_p13)
}
 0x18d   : > { %s6558_s19 = scalar_lea.vmem %s646_s1, 16  ;;  %s6565_s30 = scalar_lea.vmem %s646_s1, 32 }
 0x18e   : > { %p6559_p0 = scmp.ne.s32.totalorder %s646_s1, %s6558_s19  ;;  %p6566_p7 = scmp.lt.s32.totalorder %s646_s1, %s646_s1 }
 0x18f   : > { %p6567_p9 = scmp.lt.s32.totalorder %s6565_s30, %s6558_s19 }
 0x190   : > { %p6561_p2 = pnand %p6559_p0, %p7002_p8 }
 0x191   : > { %p6568_p5 = por %p6567_p9, %p6566_p7 }
 0x192   : > { %p6562_p4 = pneg %p6561_p2 }
 0x194   : > { %p6569_p10 = pnand %p6568_p5, %p6562_p4 }
 0x196   : > { %6572 = shalt.err (!%p6569_p10)
}
 0x197   : > { %5797 = dma.hbm_to_vmem [thread:$0]  (!%p6986_p6), %s7831_s12, 16, %s646_s1, [#allocation21]  }
 0x198   : > { %s6824_s20 = smov [#allocation25]   ;;  %s6825_s28 = smov [#allocation28]  }
 0x199   : > { %s667_s21 = sshll.u32 %s6824_s20, 4  ;;  %s689_s5 = sshll.u32 %s6825_s28, 4  ;;  %s668_s21 = int_to_ptr.vmem [resolvable:$true] %s667_s21  ;;  %s690_s5 = int_to_ptr.vmem [resolvable:$true] %s689_s5 }
 0x19a   : > { %s6573_s22 = scalar_lea.hbm %s7833_s14, 16 }
 0x19b   : > { %p6574_p1 = scmp.ne.s32.totalorder %s7833_s14, %s6573_s22  ;;  %p6580_p12 = scmp.lt.u32.totalorder %s6573_s22, %s7833_s14 }
 0x19d   : > { %p6576_p3 = pnand %p6574_p1, %p7002_p8 }
 0x19f   : > { %p6577_p11 = pneg %p6576_p3 }
 0x1a1   : > { %p6582_p13 = pnand %p6580_p12, %p6577_p11 }
 0x1a3   : > { %6585 = shalt.err (!%p6582_p13)
}
 0x1a4   : > { %s6586_s1 = scalar_lea.vmem %s668_s21, 16  ;;  %s6593_s30 = scalar_lea.vmem %s668_s21, 32 }
 0x1a5   : > { %p6587_p0 = scmp.ne.s32.totalorder %s668_s21, %s6586_s1  ;;  %p6594_p7 = scmp.lt.s32.totalorder %s668_s21, %s668_s21 }
 0x1a6   : > { %p6595_p9 = scmp.lt.s32.totalorder %s6593_s30, %s6586_s1 }
 0x1a7   : > { %p6589_p2 = pnand %p6587_p0, %p7002_p8 }
 0x1a8   : > { %p6596_p5 = por %p6595_p9, %p6594_p7 }
 0x1a9   : > { %p6590_p4 = pneg %p6589_p2 }
 0x1ab   : > { %p6597_p10 = pnand %p6596_p5, %p6590_p4 }
 0x1ad   : > { %6600 = shalt.err (!%p6597_p10)
}
 0x1ae   : > { %5803 = dma.hbm_to_vmem [thread:$0]  (!%p6986_p6), %s7833_s14, 16, %s668_s21, [#allocation24]  }
 0x1af   : > { %s7896_s25 = sld [smem:[#allocation60_spill]] }
 0x1b5   : > { %s6601_s2 = scalar_lea.hbm %s7896_s25, 16 }
 0x1b6   : > { %p6602_p1 = scmp.ne.s32.totalorder %s7896_s25, %s6601_s2  ;;  %p6608_p12 = scmp.lt.u32.totalorder %s6601_s2, %s7896_s25 }
 0x1b8   : > { %p6604_p3 = pnand %p6602_p1, %p7002_p8 }
 0x1ba   : > { %p6605_p11 = pneg %p6604_p3 }
 0x1bc   : > { %p6610_p13 = pnand %p6608_p12, %p6605_p11 }
 0x1be   : > { %6613 = shalt.err (!%p6610_p13)
}
 0x1bf   : > { %s6614_s19 = scalar_lea.vmem %s690_s5, 16  ;;  %s6621_s21 = scalar_lea.vmem %s690_s5, 32 }
 0x1c0   : > { %p6615_p0 = scmp.ne.s32.totalorder %s690_s5, %s6614_s19  ;;  %p6622_p7 = scmp.lt.s32.totalorder %s690_s5, %s690_s5 }
 0x1c1   : > { %p6623_p9 = scmp.lt.s32.totalorder %s6621_s21, %s6614_s19 }
 0x1c2   : > { %p6617_p2 = pnand %p6615_p0, %p7002_p8 }
 0x1c3   : > { %p6624_p5 = por %p6623_p9, %p6622_p7 }
 0x1c4   : > { %p6618_p4 = pneg %p6617_p2 }
 0x1c6   : > { %p6625_p10 = pnand %p6624_p5, %p6618_p4 }
 0x1c8   : > { %6628 = shalt.err (!%p6625_p10)
}
 0x1c9   : > { %5809 = dma.hbm_to_vmem [thread:$0]  (!%p6986_p6), %s7896_s25, 16, %s690_s5, [#allocation27]  }
 0x1ca   : > { %s6826_s3 = smov [#allocation31]   ;;  %s7897_s2 = sld [smem:[#allocation61_spill]] }
 0x1cb   : > { %s711_s0 = sshll.u32 %s6826_s3, 4  ;;  %s712_s0 = int_to_ptr.vmem [resolvable:$true] %s711_s0 }
 0x1d0   : > { %s6629_s22 = scalar_lea.hbm %s7897_s2, 16 }
 0x1d1   : > { %p6630_p1 = scmp.ne.s32.totalorder %s7897_s2, %s6629_s22  ;;  %p6636_p12 = scmp.lt.u32.totalorder %s6629_s22, %s7897_s2 }
 0x1d3   : > { %p6632_p3 = pnand %p6630_p1, %p7002_p8 }
 0x1d5   : > { %p6633_p11 = pneg %p6632_p3 }
 0x1d7   : > { %p6638_p13 = pnand %p6636_p12, %p6633_p11 }
 0x1d9   : > { %6641 = shalt.err (!%p6638_p13)
}
 0x1da   : > { %s6642_s5 = scalar_lea.vmem %s712_s0, 16  ;;  %s6649_s21 = scalar_lea.vmem %s712_s0, 32 }
 0x1db   : > { %p6643_p0 = scmp.ne.s32.totalorder %s712_s0, %s6642_s5  ;;  %p6650_p7 = scmp.lt.s32.totalorder %s712_s0, %s712_s0 }
 0x1dc   : > { %p6651_p9 = scmp.lt.s32.totalorder %s6649_s21, %s6642_s5 }
 0x1dd   : > { %p6645_p2 = pnand %p6643_p0, %p7002_p8 }
 0x1de   : > { %p6652_p5 = por %p6651_p9, %p6650_p7 }
 0x1df   : > { %p6646_p4 = pneg %p6645_p2 }
 0x1e1   : > { %p6653_p10 = pnand %p6652_p5, %p6646_p4 }
 0x1e3   : > { %6656 = shalt.err (!%p6653_p10)
}
 0x1e4   : > { %s7898_s3 = sld [smem:[#allocation49_spill]]  ;;  %s7899_s20 = sld [smem:[#allocation48_spill]] }
 0x1e5   : > { %s7900_s28 = sld [smem:[#allocation46_spill]]  ;;  %s7901_s22 = sld [smem:[#allocation45_spill]] }
 0x1e6   : > { %s7902_s23 = sld [smem:[#allocation44_spill]]  ;;  %s7903_s24 = sld [smem:[#allocation50_spill]] }
 0x1e7   : > { %5815 = dma.hbm_to_vmem [thread:$0]  (!%p6986_p6), %s7897_s2, 16, %s712_s0, [#allocation30]  }
 0x1e8   : > { %s7910_s4 = sld [smem:[#allocation52_spill]] }
 0x1ea   : > { %s4575_s18 = sadd.s32 4294967294, %s7898_s3   ;;  %s56_s27 = sadd.s32 1, %s7899_s20 }
 0x1eb   : > { %p58_p8 = scmp.ge.s32.totalorder %s56_s27, 2  ;;  %s63_s26 = sadd.s32 1, %s7900_s28 }
 0x1ec   : > { %p70_p1 = scmp.ne.s32.totalorder %s7900_s28, %s7901_s22  ;;  %p71_p3 = scmp.eq.s32.totalorder %s7898_s3, 0 }
 0x1ed   : > { %s7938_s27 = smov (%p58_p8, %s56_s27), 0  ;;  %p76_p12 = scmp.ne.s32.totalorder %s7901_s22, %s7902_s23 }
 0x1ee   : > { %p7370_p11 = por %p71_p3, %p70_p1  ;;  %s60_s0 = ssub.s32 %s7899_s20, %s7938_s27 }
 0x1ef   : > { %s7905_s5 = sadd.s32 4294967295, %s7898_s3   ;;  %p61_p13 = scmp.eq.s32.totalorder %s60_s0, 0 }
 0x1f0   : > { %p480_p6 = scmp.eq.s32.totalorder %s7905_s5, 1  ;;  %p7906_p0 = scmp.ne.s32.totalorder %s7903_s24, 0 }
 0x1f1   : > { %p486_p7 = scmp.eq.s32.totalorder %s4575_s18, 1  ;;  %p5842_p5 = scmp.lt.s32.totalorder %s7898_s3, 2 }
 0x1f2   : > { %p7382_p2 = por %p7906_p0, %p76_p12  ;;  %p7386_p4 = por %p480_p6, %p70_p1 }
 0x1f3   : > { %s7391_s30 = scalar_select %p61_p13, %s7900_s28, %s63_s26  }
 0x1f4   : > { %s7908_s1 = scalar_select %p7386_p4, 1, 0 }
 0x1f5   : > { %p7393_p9 = por %p486_p7, %p76_p12  ;;  %s722_s22 = sand.u32 1, %s7900_s28  }
 0x1f6   : > { %s4880_s23 = sshll.u32 %s7899_s20, 9  ;;  %s4596_s0 = sshll.u32 %s722_s22, 5 }
 0x1f7   : > { %s7909_s2 = scalar_select %p7393_p9, 1, 0 }
 0x1f8   : > { %s7403_s6 = scalar_lea.hbm %s7910_s4, %s4880_s23  ;;  %s726_s18 = scalar_lea.vmem [#allocation2], %s4596_s0 }
 0x1f9   : > { %s733_s26 = sshll.u32 %s726_s18, 4  ;;  %p7407_p10 = pnand %p5842_p5, %p7370_p11  ;;  %s7411_s26 = int_to_ptr.vmem [resolvable:$true] %s733_s26 }
 0x1fa   : > { %s7413_s3 = scalar_lea.sflag [#allocation3], %s722_s22  ;;  %s6657_s20 = scalar_lea.hbm %s7403_s6, 512 }
 0x1fb   : > { %p6658_p8 = scmp.ne.s32.totalorder %s7403_s6, %s6657_s20  ;;  %p6659_p1 = pneg %p7407_p10 }
 0x1fc   : > { %s6662_s23 = scalar_lea.hbm %s7910_s4, 1024  ;;  %p6663_p11 = scmp.lt.u32.totalorder %s7403_s6, %s7910_s4 }
 0x1fd   : > { %p6660_p3 = pnand %p6659_p1, %p6658_p8  ;;  %p6664_p6 = scmp.lt.u32.totalorder %s6662_s23, %s6657_s20 }
 0x1fe   : > { %p6666_p0 = scmp.lt.u32.totalorder %s6657_s20, %s7403_s6 }
 0x1ff   : > { %p6661_p12 = pneg %p6660_p3  ;;  %p6665_p13 = por %p6664_p6, %p6663_p11 }
 0x201   : > { %p6667_p7 = por %p6666_p0, %p6665_p13 }
 0x203   : > { %p6668_p5 = pnand %p6667_p7, %p6661_p12 }
 0x205   : > { %6671 = shalt.err (!%p6668_p5)
}
 0x206   : > { %s6672_s22 = scalar_lea.vmem %s7411_s26, 512  ;;  %s6827_s5 = smov [#allocation2]  }
 0x207   : > { %p6673_p8 = scmp.ne.s32.totalorder %s7411_s26, %s6672_s22  ;;  %s6677_s18 = sshll.u32 %s6827_s5, 4  ;;  %s6678_s18 = int_to_ptr.vmem [resolvable:$false] %s6677_s18 }
 0x208   : > { %s6679_s28 = scalar_lea.vmem %s6678_s18, 1024  ;;  %p6680_p4 = scmp.lt.s32.totalorder %s7411_s26, %s6678_s18 }
 0x209   : > { %p6675_p3 = pnand %p6673_p8, %p6659_p1  ;;  %p6681_p11 = scmp.lt.s32.totalorder %s6679_s28, %s6672_s22 }
 0x20b   : > { %p6676_p9 = pneg %p6675_p3  ;;  %p6682_p6 = por %p6681_p11, %p6680_p4 }
 0x20d   : > { %p6683_p13 = pnand %p6682_p6, %p6676_p9 }
 0x20f   : > { %6686 = shalt.err (!%p6683_p13)
}
 0x210   : > { %s6828_s20 = smov 128   ;;  %s6829_s19 = smov 8  }
 0x211   : > { %5819 = dma.hbm_to_vmem [thread:$0]  (!%p7407_p10), %s7403_s6, 512, %s7411_s26, %s7413_s3, %s6828_s20, %s6828_s20, %s6829_s19  }
 0x212   : > { %s7912_s23 = sld [smem:[#allocation51_spill]] }
 0x218   : > { %p7913_p1 = scmp.ne.s32.totalorder %s7912_s23, 0 }
 0x219   : > { %s7914_s0 = sld [smem:[#allocation45_spill]] (!%p7913_p1) }
 0x21a   : > { %745 = sbr.rel (%p7913_p1) target bundleno = 2506 (0x9ca), region = 96 }
 0x21f   : > { %s7444_s24 = sand.u32 (!%p7913_p1), 1, %s7914_s0  }
 0x220   : > { %s4600_s22 = sshll.u32 (!%p7913_p1), %s7444_s24, 5  ;;  %s748_s5 = scalar_lea.sflag (!%p7913_p1), [#allocation3], %s7444_s24 }
 0x221   : > { %s7448_s18 = scalar_lea.vmem [#allocation2], %s4600_s22 }
 0x222   : > { %6740 = dma.done.wait (%p7382_p2), %s748_s5, 512  }
 0x223   : > { %6742 = vsyncadd (%p7382_p2), %s748_s5, 4294966784  ;;  %s7915_s7 = sld [smem:[#allocation50_spill]] }
 0x229   : > { %p7916_p4 = scmp.ne.s32.totalorder %s7915_s7, 0 }
 0x22b   : > { %6744 = dma.done.wait (%p7916_p4), [#allocation6], 2048  }
 0x22c   : > { %6746 = vsyncadd (%p7916_p4), [#allocation6], 4294965248 }
 0x22d   : > { %6748 = dma.done.wait (%p7916_p4), [#allocation9], 6144  }
 0x22e   : > { %6750 = vsyncadd (%p7916_p4), [#allocation9], 4294961152 }
 0x22f   : > { %6752 = dma.done.wait (%p7916_p4), [#allocation12], 10240  }
 0x230   : > { %6754 = vsyncadd (%p7916_p4), [#allocation12], 4294957056 }
 0x231   : > { %6756 = dma.done.wait (%p7916_p4), [#allocation15], 6144  }
 0x232   : > { %6758 = vsyncadd (%p7916_p4), [#allocation15], 4294961152 }
 0x233   : > { %6760 = dma.done.wait (%p7916_p4), [#allocation18], 3088  }
 0x234   : > { %6762 = vsyncadd (%p7916_p4), [#allocation18], 4294964208 }
 0x235   : > { %6764 = dma.done.wait (%p7916_p4), [#allocation21], 32  }
 0x236   : > { %6766 = vsyncadd (%p7916_p4), [#allocation21], 4294967264 }
 0x237   : > { %6768 = dma.done.wait (%p7916_p4), [#allocation24], 32  }
 0x238   : > { %6770 = vsyncadd (%p7916_p4), [#allocation24], 4294967264 }
 0x239   : > { %6772 = dma.done.wait (%p7916_p4), [#allocation27], 32  }
 0x23a   : > { %6774 = vsyncadd (%p7916_p4), [#allocation27], 4294967264 }
 0x23b   : > { %6776 = dma.done.wait (%p7916_p4), [#allocation30], 32  }
 0x23c   : > { %6778 = vsyncadd (%p7916_p4), [#allocation30], 4294967264  ;;  %v6830_v0 = vmov 0.0   ;;  %vm6831_vm0 = vmmov 0   ;;  %v5937_v1 = vld [vmem:[#allocation5] sm:$0xff]   ;;  %v5938_v2 = vld [vmem:[#allocation5 + $0x8] sm:$0xff]  }
 0x23d   : > { %5143 = vmatprep.subr.bf16.mxu0 %v6830_v0  ;;  %5159 = vmatprep.mubr.msk.bf16.mxu0 %vm6831_vm0, %v6830_v0  ;;  %v5939_v3 = vld [vmem:[#allocation5 + $0x10] sm:$0xff]   ;;  %v5940_v4 = vld [vmem:[#allocation5 + $0x18] sm:$0xff]   ;;  %v5946_v5 = vld [vmem:[#allocation7] sm:$0xff]   ;;  %vm1155_vm1 = vsmask.f32 7424  ;;  %vm1384_vm2 = vcmask 1046528  }
 0x23e   : > { %5163 = vmatprep.subr.bf16.mxu1 %v6830_v0  ;;  %5179 = vmatprep.mubr.msk.bf16.mxu1 %vm6831_vm0, %v6830_v0  ;;  %v5948_v6 = vld [vmem:[#allocation7 + $0x8] sm:$0xff]   ;;  %v5941_v7 = vld [vmem:[#allocation5 + $0x20] sm:$0xff]   ;;  %v5950_v8 = vld [vmem:[#allocation7 + $0x10] sm:$0xff]   ;;  %s5683_s6 = smul.u32 48, %s7444_s24  ;;  %vm6832_vm5 = vmmov 1   ;;  %vm2787_vm11 = vcmask 1045504  }
 0x23f   : > { %5144 = vmatpush3.bf16.msra.mxu0 %v5937_v1  ;;  %5164 = vmatpush3.bf16.msra.mxu1 %v5946_v5  ;;  %v5942_v9 = vld [vmem:[#allocation5 + $0x28] sm:$0xff]   ;;  %v5952_v10 = vld [vmem:[#allocation7 + $0x18] sm:$0xff]   ;;  %v5943_v11 = vld [vmem:[#allocation5 + $0x30] sm:$0xff]   ;;  %vm2661_vm12 = vsmask.f32 6400  ;;  %vm3035_vm13 = vcmask 1044480  }
 0x240   : > { %5145 = vmatprep.subr.bf16.mxu0 %v6830_v0  ;;  %5165 = vmatprep.subr.bf16.mxu1 %v6830_v0  ;;  %v5954_v12 = vld [vmem:[#allocation7 + $0x20] sm:$0xff]   ;;  %v5944_v13 = vld [vmem:[#allocation5 + $0x38] sm:$0xff]   ;;  %v4619_v14 = vld [vmem:[%s7448_s18 + $0x8] sm:$0xff]  ;;  %s7540_s21 = scalar_lea.vmem [#allocation32], %s5683_s6  ;;  %vm2909_vm14 = vsmask.f32 5376 }
 0x241   : > { %v4620_v15 = vld [vmem:[%s7448_s18 + $0x10] sm:$0xff]  ;;  %v5945_v16 = vld [vmem:[#allocation8 + $0x40] sm:$0xff]   ;;  %v5956_v17 = vld [vmem:[#allocation7 + $0x28] sm:$0xff]   ;;  %s7923_s26 = sld [smem:[#allocation47_spill]]  ;;  %s4310_s3 = sshll.u32 %s7540_s21, 4  ;;  %s7763_s3 = int_to_ptr.vmem [resolvable:$true] %s4310_s3 }
 0x242   : > { %v885_v18 = vpack.c.bf16 %v4620_v15, %v4619_v14  ;;  %v5947_v19 = vld [vmem:[#allocation8 + $0x48] sm:$0xff]   ;;  %v5949_v20 = vld [vmem:[#allocation8 + $0x50] sm:$0xff]   ;;  %v5951_v21 = vld [vmem:[#allocation8 + $0x58] sm:$0xff]   ;;  %s7924_s23 = sld [smem:[#allocation62_spill]]  ;;  %s4294_s22 = scalar_lea.sflag [#allocation4], %s7444_s24 }
 0x243   : > { %5146 = vmatpush3.bf16.msra.mxu0 %v5938_v2  ;;  %5166 = vmatpush3.bf16.msra.mxu1 %v5948_v6  ;;  %v5953_v22 = vld [vmem:[#allocation8 + $0x60] sm:$0xff]   ;;  %v5955_v23 = vld [vmem:[#allocation8 + $0x68] sm:$0xff]   ;;  %v5957_v24 = vld [vmem:[#allocation8 + $0x70] sm:$0xff]   ;;  %s6687_s5 = scalar_lea.vmem %s7763_s3, 768  ;;  %p7925_p9 = scmp.ne.s32.totalorder %s7908_s1, 0 }
 0x244   : > { %5147 = vmatprep.subr.bf16.mxu0 %v6830_v0  ;;  %5167 = vmatprep.subr.bf16.mxu1 %v6830_v0  ;;  %v4639_v25 = vld [vmem:[%s7448_s18 + $0x5] sm:$0xff]  ;;  %v4640_v26 = vld [vmem:[%s7448_s18 + $0xd] sm:$0xff]  ;;  %v4641_v29 = vld [vmem:[%s7448_s18 + $0x15] sm:$0x3f]  ;;  %p6688_p2 = scmp.ne.s32.totalorder %s7763_s3, %s6687_s5 }
 0x245   : > { %v7513_v27 = vpack.c.bf16 %v4640_v26, %v4639_v25  ;;  %v5958_v28 = vld [vmem:[#allocation7 + $0x30] sm:$0xff]   ;;  %v7516_v30 = vpack.c.bf16 %v4641_v29, %v4641_v29  ;;  %v5959_v32 = vld [vmem:[#allocation8 + $0x78] sm:$0xff]   ;;  %v5961_v40 = vld [vmem:[#allocation8 + $0x80] sm:$0xff]  }
 0x246   : > { %v5960_v36 = vld [vmem:[#allocation7 + $0x38] sm:$0xff]   ;;  %v5962_v43 = vld [vmem:[#allocation8] sm:$0xff]   ;;  %v5963_v44 = vld [vmem:[#allocation8 + $0x88] sm:$0xff]   ;;  %p6689_p10 = pnand %p6688_p2, %p7925_p9 }
 0x247   : > { %5148 = vmatpush3.bf16.msra.mxu0 %v5939_v3  ;;  %5168 = vmatpush3.bf16.msra.mxu1 %v5950_v8  ;;  %v1159_v31 = vshll.u32 %v7513_v27, 16  ;;  %v1157_v33 = vshrl.u32 %v7513_v27, 16  ;;  %v1164_v35 = vshll.u32 %v7516_v30, 16  ;;  %v1168_v39 = vshrl.u32 %v7516_v30, 16  ;;  %v5965_v45 = vld [vmem:[#allocation8 + $0x90] sm:$0xff]   ;;  %v5967_v46 = vld [vmem:[#allocation8 + $0x98] sm:$0xff]  }
 0x248   : > { %5149 = vmatprep.subr.bf16.mxu0 %v6830_v0  ;;  %5169 = vmatprep.subr.bf16.mxu1 %v6830_v0  ;;  %v5969_v47 = vld [vmem:[#allocation8 + $0xa0] sm:$0xff]   ;;  %v5971_v48 = vld [vmem:[#allocation8 + $0xa8] sm:$0xff]   ;;  %v5973_v49 = vld [vmem:[#allocation8 + $0xb0] sm:$0xff]   ;;  %v1385_v51 = vrot.slane %v7513_v27, 1  ;;  %v1386_v52 = vrot.slane %v7516_v30, 1  ;;  %s5684_s28 = smul.u32 768, %s7923_s26  ;;  %p6690_p12 = pneg %p6689_p10 }
 0x249   : > { %v1161_v34 = vrot.slane %v1159_v31, 1  ;;  %v1166_v38 = vrot.slane %v1164_v35, 1  ;;  %v5975_v50 = vld [vmem:[#allocation8 + $0xb8] sm:$0xff]   ;;  %v4621_v54 = vld [vmem:[#allocation19] ss:$0 sm:$0xff]  ;;  %v5964_v1 = vld [vmem:[#allocation8 + $0x8] sm:$0xff]  }
 0x24a   : > { %v1387_v53 = vsel %vm1384_vm2, %v1385_v51, %v1386_v52  ;;  %v5966_v2 = vld [vmem:[#allocation8 + $0x10] sm:$0xff]   ;;  %v5968_v3 = vld [vmem:[#allocation8 + $0x18] sm:$0xff]   ;;  %v5972_v5 = vld [vmem:[#allocation8 + $0x28] sm:$0xff]   ;;  %s7768_s0 = scalar_lea.hbm %s7924_s23, %s5684_s28 }
 0x24b   : > { %5150 = vmatpush3.bf16.msra.mxu0 %v5940_v4  ;;  %5170 = vmatpush3.bf16.msra.mxu1 %v5952_v10  ;;  %v1162_v37 = vor.u32 %v1161_v34, %v1157_v33  ;;  %v1170_v42 = vor.u32 %v1168_v39, %v1166_v38  ;;  %v5970_v4 = vld [vmem:[#allocation8 + $0x20] sm:$0xff]   ;;  %v5974_v6 = vld [vmem:[#allocation8 + $0x30] sm:$0xff]   ;;  %v5981_v15 = vld [vmem:[#allocation10 + $0x48] sm:$0xff]  }
 0x24c   : > { %5151 = vmatprep.subr.bf16.mxu0 %v6830_v0  ;;  %5171 = vmatprep.subr.bf16.mxu1 %v6830_v0  ;;  %v5979_v14 = vld [vmem:[#allocation10 + $0x40] sm:$0xff]   ;;  %v5990_v29 = vld [vmem:[#allocation10 + $0x38] sm:$0xff]  }
 0x24d   : > { %v1167_v41 = vsel %vm1155_vm1, %v1162_v37, %v1166_v38  ;;  %v5987_v26 = vld [vmem:[#allocation10 + $0x60] sm:$0xff]   ;;  %v5992_v31 = vld [vmem:[#allocation10 + $0x78] sm:$0xff]  }
 0x24e   : > { %v4630_v33 = vld [vmem:[#allocation20] ss:$0 sm:$0xff] }
 0x24f   : > { %5152 = vmatpush3.bf16.msra.mxu0 %v5941_v7  ;;  %5172 = vmatpush3.bf16.msra.mxu1 %v5954_v12  ;;  %v5976_v7 = vld [vmem:[#allocation8 + $0x38] sm:$0xff]   ;;  %v5977_v12 = vld [vmem:[#allocation10] sm:$0xff]  }
 0x250   : > { %5153 = vmatprep.subr.bf16.mxu0 %v6830_v0  ;;  %5173 = vmatprep.subr.bf16.mxu1 %v6830_v0 }
 0x253   : > { %5154 = vmatpush3.bf16.msra.mxu0 %v5942_v9  ;;  %5174 = vmatpush3.bf16.msra.mxu1 %v5956_v17  ;;  %v5983_v17 = vld [vmem:[#allocation10 + $0x50] sm:$0xff]  }
 0x254   : > { %5155 = vmatprep.subr.bf16.mxu0 %v6830_v0  ;;  %5175 = vmatprep.subr.bf16.mxu1 %v6830_v0 }
 0x257   : > { %5156 = vmatpush3.bf16.msra.mxu0 %v5943_v11  ;;  %5176 = vmatpush3.bf16.msra.mxu1 %v5958_v28  ;;  %v5989_v28 = vld [vmem:[#allocation10 + $0x68] sm:$0xff]  }
 0x258   : > { %5157 = vmatprep.subr.bf16.mxu0 %v6830_v0  ;;  %5177 = vmatprep.subr.bf16.mxu1 %v6830_v0 }
 0x25b   : > { %5158 = vmatpush3.bf16.msra.mxu0 %v5944_v13  ;;  %5178 = vmatpush3.bf16.msra.mxu1 %v5960_v36  ;;  %v5978_v13 = vld [vmem:[#allocation10 + $0x8] sm:$0xff]  }
 0x25c   : > { %5183 = vmatprep.subr.bf16.mxu0 %v5945_v16  ;;  %5203 = vmatprep.subr.bf16.mxu1 %v5962_v43 }
 0x25e   : > { %5160 = vmatmul.mubr.bf16.vlgmr.msra.gmra.mrb[0].mxu0 %v885_v18  ;;  %v5982_v18 = vld [vmem:[#allocation10 + $0x18] sm:$0xff]  }
 0x25f   : > { %5184 = vmatpush3.bf16.msra.mxu0 %v5945_v16  ;;  %5199 = vmatprep.mubr.bf16.mxu0 %v1167_v41  ;;  %v5980_v16 = vld [vmem:[#allocation10 + $0x10] sm:$0xff]  }
 0x260   : > { %5185 = vmatprep.subr.bf16.mxu0 %v5947_v19 }
 0x263   : > { %5186 = vmatpush3.bf16.msra.mxu0 %v5947_v19  ;;  %v5984_v19 = vld [vmem:[#allocation10 + $0x20] sm:$0xff]  }
 0x264   : > { %5187 = vmatprep.subr.bf16.mxu0 %v5949_v20 }
 0x267   : > { %5188 = vmatpush3.bf16.msra.mxu0 %v5949_v20 }
 0x268   : > { %5189 = vmatprep.subr.bf16.mxu0 %v5951_v21 }
 0x26b   : > { %5190 = vmatpush3.bf16.msra.mxu0 %v5951_v21  ;;  %v5985_v21 = vld [vmem:[#allocation10 + $0x58] sm:$0xff]  }
 0x26c   : > { %5191 = vmatprep.subr.bf16.mxu0 %v5953_v22 }
 0x26f   : > { %5192 = vmatpush3.bf16.msra.mxu0 %v5953_v22 }
 0x270   : > { %5193 = vmatprep.subr.bf16.mxu0 %v5955_v23 }
 0x273   : > { %5194 = vmatpush3.bf16.msra.mxu0 %v5955_v23 }
 0x274   : > { %5195 = vmatprep.subr.bf16.mxu0 %v5957_v24 }
 0x277   : > { %5196 = vmatpush3.bf16.msra.mxu0 %v5957_v24  ;;  %v5986_v24 = vld [vmem:[#allocation10 + $0x28] sm:$0xff]  }
 0x278   : > { %5197 = vmatprep.subr.bf16.mxu0 %v5959_v32 }
 0x27b   : > { %5198 = vmatpush3.bf16.msra.mxu0 %v5959_v32  ;;  %v7536_v32 = vld [vmem:[#allocation10 + $0x80] sm:$0xff]  }
 0x27c   : > { %5223 = vmatprep.subr.bf16.mxu0 %v5961_v40 }
 0x27e   : > { %5200 = vmatmul.mubr.bf16.vlgmr.msra.gmra.mrb[4].mxu0 %v1170_v42  ;;  %v1502_v42 = vlaneseq }
 0x27f   : > { %5224 = vmatpush3.bf16.msra.mxu0 %v5961_v40  ;;  %5239 = vmatprep.mubr.bf16.mxu0 %v1387_v53 }
 0x280   : > { %5225 = vmatprep.subr.bf16.mxu0 %v5963_v44 }
 0x283   : > { %5226 = vmatpush3.bf16.msra.mxu0 %v5963_v44 }
 0x284   : > { %5227 = vmatprep.subr.bf16.mxu0 %v5965_v45 }
 0x287   : > { %5228 = vmatpush3.bf16.msra.mxu0 %v5965_v45 }
 0x288   : > { %5229 = vmatprep.subr.bf16.mxu0 %v5967_v46 }
 0x28b   : > { %5230 = vmatpush3.bf16.msra.mxu0 %v5967_v46 }
 0x28c   : > { %5231 = vmatprep.subr.bf16.mxu0 %v5969_v47 }
 0x28f   : > { %5232 = vmatpush3.bf16.msra.mxu0 %v5969_v47 }
 0x290   : > { %5233 = vmatprep.subr.bf16.mxu0 %v5971_v48 }
 0x293   : > { %5234 = vmatpush3.bf16.msra.mxu0 %v5971_v48  ;;  %v4666_v48 = vld [vmem:[#allocation22] ss:$0 sm:$0xff] }
 0x294   : > { %5235 = vmatprep.subr.bf16.mxu0 %v5973_v49 }
 0x297   : > { %5236 = vmatpush3.bf16.msra.mxu0 %v5973_v49 }
 0x298   : > { %5237 = vmatprep.subr.bf16.mxu0 %v5975_v50 }
 0x29b   : > { %5238 = vmatpush3.bf16.msra.mxu0 %v5975_v50 }
 0x29c   : > { %5263 = vmatprep.subr.bf16.mxu0 %v5977_v12 }
 0x29e   : > { %5240 = vmatmul.mubr.bf16.vlgmr.msra.gmra.mrb[8].mxu0 %v1386_v52 }
 0x29f   : > { %5264 = vmatpush3.bf16.msra.mxu0 %v5977_v12 }
 0x2a0   : > { %5265 = vmatprep.subr.bf16.mxu0 %v5978_v13 }
 0x2a3   : > { %5266 = vmatpush3.bf16.msra.mxu0 %v5978_v13 }
 0x2a4   : > { %5267 = vmatprep.subr.bf16.mxu0 %v5980_v16 }
 0x2a7   : > { %5268 = vmatpush3.bf16.msra.mxu0 %v5980_v16 }
 0x2a8   : > { %5269 = vmatprep.subr.bf16.mxu0 %v5982_v18 }
 0x2ab   : > { %5270 = vmatpush3.bf16.msra.mxu0 %v5982_v18 }
 0x2ac   : > { %5271 = vmatprep.subr.bf16.mxu0 %v5984_v19 }
 0x2af   : > { %5272 = vmatpush3.bf16.msra.mxu0 %v5984_v19 }
 0x2b0   : > { %5273 = vmatprep.subr.bf16.mxu0 %v5986_v24 }
 0x2b3   : > { %5274 = vmatpush3.bf16.msra.mxu0 %v5986_v24  ;;  %v5997_v24 = vld [vmem:[#allocation10 + $0xa0] sm:$0xff]  }
 0x331   : > { %v991_v55 = vpop.f32.mrb[0].mxu0 }
 0x332   : > { %v992_v56 = vadd.f32 %v4621_v54, %v991_v55  ;;  %v5161_v57 = vpop.f32.mrb[1].mxu0 }
 0x333   : > { %v994_v58 = vpop.f32.mrb[2].mxu0 }
 0x334   : > { %v995_v59 = vadd.f32 %v4621_v54, %v994_v58  ;;  %v5162_v60 = vpop.f32.mrb[3].mxu0  ;;  %v998_v61 = vmax.f32 %v992_v56, 0.0 }
 0x336   : > { %v999_v62 = vmax.f32 %v995_v59, 0.0 }
 0x338   : > { %v1000_v63 = vpack.c.bf16 %v999_v62, %v998_v61 }
 0x33a   : > { %5180 = vmatmul.mubr.bf16.vlgmr.msra.gmra.mrb[0].mxu1 %v1000_v63 }
 0x33b   : > { %5204 = vmatpush3.bf16.msra.mxu1 %v5962_v43  ;;  %5219 = vmatprep.mubr.bf16.mxu1 %v7513_v27  ;;  %v5988_v27 = vld [vmem:[#allocation10 + $0x30] sm:$0xff]   ;;  %v7544_v43 = vshrl.u32 %v1502_v42, 7 }
 0x33c   : > { %5205 = vmatprep.subr.bf16.mxu1 %v5964_v1  ;;  %5275 = vmatprep.subr.bf16.mxu0 %v5988_v27  ;;  %v6015_v42 = vld [vmem:[#allocation11 + $0x70] sm:$0xff]  }
 0x33d   : > { %5276 = vmatpush3.bf16.msra.mxu0 %v5988_v27  ;;  %v7547_v44 = vadd.s32 16, %v7544_v43  ;;  %v7555_v54 = vadd.s32 4294967294, %v7544_v43  ;;  %v6000_v27 = vld [vmem:[#allocation10 + $0xb8] sm:$0xff]  }
 0x33e   : > { %5277 = vmatprep.subr.bf16.mxu0 %v5990_v29 }
 0x33f   : > { %5206 = vmatpush3.bf16.msra.mxu1 %v5964_v1  ;;  %v7551_v49 = vadd.s32 4294967294, %v7547_v44  ;;  %vm1511_vm4 = vcmp.ge.s32.totalorder %v7555_v54, 0 }
 0x340   : > { %5207 = vmatprep.subr.bf16.mxu1 %v5966_v2  ;;  %vm7567_vm6 = vmpackc.low %vm6832_vm5, %vm1511_vm4 }
 0x341   : > { %5278 = vmatpush3.bf16.msra.mxu0 %v5990_v29  ;;  %vm1516_vm3 = vcmp.lt.s32.totalorder %v7551_v49, 16  ;;  %v6003_v29 = vld [vmem:[#allocation11 + $0x40] sm:$0xff]  }
 0x342   : > { %5303 = vmatprep.subr.bf16.mxu0 %v6830_v0  ;;  %vm7574_vm7 = vmpackc.low %vm1516_vm3, %vm1516_vm3 }
 0x343   : > { %5208 = vmatpush3.bf16.msra.mxu1 %v5966_v2 }
 0x344   : > { %5209 = vmatprep.subr.bf16.mxu1 %v5968_v3 }
 0x347   : > { %5210 = vmatpush3.bf16.msra.mxu1 %v5968_v3 }
 0x348   : > { %5211 = vmatprep.subr.bf16.mxu1 %v5970_v4 }
 0x34b   : > { %5212 = vmatpush3.bf16.msra.mxu1 %v5970_v4 }
 0x34c   : > { %5213 = vmatprep.subr.bf16.mxu1 %v5972_v5 }
 0x34f   : > { %5214 = vmatpush3.bf16.msra.mxu1 %v5972_v5 }
 0x350   : > { %5215 = vmatprep.subr.bf16.mxu1 %v5974_v6 }
 0x351   : > { %v7529_v8 = vpop.f32.mrb[4].mxu0 }
 0x352   : > { %v7531_v9 = vpop.f32.mrb[5].mxu0 }
 0x353   : > { %5216 = vmatpush3.bf16.msra.mxu1 %v5974_v6  ;;  %v5202_v10 = vpop.f32.mrb[6].mxu0 }
 0x354   : > { %5217 = vmatprep.subr.bf16.mxu1 %v5976_v7  ;;  %v7533_v11 = vpop.f32.mrb[7].mxu0 }
 0x357   : > { %5218 = vmatpush3.bf16.msra.mxu1 %v5976_v7  ;;  %v6123_v7 = vld [vmem:[#allocation16 + $0x90] sm:$0xff]  }
 0x358   : > { %5243 = vmatprep.subr.bf16.mxu1 %v5979_v14 }
 0x35a   : > { %5220 = vmatmul.mubr.bf16.vlgmr.msra.gmra.mrb[4].mxu1 %v7516_v30  ;;  %v5991_v30 = vld [vmem:[#allocation10 + $0x70] sm:$0xff]  }
 0x35b   : > { %5244 = vmatpush3.bf16.msra.mxu1 %v5979_v14 }
 0x35c   : > { %5245 = vmatprep.subr.bf16.mxu1 %v5981_v15 }
 0x35f   : > { %5246 = vmatpush3.bf16.msra.mxu1 %v5981_v15 }
 0x360   : > { %5247 = vmatprep.subr.bf16.mxu1 %v5983_v17 }
 0x363   : > { %5248 = vmatpush3.bf16.msra.mxu1 %v5983_v17 }
 0x364   : > { %5249 = vmatprep.subr.bf16.mxu1 %v5985_v21 }
 0x367   : > { %5250 = vmatpush3.bf16.msra.mxu1 %v5985_v21  ;;  %v5994_v21 = vld [vmem:[#allocation10 + $0x88] sm:$0xff]  }
 0x368   : > { %5251 = vmatprep.subr.bf16.mxu1 %v5987_v26 }
 0x36b   : > { %5252 = vmatpush3.bf16.msra.mxu1 %v5987_v26  ;;  %v5999_v26 = vld [vmem:[#allocation10 + $0xb0] sm:$0xff]  }
 0x36c   : > { %5253 = vmatprep.subr.bf16.mxu1 %v5989_v28 }
 0x36f   : > { %5254 = vmatpush3.bf16.msra.mxu1 %v5989_v28  ;;  %v6001_v28 = vld [vmem:[#allocation11] sm:$0xff]  }
 0x370   : > { %5255 = vmatprep.subr.bf16.mxu1 %v5991_v30 }
 0x371   : > { %v5241_v20 = vpop.f32.mrb[8].mxu0 }
 0x372   : > { %v1472_v22 = vpop.f32.mrb[9].mxu0 }
 0x373   : > { %v5242_v23 = vpop.f32.mrb[10].mxu0  ;;  %5256 = vmatpush3.bf16.msra.mxu1 %v5991_v30  ;;  %v6002_v30 = vld [vmem:[#allocation11 + $0x8] sm:$0xff]  }
 0x374   : > { %v1475_v25 = vpop.f32.mrb[11].mxu0  ;;  %5257 = vmatprep.subr.bf16.mxu1 %v5992_v31  ;;  %v5996_v23 = vld [vmem:[#allocation10 + $0x98] sm:$0xff]  }
 0x377   : > { %5258 = vmatpush3.bf16.msra.mxu1 %v5992_v31  ;;  %v6005_v31 = vld [vmem:[#allocation11 + $0x48] sm:$0xff]  }
 0x378   : > { %5283 = vmatprep.subr.bf16.mxu1 %v7536_v32 }
 0x40d   : > { %v1106_v34 = vpop.f32.mrb[0].mxu1 }
 0x40e   : > { %v1107_v35 = vadd.f32 %v4630_v33, %v1106_v34  ;;  %v5181_v36 = vpop.f32.mrb[1].mxu1  ;;  %v6006_v34 = vld [vmem:[#allocation11 + $0x18] sm:$0xff]  }
 0x40f   : > { %v1109_v37 = vpop.f32.mrb[2].mxu1  ;;  %v6008_v36 = vld [vmem:[#allocation11 + $0x20] sm:$0xff]  }
 0x410   : > { %v1113_v38 = vmax.f32 %v1107_v35, 0.0  ;;  %v1110_v39 = vadd.f32 %v4630_v33, %v1109_v37  ;;  %v5182_v40 = vpop.f32.mrb[3].mxu1  ;;  %v6007_v33 = vld [vmem:[#allocation11 + $0x50] sm:$0xff]   ;;  %v6009_v35 = vld [vmem:[#allocation11 + $0x58] sm:$0xff]   ;;  %v6010_v37 = vld [vmem:[#allocation11 + $0x28] sm:$0xff]  }
 0x411   : > { %v6013_v40 = vld [vmem:[#allocation11 + $0x68] sm:$0xff]  }
 0x412   : > { %4287 = vst [vmem:[%s7540_s21] sm:$0xff] %v1113_v38  ;;  %v1114_v41 = vmax.f32 %v1110_v39, 0.0  ;;  %v6011_v38 = vld [vmem:[#allocation11 + $0x60] sm:$0xff]   ;;  %v6012_v39 = vld [vmem:[#allocation11 + $0x30] sm:$0xff]  }
 0x414   : > { %4290 = vst [vmem:[%s7540_s21 + $0x18] sm:$0xff] %v1114_v41  ;;  %v6014_v41 = vld [vmem:[#allocation11 + $0x38] sm:$0xff]  }
 0x42d   : > { %v5221_v45 = vpop.f32.mrb[4].mxu1 }
 0x42e   : > { %v1360_v46 = vadd.f32 %v5221_v45, %v7529_v8  ;;  %v1351_v47 = vpop.f32.mrb[5].mxu1  ;;  %v6016_v45 = vld [vmem:[#allocation11 + $0x78] sm:$0xff]  }
 0x42f   : > { %v1352_v50 = vadd.f32 %v1351_v47, %v7531_v9  ;;  %v5222_v51 = vpop.f32.mrb[6].mxu1 }
 0x430   : > { %v1488_v52 = vadd.f32 %v5241_v20, %v1360_v46  ;;  %v1354_v53 = vpop.f32.mrb[7].mxu1  ;;  %v6017_v46 = vld [vmem:[#allocation13 + $0x40] sm:$0xff]  }
 0x431   : > { %v1486_v55 = vadd.f32 %v1472_v22, %v1352_v50  ;;  %v1355_v56 = vadd.f32 %v1354_v53, %v7533_v11  ;;  %v5995_v22 = vld [vmem:[#allocation10 + $0x90] sm:$0xff]  }
 0x432   : > { %v1498_v57 = vadd.f32 %v4666_v48, %v1488_v52 }
 0x433   : > { %v1496_v58 = vadd.f32 %v4666_v48, %v1486_v55  ;;  %v1487_v59 = vadd.f32 %v1475_v25, %v1355_v56  ;;  %v5998_v25 = vld [vmem:[#allocation10 + $0xa8] sm:$0xff]  }
 0x434   : > { %v1501_v60 = vmax.f32 %v1498_v57, 0.0 }
 0x435   : > { %v1499_v61 = vmax.f32 %v1496_v58, 0.0  ;;  %v1497_v62 = vadd.f32 %v4666_v48, %v1487_v59 }
 0x436   : > { %v1522_v63 = vsel %vm1516_vm3, %v1501_v60, 0.0  ;;  %v4687_v9 = vpack.c.bf16 %v1501_v60, %v1501_v60  ;;  %v4726_v60 = vld [vmem:[%s7448_s18 + $0x2] sm:$0xff] }
 0x437   : > { %v1524_v1 = vpack.c.bf16 %v1522_v63, %v1522_v63  ;;  %v1500_v2 = vmax.f32 %v1497_v62, 0.0  ;;  %v1520_v3 = vsel %vm1511_vm4, %v1499_v61, 0.0  ;;  %v4728_v63 = vld [vmem:[%s7448_s18 + $0x12] sm:$0xff] }
 0x439   : > { %v4684_v5 = vpack.c.bf16 %v1500_v2, %v1499_v61  ;;  %v1523_v6 = vpack.c.bf16 %v1500_v2, %v1520_v3  ;;  %v1566_v8 = vshll.u32 %v1524_v1, 16  ;;  %v1787_v12 = vrot.slane %v1524_v1, 1  ;;  %v4727_v61 = vld [vmem:[%s7448_s18 + $0xa] sm:$0xff] }
 0x43a   : > { %v1570_v18 = vshrl.u32 %v1524_v1, 16  ;;  %v7607_v62 = vpack.c.bf16 %v4727_v61, %v4726_v60  ;;  %v4729_v1 = vld [vmem:[%s7448_s18 + $0x1a] sm:$0xf]  ;;  %v6028_v60 = vld [vmem:[#allocation11 + $0xa8] sm:$0xff]   ;;  %s6833_s18 = smov [#allocation32]  }
 0x43b   : > { %5279 = vmatprep.mubr.msk.bf16.mxu0 %vm7567_vm6, %v4684_v5  ;;  %v1561_v10 = vshll.u32 %v1523_v6, 16  ;;  %v1786_v11 = vrot.slane %v1523_v6, 1  ;;  %v1559_v13 = vshrl.u32 %v1523_v6, 16  ;;  %v1568_v15 = vrot.slane %v1566_v8, 1  ;;  %v4697_v6 = vld [vmem:[#allocation23] ss:$0 sm:$0xff] }
 0x43c   : > { %5280 = vmatmul.mubr.msk.bf16.vlgmr.msra.gmra.mrb[12].mxu0 %vm7574_vm7, %v4687_v9  ;;  %v7611_v2 = vpack.c.bf16 %v4729_v1, %v4728_v63  ;;  %v7614_v3 = vshll.u32 %v7607_v62, 16  ;;  %v7617_v8 = vadd.s32 4294967295, %v7547_v44  ;;  %v6033_v63 = vld [vmem:[#allocation13 + $0x80] sm:$0xff]   ;;  %v2540_v1 = vrot.slane %v7607_v62, 1  ;;  %s6691_s7 = sshll.u32 %s6833_s18, 4  ;;  %s6692_s7 = int_to_ptr.vmem [resolvable:$false] %s6691_s7 }
 0x43d   : > { %v1563_v14 = vrot.slane %v1561_v10, 1  ;;  %v1788_v16 = vsel %vm1384_vm2, %v1786_v11, %v1787_v12  ;;  %5319 = vmatprep.mubr.msk.bf16.mxu0 %vm6831_vm0, %v6830_v0  ;;  %v1572_v20 = vor.u32 %v1570_v18, %v1568_v15  ;;  %5304 = vmatpush3.bf16.msra.mxu0 %v6003_v29  ;;  %v7620_v11 = vadd.s32 4294967295, %v7544_v43  ;;  %s6693_s6 = scalar_lea.vmem %s6692_s7, 1536  ;;  %p6694_p0 = scmp.lt.s32.totalorder %s7763_s3, %s6692_s7 }
 0x43e   : > { %5305 = vmatprep.subr.bf16.mxu0 %v6830_v0  ;;  %vm1913_vm8 = vcmp.lt.s32.totalorder %v7617_v8, 16  ;;  %v7660_v61 = vshrl.u32 %v7611_v2, 16  ;;  %p6695_p7 = scmp.lt.s32.totalorder %s6693_s6, %s6687_s5 }
 0x43f   : > { %v1564_v17 = vor.u32 %v1563_v14, %v1559_v13  ;;  %v7623_v14 = vshrl.u32 %v7607_v62, 16  ;;  %vm1908_vm9 = vcmp.ge.s32.totalorder %v7620_v11, 0 }
 0x440   : > { %vm7640_vm10 = vmpackc.low %vm6832_vm5, %vm1908_vm9  ;;  %p6696_p5 = por %p6695_p7, %p6694_p0 }
 0x441   : > { %v1569_v19 = vsel %vm1155_vm1, %v1564_v17, %v1568_v15  ;;  %5306 = vmatpush3.bf16.msra.mxu0 %v6005_v31  ;;  %v2317_v15 = vrot.slane %v7614_v3, 1 }
 0x442   : > { %5259 = vmatprep.mubr.bf16.mxu1 %v1569_v19  ;;  %5307 = vmatprep.subr.bf16.mxu0 %v6830_v0  ;;  %p6697_p8 = pnand %p6696_p5, %p6690_p12 }
 0x443   : > { %5260 = vmatmul.mubr.bf16.vlgmr.msra.gmra.mrb[8].mxu1 %v1572_v20 }
 0x444   : > { %5284 = vmatpush3.bf16.msra.mxu1 %v7536_v32  ;;  %5299 = vmatprep.mubr.bf16.mxu1 %v1788_v16  ;;  %v6004_v32 = vld [vmem:[#allocation11 + $0x10] sm:$0xff]   ;;  %v7627_v16 = vshll.u32 %v7611_v2, 16 }
 0x445   : > { %5285 = vmatprep.subr.bf16.mxu1 %v5994_v21  ;;  %5308 = vmatpush3.bf16.msra.mxu0 %v6007_v33  ;;  %v6019_v33 = vld [vmem:[#allocation13 + $0x48] sm:$0xff]  }
 0x446   : > { %5309 = vmatprep.subr.bf16.mxu0 %v6830_v0 }
 0x448   : > { %5286 = vmatpush3.bf16.msra.mxu1 %v5994_v21 }
 0x449   : > { %5287 = vmatprep.subr.bf16.mxu1 %v5995_v22  ;;  %5310 = vmatpush3.bf16.msra.mxu0 %v6009_v35 }
 0x44a   : > { %5311 = vmatprep.subr.bf16.mxu0 %v6830_v0 }
 0x44c   : > { %5288 = vmatpush3.bf16.msra.mxu1 %v5995_v22 }
 0x44d   : > { %5289 = vmatprep.subr.bf16.mxu1 %v5996_v23  ;;  %5312 = vmatpush3.bf16.msra.mxu0 %v6011_v38 }
 0x44e   : > { %5313 = vmatprep.subr.bf16.mxu0 %v6830_v0 }
 0x450   : > { %5290 = vmatpush3.bf16.msra.mxu1 %v5996_v23 }
 0x451   : > { %5291 = vmatprep.subr.bf16.mxu1 %v5997_v24  ;;  %5314 = vmatpush3.bf16.msra.mxu0 %v6013_v40 }
 0x452   : > { %5315 = vmatprep.subr.bf16.mxu0 %v6830_v0 }
 0x454   : > { %5292 = vmatpush3.bf16.msra.mxu1 %v5997_v24  ;;  %v2318_v24 = vor.u32 %v2317_v15, %v7623_v14  ;;  %v6034_v15 = vld [vmem:[#allocation13] sm:$0xff]  }
 0x455   : > { %5293 = vmatprep.subr.bf16.mxu1 %v5998_v25  ;;  %5316 = vmatpush3.bf16.msra.mxu0 %v6015_v42 }
 0x456   : > { %5317 = vmatprep.subr.bf16.mxu0 %v6830_v0 }
 0x458   : > { %5294 = vmatpush3.bf16.msra.mxu1 %v5998_v25  ;;  %v2322_v25 = vrot.slane %v7627_v16, 1 }
 0x459   : > { %5295 = vmatprep.subr.bf16.mxu1 %v5999_v26  ;;  %5318 = vmatpush3.bf16.msra.mxu0 %v6016_v45 }
 0x45a   : > { %5343 = vmatprep.subr.bf16.mxu0 %v6830_v0 }
 0x45c   : > { %5296 = vmatpush3.bf16.msra.mxu1 %v5999_v26 }
 0x45d   : > { %5297 = vmatprep.subr.bf16.mxu1 %v6000_v27 }
 0x460   : > { %5298 = vmatpush3.bf16.msra.mxu1 %v6000_v27 }
 0x461   : > { %5323 = vmatprep.subr.bf16.mxu1 %v6830_v0 }
 0x463   : > { %5300 = vmatmul.mubr.bf16.vlgmr.msra.gmra.mrb[12].mxu1 %v1787_v12 }
 0x464   : > { %5339 = vmatprep.mubr.msk.bf16.mxu1 %vm6831_vm0, %v6830_v0  ;;  %5324 = vmatpush3.bf16.msra.mxu1 %v6001_v28 }
 0x465   : > { %5325 = vmatprep.subr.bf16.mxu1 %v6830_v0 }
 0x468   : > { %5326 = vmatpush3.bf16.msra.mxu1 %v6002_v30  ;;  %v6147_v30 = vld [vmem:[#allocation17 + $0x90] sm:$0xff]  }
 0x469   : > { %5327 = vmatprep.subr.bf16.mxu1 %v6830_v0 }
 0x46c   : > { %5328 = vmatpush3.bf16.msra.mxu1 %v6004_v32 }
 0x46d   : > { %5329 = vmatprep.subr.bf16.mxu1 %v6830_v0 }
 0x470   : > { %5330 = vmatpush3.bf16.msra.mxu1 %v6006_v34  ;;  %v2323_v34 = vsel %vm1155_vm1, %v2318_v24, %v2322_v25  ;;  %v6042_v24 = vld [vmem:[#allocation13 + $0x20] sm:$0xff]  }
 0x471   : > { %5331 = vmatprep.subr.bf16.mxu1 %v6830_v0 }
 0x474   : > { %5332 = vmatpush3.bf16.msra.mxu1 %v6008_v36 }
 0x475   : > { %5333 = vmatprep.subr.bf16.mxu1 %v6830_v0 }
 0x478   : > { %5334 = vmatpush3.bf16.msra.mxu1 %v6010_v37 }
 0x479   : > { %5335 = vmatprep.subr.bf16.mxu1 %v6830_v0 }
 0x47c   : > { %5336 = vmatpush3.bf16.msra.mxu1 %v6012_v39 }
 0x47d   : > { %5337 = vmatprep.subr.bf16.mxu1 %v6830_v0 }
 0x480   : > { %5338 = vmatpush3.bf16.msra.mxu1 %v6014_v41  ;;  %v6021_v41 = vld [vmem:[#allocation13 + $0x50] sm:$0xff]  }
 0x481   : > { %5363 = vmatprep.subr.bf16.mxu1 %v6017_v46 }
 0x50f   : > { %v5281_v47 = vpop.f32.mrb[12].mxu0 }
 0x510   : > { %v1753_v48 = vpop.f32.mrb[13].mxu0 }
 0x511   : > { %v5282_v50 = vpop.f32.mrb[14].mxu0 }
 0x512   : > { %v1756_v51 = vpop.f32.mrb[15].mxu0 }
 0x516   : > { %v5261_v52 = vpop.f32.mrb[8].mxu1 }
 0x517   : > { %v1762_v53 = vadd.f32 %v5281_v47, %v5261_v52  ;;  %v1657_v55 = vpop.f32.mrb[9].mxu1  ;;  %v6020_v52 = vld [vmem:[#allocation11 + $0x88] sm:$0xff]  }
 0x518   : > { %v1754_v56 = vadd.f32 %v1753_v48, %v1657_v55  ;;  %v5262_v57 = vpop.f32.mrb[10].mxu1  ;;  %v6018_v48 = vld [vmem:[#allocation11 + $0x80] sm:$0xff]   ;;  %v6027_v55 = vld [vmem:[#allocation13 + $0x68] sm:$0xff]  }
 0x519   : > { %v1660_v58 = vpop.f32.mrb[11].mxu1  ;;  %v6029_v57 = vld [vmem:[#allocation13 + $0x70] sm:$0xff]  }
 0x51a   : > { %v1757_v59 = vadd.f32 %v1756_v51, %v1660_v58  ;;  %v6023_v51 = vld [vmem:[#allocation13 + $0x58] sm:$0xff]   ;;  %v6026_v58 = vld [vmem:[#allocation11 + $0xa0] sm:$0xff]  }
 0x536   : > { %v5301_v5 = vpop.f32.mrb[12].mxu1 }
 0x537   : > { %v1889_v9 = vadd.f32 %v5301_v5, %v1762_v53  ;;  %v1873_v10 = vpop.f32.mrb[13].mxu1  ;;  %v6022_v53 = vld [vmem:[#allocation11 + $0x90] sm:$0xff]   ;;  %v2541_v5 = vrot.slane %v7611_v2, 1 }
 0x538   : > { %v1887_v12 = vadd.f32 %v1873_v10, %v1754_v56  ;;  %v5302_v13 = vpop.f32.mrb[14].mxu1  ;;  %v6024_v56 = vld [vmem:[#allocation11 + $0x98] sm:$0xff]   ;;  %v6035_v10 = vld [vmem:[#allocation13 + $0x88] sm:$0xff]  }
 0x539   : > { %v1899_v17 = vadd.f32 %v4697_v6, %v1889_v9  ;;  %v1876_v18 = vpop.f32.mrb[15].mxu1  ;;  %v2326_v9 = vor.u32 %v7660_v61, %v2322_v25  ;;  %v6032_v13 = vld [vmem:[#allocation11 + $0xb8] sm:$0xff]   ;;  %v6045_v25 = vld [vmem:[#allocation13 + $0xb0] sm:$0xff]  }
 0x53a   : > { %v1897_v19 = vadd.f32 %v4697_v6, %v1887_v12  ;;  %v1888_v20 = vadd.f32 %v1876_v18, %v1757_v59  ;;  %v6031_v59 = vld [vmem:[#allocation13 + $0x78] sm:$0xff]   ;;  %v2542_v12 = vsel %vm1384_vm2, %v2540_v1, %v2541_v5  ;;  %v6036_v18 = vld [vmem:[#allocation13 + $0x8] sm:$0xff]   ;;  %v3037_v1 = vrot.slane %v7611_v2, 3 }
 0x53b   : > { %v1902_v21 = vmax.f32 %v1899_v17, 0.0  ;;  %v6037_v17 = vld [vmem:[#allocation13 + $0x90] sm:$0xff]  }
 0x53c   : > { %v1900_v22 = vmax.f32 %v1897_v19, 0.0  ;;  %v1898_v23 = vadd.f32 %v4697_v6, %v1888_v20  ;;  %v6030_v6 = vld [vmem:[#allocation11 + $0xb0] sm:$0xff]   ;;  %v6039_v19 = vld [vmem:[#allocation13 + $0x98] sm:$0xff]  }
 0x53d   : > { %v1919_v26 = vsel %vm1913_vm8, %v1902_v21, 0.0  ;;  %v6038_v20 = vld [vmem:[#allocation13 + $0x10] sm:$0xff]   ;;  %v6041_v21 = vld [vmem:[#allocation13 + $0xa0] sm:$0xff]  }
 0x53e   : > { %v1921_v27 = vpack.c.bf16 %v1919_v26, %v1919_v26  ;;  %v1917_v28 = vsel %vm1908_vm9, %v1900_v22, 0.0  ;;  %v1901_v29 = vmax.f32 %v1898_v23, 0.0  ;;  %v6043_v23 = vld [vmem:[#allocation13 + $0xa8] sm:$0xff]  }
 0x53f   : > { %v6044_v26 = vld [vmem:[#allocation13 + $0x28] sm:$0xff]  }
 0x540   : > { %v1920_v31 = vpack.c.bf16 %v1901_v29, %v1917_v28  ;;  %v4715_v32 = vpack.c.bf16 %v1901_v29, %v1900_v22  ;;  %v1963_v35 = vshll.u32 %v1921_v27, 16  ;;  %v2166_v36 = vrot.slane %v1921_v27, 1  ;;  %v6040_v22 = vld [vmem:[#allocation13 + $0x18] sm:$0xff]   ;;  %v6046_v28 = vld [vmem:[#allocation13 + $0x30] sm:$0xff]   ;;  %v6049_v29 = vld [vmem:[#allocation13 + $0x100] sm:$0xff]  }
 0x541   : > { %v6047_v27 = vld [vmem:[#allocation13 + $0xb8] sm:$0xff]  }
 0x542   : > { %v1958_v37 = vshll.u32 %v1920_v31, 16  ;;  %5340 = vmatmul.mubr.msk.bf16.vlgmr.msra.gmra.mrb[16].mxu1 %vm7640_vm10, %v4715_v32  ;;  %v2165_v38 = vrot.slane %v1920_v31, 1  ;;  %v1956_v39 = vshrl.u32 %v1920_v31, 16  ;;  %v1965_v45 = vrot.slane %v1963_v35, 1 }
 0x543   : > { %5364 = vmatpush3.bf16.msra.mxu1 %v6017_v46  ;;  %5379 = vmatprep.mubr.bf16.mxu1 %v2323_v34  ;;  %v6025_v46 = vld [vmem:[#allocation13 + $0x60] sm:$0xff]   ;;  %v2788_v31 = vrot.slane %v7607_v62, 2  ;;  %v2789_v32 = vrot.slane %v7611_v2, 2  ;;  %v2662_v34 = vrot.slane %v7623_v14, 1  ;;  %v2663_v35 = vrot.slane %v7614_v3, 2 }
 0x544   : > { %v1960_v40 = vrot.slane %v1958_v37, 1  ;;  %5365 = vmatprep.subr.bf16.mxu1 %v6019_v33  ;;  %v7650_v42 = vsel %vm1384_vm2, %v2165_v38, %v2166_v36  ;;  %v2665_v36 = vrot.slane %v7660_v61, 1  ;;  %v2666_v37 = vrot.slane %v7627_v16, 2  ;;  %v6051_v38 = vld [vmem:[#allocation13 + $0x108] sm:$0xff]  }
 0x546   : > { %v1961_v47 = vor.u32 %v1960_v40, %v1956_v39  ;;  %v2790_v39 = vsel %vm2787_vm11, %v2788_v31, %v2789_v32  ;;  %v6050_v40 = vld [vmem:[#allocation13 + $0xc0] sm:$0xff]   ;;  %v6082_v31 = vld [vmem:[#allocation14 + $0x8] sm:$0xff]  }
 0x547   : > { %5366 = vmatpush3.bf16.msra.mxu1 %v6019_v33  ;;  %v6048_v33 = vld [vmem:[#allocation13 + $0x38] sm:$0xff]  }
 0x548   : > { %v1966_v50 = vsel %vm1155_vm1, %v1961_v47, %v1965_v45  ;;  %5367 = vmatprep.subr.bf16.mxu1 %v6021_v41  ;;  %v6053_v45 = vld [vmem:[#allocation13 + $0x110] sm:$0xff]   ;;  %v6052_v47 = vld [vmem:[#allocation13 + $0xc8] sm:$0xff]  }
 0x549   : > { %5320 = vmatmul.mubr.bf16.vlgmr.msra.gmra.mrb[16].mxu0 %v1966_v50  ;;  %v6055_v50 = vld [vmem:[#allocation13 + $0x118] sm:$0xff]  }
 0x54a   : > { %5344 = vmatpush3.bf16.msra.mxu0 %v6018_v48  ;;  %5359 = vmatprep.mubr.msk.bf16.mxu0 %vm6831_vm0, %v6830_v0 }
 0x54b   : > { %5345 = vmatprep.subr.bf16.mxu0 %v6830_v0  ;;  %5368 = vmatpush3.bf16.msra.mxu1 %v6021_v41  ;;  %v2664_v41 = vor.u32 %v2663_v35, %v2662_v34  ;;  %v6084_v34 = vld [vmem:[#allocation14 + $0x10] sm:$0xff]  }
 0x54c   : > { %5369 = vmatprep.subr.bf16.mxu1 %v6023_v51  ;;  %v6087_v35 = vld [vmem:[#allocation14 + $0x50] sm:$0xff]  }
 0x54e   : > { %5346 = vmatpush3.bf16.msra.mxu0 %v6020_v52  ;;  %v6057_v52 = vld [vmem:[#allocation13 + $0x120] sm:$0xff]  }
 0x54f   : > { %5347 = vmatprep.subr.bf16.mxu0 %v6830_v0  ;;  %5370 = vmatpush3.bf16.msra.mxu1 %v6023_v51  ;;  %v6054_v51 = vld [vmem:[#allocation13 + $0xd0] sm:$0xff]  }
 0x550   : > { %5371 = vmatprep.subr.bf16.mxu1 %v6025_v46 }
 0x552   : > { %5348 = vmatpush3.bf16.msra.mxu0 %v6022_v53  ;;  %v6059_v53 = vld [vmem:[#allocation13 + $0x128] sm:$0xff]  }
 0x553   : > { %5349 = vmatprep.subr.bf16.mxu0 %v6830_v0  ;;  %5372 = vmatpush3.bf16.msra.mxu1 %v6025_v46  ;;  %v6056_v46 = vld [vmem:[#allocation13 + $0xd8] sm:$0xff]  }
 0x554   : > { %5373 = vmatprep.subr.bf16.mxu1 %v6027_v55 }
 0x556   : > { %5350 = vmatpush3.bf16.msra.mxu0 %v6024_v56  ;;  %v6061_v56 = vld [vmem:[#allocation13 + $0x130] sm:$0xff]  }
 0x557   : > { %5351 = vmatprep.subr.bf16.mxu0 %v6830_v0  ;;  %5374 = vmatpush3.bf16.msra.mxu1 %v6027_v55  ;;  %v6058_v55 = vld [vmem:[#allocation13 + $0xe0] sm:$0xff]  }
 0x558   : > { %5375 = vmatprep.subr.bf16.mxu1 %v6029_v57 }
 0x55a   : > { %5352 = vmatpush3.bf16.msra.mxu0 %v6026_v58  ;;  %v6063_v58 = vld [vmem:[#allocation13 + $0x138] sm:$0xff]  }
 0x55b   : > { %5353 = vmatprep.subr.bf16.mxu0 %v6830_v0  ;;  %5376 = vmatpush3.bf16.msra.mxu1 %v6029_v57  ;;  %v6060_v57 = vld [vmem:[#allocation13 + $0xe8] sm:$0xff]  }
 0x55c   : > { %5377 = vmatprep.subr.bf16.mxu1 %v6031_v59 }
 0x55e   : > { %5354 = vmatpush3.bf16.msra.mxu0 %v6028_v60  ;;  %v6065_v60 = vld [vmem:[#allocation13 + $0x180] sm:$0xff]  }
 0x55f   : > { %5355 = vmatprep.subr.bf16.mxu0 %v6830_v0  ;;  %5378 = vmatpush3.bf16.msra.mxu1 %v6031_v59  ;;  %v6062_v59 = vld [vmem:[#allocation13 + $0xf0] sm:$0xff]  }
 0x560   : > { %5403 = vmatprep.subr.bf16.mxu1 %v6033_v63 }
 0x562   : > { %5356 = vmatpush3.bf16.msra.mxu0 %v6030_v6  ;;  %5380 = vmatmul.mubr.bf16.vlgmr.msra.gmra.mrb[20].mxu1 %v2326_v9  ;;  %v2910_v6 = vrot.slane %v7623_v14, 2  ;;  %v2911_v9 = vrot.slane %v7614_v3, 3  ;;  %v6069_v3 = vld [vmem:[#allocation13 + $0x190] sm:$0xff]  }
 0x563   : > { %5357 = vmatprep.subr.bf16.mxu0 %v6830_v0  ;;  %5404 = vmatpush3.bf16.msra.mxu1 %v6033_v63  ;;  %v3036_v63 = vrot.slane %v7607_v62, 3 }
 0x564   : > { %5405 = vmatprep.subr.bf16.mxu1 %v6035_v10  ;;  %5419 = vmatprep.mubr.bf16.mxu1 %v2542_v12  ;;  %v2914_v12 = vrot.slane %v7627_v16, 3  ;;  %v6068_v16 = vld [vmem:[#allocation13 + $0x148] sm:$0xff]  }
 0x566   : > { %5358 = vmatpush3.bf16.msra.mxu0 %v6032_v13  ;;  %v6067_v13 = vld [vmem:[#allocation13 + $0x188] sm:$0xff]  }
 0x567   : > { %5383 = vmatprep.subr.bf16.mxu0 %v6034_v15  ;;  %5406 = vmatpush3.bf16.msra.mxu1 %v6035_v10  ;;  %v2913_v10 = vrot.slane %v7660_v61, 2 }
 0x568   : > { %5407 = vmatprep.subr.bf16.mxu1 %v6037_v17 }
 0x569   : > { %5360 = vmatmul.mubr.bf16.vlgmr.msra.gmra.mrb[20].mxu0 %v7650_v42  ;;  %v7685_v42 = vor.u32 %v2666_v37, %v2665_v36  ;;  %v2915_v14 = vor.u32 %v2914_v12, %v2913_v10  ;;  %v6088_v37 = vld [vmem:[#allocation14 + $0x20] sm:$0xff]  }
 0x56a   : > { %5384 = vmatpush3.bf16.msra.mxu0 %v6034_v15  ;;  %5399 = vmatprep.mubr.bf16.mxu0 %v7607_v62  ;;  %v3038_v62 = vsel %vm3035_vm13, %v3036_v63, %v3037_v1  ;;  %v6066_v15 = vld [vmem:[#allocation13 + $0x140] sm:$0xff]  }
 0x56b   : > { %5385 = vmatprep.subr.bf16.mxu0 %v6036_v18  ;;  %5408 = vmatpush3.bf16.msra.mxu1 %v6037_v17  ;;  %v2668_v48 = vsel %vm2661_vm12, %v2664_v41, %v7685_v42  ;;  %v2912_v17 = vor.u32 %v2911_v9, %v2910_v6  ;;  %v6089_v41 = vld [vmem:[#allocation14 + $0x58] sm:$0xff]   ;;  %v4725_v9 = vld [vmem:[#allocation25] ss:$0 sm:$0xff] }
 0x56c   : > { %5409 = vmatprep.subr.bf16.mxu1 %v6039_v19 }
 0x56d   : > { %v2916_v61 = vsel %vm2909_vm14, %v2912_v17, %v2915_v14 }
 0x56e   : > { %5386 = vmatpush3.bf16.msra.mxu0 %v6036_v18  ;;  %v6071_v18 = vld [vmem:[#allocation13 + $0x198] sm:$0xff]  }
 0x56f   : > { %5387 = vmatprep.subr.bf16.mxu0 %v6038_v20  ;;  %5410 = vmatpush3.bf16.msra.mxu1 %v6039_v19  ;;  %v6070_v19 = vld [vmem:[#allocation13 + $0x150] sm:$0xff]  }
 0x570   : > { %5411 = vmatprep.subr.bf16.mxu1 %v6041_v21 }
 0x572   : > { %5388 = vmatpush3.bf16.msra.mxu0 %v6038_v20  ;;  %v6073_v20 = vld [vmem:[#allocation13 + $0x1a0] sm:$0xff]  }
 0x573   : > { %5389 = vmatprep.subr.bf16.mxu0 %v6040_v22  ;;  %5412 = vmatpush3.bf16.msra.mxu1 %v6041_v21  ;;  %v6072_v21 = vld [vmem:[#allocation13 + $0x158] sm:$0xff]  }
 0x574   : > { %5413 = vmatprep.subr.bf16.mxu1 %v6043_v23 }
 0x576   : > { %5390 = vmatpush3.bf16.msra.mxu0 %v6040_v22  ;;  %v6075_v22 = vld [vmem:[#allocation13 + $0x1a8] sm:$0xff]  }
 0x577   : > { %5391 = vmatprep.subr.bf16.mxu0 %v6042_v24  ;;  %5414 = vmatpush3.bf16.msra.mxu1 %v6043_v23  ;;  %v6074_v23 = vld [vmem:[#allocation13 + $0x160] sm:$0xff]  }
 0x578   : > { %5415 = vmatprep.subr.bf16.mxu1 %v6045_v25 }
 0x57a   : > { %5392 = vmatpush3.bf16.msra.mxu0 %v6042_v24  ;;  %v6077_v24 = vld [vmem:[#allocation13 + $0x1b0] sm:$0xff]  }
 0x57b   : > { %5393 = vmatprep.subr.bf16.mxu0 %v6044_v26  ;;  %5416 = vmatpush3.bf16.msra.mxu1 %v6045_v25  ;;  %v6076_v25 = vld [vmem:[#allocation13 + $0x168] sm:$0xff]  }
 0x57c   : > { %5417 = vmatprep.subr.bf16.mxu1 %v6047_v27 }
 0x57e   : > { %5394 = vmatpush3.bf16.msra.mxu0 %v6044_v26  ;;  %v6079_v26 = vld [vmem:[#allocation13 + $0x1b8] sm:$0xff]  }
 0x57f   : > { %5395 = vmatprep.subr.bf16.mxu0 %v6046_v28  ;;  %5418 = vmatpush3.bf16.msra.mxu1 %v6047_v27  ;;  %v6078_v27 = vld [vmem:[#allocation13 + $0x170] sm:$0xff]  }
 0x580   : > { %5443 = vmatprep.subr.bf16.mxu1 %v6049_v29 }
 0x582   : > { %5396 = vmatpush3.bf16.msra.mxu0 %v6046_v28  ;;  %5420 = vmatmul.mubr.bf16.vlgmr.msra.gmra.mrb[24].mxu1 %v2541_v5  ;;  %v6064_v5 = vld [vmem:[#allocation13 + $0xf8] sm:$0xff]  }
 0x583   : > { %5397 = vmatprep.subr.bf16.mxu0 %v6048_v33  ;;  %5444 = vmatpush3.bf16.msra.mxu1 %v6049_v29  ;;  %v6080_v28 = vld [vmem:[#allocation13 + $0x178] sm:$0xff]   ;;  %v6081_v29 = vld [vmem:[#allocation14] sm:$0xff]  }
 0x584   : > { %5445 = vmatprep.subr.bf16.mxu1 %v6051_v38  ;;  %5459 = vmatprep.mubr.bf16.mxu1 %v2790_v39 }
 0x586   : > { %5398 = vmatpush3.bf16.msra.mxu0 %v6048_v33  ;;  %v6085_v33 = vld [vmem:[#allocation14 + $0x48] sm:$0xff]  }
 0x587   : > { %5423 = vmatprep.subr.bf16.mxu0 %v6050_v40  ;;  %5446 = vmatpush3.bf16.msra.mxu1 %v6051_v38 }
 0x588   : > { %5447 = vmatprep.subr.bf16.mxu1 %v6053_v45 }
 0x589   : > { %5400 = vmatmul.mubr.bf16.vlgmr.msra.gmra.mrb[24].mxu0 %v7611_v2  ;;  %v6086_v2 = vld [vmem:[#allocation14 + $0x18] sm:$0xff]  }
 0x58a   : > { %5424 = vmatpush3.bf16.msra.mxu0 %v6050_v40  ;;  %5439 = vmatprep.mubr.bf16.mxu0 %v2668_v48  ;;  %v6090_v48 = vld [vmem:[#allocation14 + $0x28] sm:$0xff]  }
 0x58b   : > { %5425 = vmatprep.subr.bf16.mxu0 %v6052_v47  ;;  %5448 = vmatpush3.bf16.msra.mxu1 %v6053_v45 }
 0x58c   : > { %5449 = vmatprep.subr.bf16.mxu1 %v6055_v50 }
 0x58e   : > { %5426 = vmatpush3.bf16.msra.mxu0 %v6052_v47 }
 0x58f   : > { %5427 = vmatprep.subr.bf16.mxu0 %v6054_v51  ;;  %5450 = vmatpush3.bf16.msra.mxu1 %v6055_v50 }
 0x590   : > { %5451 = vmatprep.subr.bf16.mxu1 %v6057_v52 }
 0x592   : > { %5428 = vmatpush3.bf16.msra.mxu0 %v6054_v51 }
 0x593   : > { %5429 = vmatprep.subr.bf16.mxu0 %v6056_v46  ;;  %5452 = vmatpush3.bf16.msra.mxu1 %v6057_v52 }
 0x594   : > { %5453 = vmatprep.subr.bf16.mxu1 %v6059_v53 }
 0x596   : > { %5430 = vmatpush3.bf16.msra.mxu0 %v6056_v46  ;;  %v6091_v46 = vld [vmem:[#allocation14 + $0x60] sm:$0xff]  }
 0x597   : > { %5431 = vmatprep.subr.bf16.mxu0 %v6058_v55  ;;  %5454 = vmatpush3.bf16.msra.mxu1 %v6059_v53  ;;  %v6092_v53 = vld [vmem:[#allocation14 + $0x30] sm:$0xff]  }
 0x598   : > { %5455 = vmatprep.subr.bf16.mxu1 %v6061_v56 }
 0x59a   : > { %5432 = vmatpush3.bf16.msra.mxu0 %v6058_v55  ;;  %v6093_v55 = vld [vmem:[#allocation14 + $0x68] sm:$0xff]  }
 0x59b   : > { %5433 = vmatprep.subr.bf16.mxu0 %v6060_v57  ;;  %5456 = vmatpush3.bf16.msra.mxu1 %v6061_v56  ;;  %v6094_v56 = vld [vmem:[#allocation14 + $0x38] sm:$0xff]  }
 0x59c   : > { %5457 = vmatprep.subr.bf16.mxu1 %v6063_v58 }
 0x59e   : > { %5434 = vmatpush3.bf16.msra.mxu0 %v6060_v57  ;;  %v6095_v57 = vld [vmem:[#allocation14 + $0x70] sm:$0xff]  }
 0x59f   : > { %5435 = vmatprep.subr.bf16.mxu0 %v6062_v59  ;;  %5458 = vmatpush3.bf16.msra.mxu1 %v6063_v58  ;;  %v6096_v58 = vld [vmem:[#allocation14 + $0x78] sm:$0xff]  }
 0x5a0   : > { %5483 = vmatprep.subr.bf16.mxu1 %v6065_v60 }
 0x5a2   : > { %5436 = vmatpush3.bf16.msra.mxu0 %v6062_v59  ;;  %5460 = vmatmul.mubr.bf16.vlgmr.msra.gmra.mrb[28].mxu1 %v2789_v32  ;;  %v6083_v32 = vld [vmem:[#allocation14 + $0x40] sm:$0xff]  }
 0x5a3   : > { %5437 = vmatprep.subr.bf16.mxu0 %v6064_v5  ;;  %5484 = vmatpush3.bf16.msra.mxu1 %v6065_v60  ;;  %v7702_v59 = vld [vmem:[#allocation14 + $0x80] sm:$0xff]  }
 0x5a4   : > { %5485 = vmatprep.subr.bf16.mxu1 %v6067_v13  ;;  %5499 = vmatprep.mubr.bf16.mxu1 %v3038_v62 }
 0x5a6   : > { %5438 = vmatpush3.bf16.msra.mxu0 %v6064_v5 }
 0x5a7   : > { %5463 = vmatprep.subr.bf16.mxu0 %v6066_v15  ;;  %5486 = vmatpush3.bf16.msra.mxu1 %v6067_v13 }
 0x5a8   : > { %5487 = vmatprep.subr.bf16.mxu1 %v6069_v3 }
 0x5a9   : > { %5440 = vmatmul.mubr.bf16.vlgmr.msra.gmra.mrb[28].mxu0 %v7685_v42 }
 0x5aa   : > { %5464 = vmatpush3.bf16.msra.mxu0 %v6066_v15  ;;  %5479 = vmatprep.mubr.bf16.mxu0 %v2916_v61 }
 0x5ab   : > { %5465 = vmatprep.subr.bf16.mxu0 %v6068_v16  ;;  %5488 = vmatpush3.bf16.msra.mxu1 %v6069_v3 }
 0x5ac   : > { %5489 = vmatprep.subr.bf16.mxu1 %v6071_v18 }
 0x5ae   : > { %5466 = vmatpush3.bf16.msra.mxu0 %v6068_v16 }
 0x5af   : > { %5467 = vmatprep.subr.bf16.mxu0 %v6070_v19  ;;  %5490 = vmatpush3.bf16.msra.mxu1 %v6071_v18 }
 0x5b0   : > { %5491 = vmatprep.subr.bf16.mxu1 %v6073_v20 }
 0x5b2   : > { %5468 = vmatpush3.bf16.msra.mxu0 %v6070_v19 }
 0x5b3   : > { %5469 = vmatprep.subr.bf16.mxu0 %v6072_v21  ;;  %5492 = vmatpush3.bf16.msra.mxu1 %v6073_v20 }
 0x5b4   : > { %5493 = vmatprep.subr.bf16.mxu1 %v6075_v22 }
 0x5b6   : > { %5470 = vmatpush3.bf16.msra.mxu0 %v6072_v21 }
 0x5b7   : > { %5471 = vmatprep.subr.bf16.mxu0 %v6074_v23  ;;  %5494 = vmatpush3.bf16.msra.mxu1 %v6075_v22 }
 0x5b8   : > { %5495 = vmatprep.subr.bf16.mxu1 %v6077_v24 }
 0x5ba   : > { %5472 = vmatpush3.bf16.msra.mxu0 %v6074_v23 }
 0x5bb   : > { %5473 = vmatprep.subr.bf16.mxu0 %v6076_v25  ;;  %5496 = vmatpush3.bf16.msra.mxu1 %v6077_v24 }
 0x5bc   : > { %5497 = vmatprep.subr.bf16.mxu1 %v6079_v26 }
 0x5be   : > { %5474 = vmatpush3.bf16.msra.mxu0 %v6076_v25 }
 0x5bf   : > { %5475 = vmatprep.subr.bf16.mxu0 %v6078_v27  ;;  %5498 = vmatpush3.bf16.msra.mxu1 %v6079_v26 }
 0x5c0   : > { %5523 = vmatprep.subr.bf16.mxu1 %v6081_v29 }
 0x5c2   : > { %5476 = vmatpush3.bf16.msra.mxu0 %v6078_v27  ;;  %5500 = vmatmul.mubr.bf16.vlgmr.msra.gmra.mrb[32].mxu1 %v3037_v1 }
 0x5c3   : > { %5477 = vmatprep.subr.bf16.mxu0 %v6080_v28  ;;  %5524 = vmatpush3.bf16.msra.mxu1 %v6081_v29 }
 0x5c4   : > { %5525 = vmatprep.subr.bf16.mxu1 %v6082_v31 }
 0x5c6   : > { %5478 = vmatpush3.bf16.msra.mxu0 %v6080_v28 }
 0x5c7   : > { %5503 = vmatprep.subr.bf16.mxu0 %v6083_v32  ;;  %5526 = vmatpush3.bf16.msra.mxu1 %v6082_v31 }
 0x5c8   : > { %5527 = vmatprep.subr.bf16.mxu1 %v6084_v34 }
 0x5c9   : > { %5480 = vmatmul.mubr.bf16.vlgmr.msra.gmra.mrb[32].mxu0 %v2915_v14 }
 0x5ca   : > { %5504 = vmatpush3.bf16.msra.mxu0 %v6083_v32 }
 0x5cb   : > { %5505 = vmatprep.subr.bf16.mxu0 %v6085_v33  ;;  %5528 = vmatpush3.bf16.msra.mxu1 %v6084_v34 }
 0x5cc   : > { %5529 = vmatprep.subr.bf16.mxu1 %v6086_v2 }
 0x5ce   : > { %5506 = vmatpush3.bf16.msra.mxu0 %v6085_v33 }
 0x5cf   : > { %5507 = vmatprep.subr.bf16.mxu0 %v6087_v35  ;;  %5530 = vmatpush3.bf16.msra.mxu1 %v6086_v2 }
 0x5d0   : > { %5531 = vmatprep.subr.bf16.mxu1 %v6088_v37 }
 0x5d2   : > { %5508 = vmatpush3.bf16.msra.mxu0 %v6087_v35 }
 0x5d3   : > { %5532 = vmatpush3.bf16.msra.mxu1 %v6088_v37  ;;  %5509 = vmatprep.subr.bf16.mxu0 %v6089_v41 }
 0x5d4   : > { %5533 = vmatprep.subr.bf16.mxu1 %v6090_v48 }
 0x5d6   : > { %5510 = vmatpush3.bf16.msra.mxu0 %v6089_v41 }
 0x5d7   : > { %5534 = vmatpush3.bf16.msra.mxu1 %v6090_v48  ;;  %5511 = vmatprep.subr.bf16.mxu0 %v6091_v46 }
 0x5d8   : > { %5535 = vmatprep.subr.bf16.mxu1 %v6092_v53 }
 0x5da   : > { %5512 = vmatpush3.bf16.msra.mxu0 %v6091_v46 }
 0x5db   : > { %5536 = vmatpush3.bf16.msra.mxu1 %v6092_v53  ;;  %5513 = vmatprep.subr.bf16.mxu0 %v6093_v55 }
 0x5dc   : > { %5537 = vmatprep.subr.bf16.mxu1 %v6094_v56 }
 0x5de   : > { %5514 = vmatpush3.bf16.msra.mxu0 %v6093_v55 }
 0x5df   : > { %5538 = vmatpush3.bf16.msra.mxu1 %v6094_v56  ;;  %5515 = vmatprep.subr.bf16.mxu0 %v6095_v57  ;;  %v4786_v56 = vld [vmem:[#allocation26] ss:$0 sm:$0xff] }
 0x5e2   : > { %5516 = vmatpush3.bf16.msra.mxu0 %v6095_v57 }
 0x5e3   : > { %5517 = vmatprep.subr.bf16.mxu0 %v6096_v58 }
 0x5e6   : > { %5518 = vmatpush3.bf16.msra.mxu0 %v6096_v58 }
 0x5e7   : > { %5543 = vmatprep.subr.bf16.mxu0 %v7702_v59 }
 0x615   : > { %v2139_v36 = vpop.f32.mrb[16].mxu1 }
 0x616   : > { %v5341_v38 = vpop.f32.mrb[17].mxu1 }
 0x617   : > { %v2142_v39 = vpop.f32.mrb[18].mxu1 }
 0x618   : > { %v5342_v40 = vpop.f32.mrb[19].mxu1 }
 0x61c   : > { %v2050_v42 = vpop.f32.mrb[16].mxu0 }
 0x61d   : > { %v2140_v45 = vadd.f32 %v2139_v36, %v2050_v42  ;;  %v5321_v47 = vpop.f32.mrb[17].mxu0 }
 0x61e   : > { %v2053_v50 = vpop.f32.mrb[18].mxu0 }
 0x61f   : > { %v2143_v51 = vadd.f32 %v2142_v39, %v2053_v50  ;;  %v5322_v52 = vpop.f32.mrb[19].mxu0 }
 0x635   : > { %v5381_v60 = vpop.f32.mrb[20].mxu1 }
 0x636   : > { %v2411_v63 = vpop.f32.mrb[21].mxu1 }
 0x637   : > { %v5382_v1 = vpop.f32.mrb[22].mxu1 }
 0x638   : > { %v2414_v5 = vpop.f32.mrb[23].mxu1 }
 0x63c   : > { %v2251_v6 = vpop.f32.mrb[20].mxu0 }
 0x63d   : > { %v2258_v10 = vadd.f32 %v2251_v6, %v2140_v45  ;;  %v5361_v12 = vpop.f32.mrb[21].mxu0 }
 0x63e   : > { %v2254_v13 = vpop.f32.mrb[22].mxu0 }
 0x63f   : > { %v2267_v62 = vadd.f32 %v4725_v9, %v2258_v10  ;;  %v2259_v15 = vadd.f32 %v2254_v13, %v2143_v51  ;;  %v5362_v17 = vpop.f32.mrb[23].mxu0 }
 0x641   : > { %v2269_v14 = vmax.f32 %v2267_v62, 0.0  ;;  %v2268_v3 = vadd.f32 %v4725_v9, %v2259_v15 }
 0x643   : > { %4288 = vst [vmem:[%s7540_s21 + $0x8] sm:$0xff] %v2269_v14  ;;  %v2270_v16 = vmax.f32 %v2268_v3, 0.0 }
 0x645   : > { %4291 = vst [vmem:[%s7540_s21 + $0x20] sm:$0xff] %v2270_v16 }
 0x655   : > { %v5421_v61 = vpop.f32.mrb[24].mxu1 }
 0x656   : > { %v2627_v18 = vpop.f32.mrb[25].mxu1 }
 0x657   : > { %v5422_v19 = vpop.f32.mrb[26].mxu1 }
 0x658   : > { %v2630_v20 = vpop.f32.mrb[27].mxu1 }
 0x65c   : > { %v5401_v21 = vpop.f32.mrb[24].mxu0 }
 0x65d   : > { %v2516_v22 = vadd.f32 %v5401_v21, %v5381_v60  ;;  %v2507_v23 = vpop.f32.mrb[25].mxu0  ;;  %v3157_v60 = vadd.s32 4294967293, %v7547_v44 }
 0x65e   : > { %v2508_v24 = vadd.f32 %v2507_v23, %v2411_v63  ;;  %v5402_v25 = vpop.f32.mrb[26].mxu0 }
 0x65f   : > { %v2643_v26 = vadd.f32 %v5421_v61, %v2516_v22  ;;  %v2510_v27 = vpop.f32.mrb[27].mxu0  ;;  %vm3163_vm15 = vcmp.lt.s32.totalorder %v3157_v60, 16 }
 0x660   : > { %v2641_v28 = vadd.f32 %v2627_v18, %v2508_v24  ;;  %v2511_v29 = vadd.f32 %v2510_v27, %v2414_v5  ;;  %v3155_v5 = vadd.s32 4294967293, %v7544_v43  ;;  %vm4806_vm13 = vmpackc.low %vm3163_vm15, %vm3163_vm15 }
 0x662   : > { %v2642_v31 = vadd.f32 %v2630_v20, %v2511_v29  ;;  %vm3158_vm11 = vcmp.ge.s32.totalorder %v3155_v5, 0 }
 0x663   : > { %vm4803_vm12 = vmpackc.low %vm6832_vm5, %vm3158_vm11 }
 0x675   : > { %v5461_v32 = vpop.f32.mrb[28].mxu1 }
 0x676   : > { %v2875_v33 = vpop.f32.mrb[29].mxu1 }
 0x677   : > { %v5462_v34 = vpop.f32.mrb[30].mxu1 }
 0x678   : > { %v2878_v35 = vpop.f32.mrb[31].mxu1  ;;  %v6100_v34 = vld [vmem:[#allocation14 + $0x98] sm:$0xff]  }
 0x67c   : > { %v5441_v2 = vpop.f32.mrb[28].mxu0 }
 0x67d   : > { %v2769_v36 = vadd.f32 %v5441_v2, %v2643_v26  ;;  %v2753_v37 = vpop.f32.mrb[29].mxu0  ;;  %v6102_v2 = vld [vmem:[#allocation14 + $0xa8] sm:$0xff]  }
 0x67e   : > { %v2767_v38 = vadd.f32 %v2753_v37, %v2641_v28  ;;  %v5442_v39 = vpop.f32.mrb[30].mxu0  ;;  %v6104_v37 = vld [vmem:[#allocation14 + $0xb8] sm:$0xff]  }
 0x67f   : > { %v2891_v40 = vadd.f32 %v5461_v32, %v2769_v36  ;;  %v2756_v41 = vpop.f32.mrb[31].mxu0  ;;  %v6098_v32 = vld [vmem:[#allocation14 + $0x88] sm:$0xff]   ;;  %v6103_v36 = vld [vmem:[#allocation14 + $0xb0] sm:$0xff]   ;;  %v6107_v39 = vld [vmem:[#allocation16 + $0x40] sm:$0xff]  }
 0x680   : > { %v2889_v42 = vadd.f32 %v2875_v33, %v2767_v38  ;;  %v2768_v45 = vadd.f32 %v2756_v41, %v2642_v31  ;;  %v6099_v33 = vld [vmem:[#allocation14 + $0x90] sm:$0xff]   ;;  %v6106_v38 = vld [vmem:[#allocation16 + $0x8] sm:$0xff]   ;;  %5563 = vmatprep.subr.bf16.mxu1 %v6107_v39 }
 0x681   : > { %v6108_v41 = vld [vmem:[#allocation16 + $0x10] sm:$0xff]  }
 0x682   : > { %v2890_v47 = vadd.f32 %v2878_v35, %v2768_v45  ;;  %v6101_v35 = vld [vmem:[#allocation14 + $0xa0] sm:$0xff]   ;;  %v6110_v45 = vld [vmem:[#allocation16 + $0x18] sm:$0xff]  }
 0x695   : > { %v5501_v48 = vpop.f32.mrb[32].mxu1 }
 0x696   : > { %v3123_v50 = vpop.f32.mrb[33].mxu1 }
 0x697   : > { %v5502_v51 = vpop.f32.mrb[34].mxu1 }
 0x698   : > { %v3126_v52 = vpop.f32.mrb[35].mxu1  ;;  %v6115_v51 = vld [vmem:[#allocation16 + $0x60] sm:$0xff]  }
 0x69c   : > { %v5481_v46 = vpop.f32.mrb[32].mxu0 }
 0x69d   : > { %v3017_v53 = vadd.f32 %v5481_v46, %v2891_v40  ;;  %v3001_v55 = vpop.f32.mrb[33].mxu0  ;;  %v6109_v40 = vld [vmem:[#allocation16 + $0x48] sm:$0xff]  }
 0x69e   : > { %v3015_v57 = vadd.f32 %v3001_v55, %v2889_v42  ;;  %v5482_v58 = vpop.f32.mrb[34].mxu0  ;;  %v6111_v42 = vld [vmem:[#allocation16 + $0x50] sm:$0xff]   ;;  %v6117_v46 = vld [vmem:[#allocation16 + $0x68] sm:$0xff]  }
 0x69f   : > { %v3139_v63 = vadd.f32 %v5501_v48, %v3017_v53  ;;  %v3004_v1 = vpop.f32.mrb[35].mxu0  ;;  %v6112_v48 = vld [vmem:[#allocation16 + $0x20] sm:$0xff]   ;;  %v6118_v53 = vld [vmem:[#allocation16 + $0x38] sm:$0xff]   ;;  %v6119_v55 = vld [vmem:[#allocation16 + $0x70] sm:$0xff]  }
 0x6a0   : > { %v3137_v6 = vadd.f32 %v3123_v50, %v3015_v57  ;;  %v3016_v9 = vadd.f32 %v3004_v1, %v2890_v47  ;;  %v6113_v47 = vld [vmem:[#allocation16 + $0x58] sm:$0xff]   ;;  %v6114_v50 = vld [vmem:[#allocation16 + $0x28] sm:$0xff]   ;;  %v6121_v57 = vld [vmem:[#allocation16 + $0x80] sm:$0xff]  }
 0x6a1   : > { %v3149_v10 = vadd.f32 %v4786_v56, %v3139_v63 }
 0x6a2   : > { %v3147_v12 = vadd.f32 %v4786_v56, %v3137_v6  ;;  %v3138_v13 = vadd.f32 %v3126_v52, %v3016_v9  ;;  %v6116_v52 = vld [vmem:[#allocation16 + $0x30] sm:$0xff]  }
 0x6a3   : > { %v3152_v62 = vmax.f32 %v3149_v10, 0.0 }
 0x6a4   : > { %v3150_v15 = vmax.f32 %v3147_v12, 0.0  ;;  %v3148_v17 = vadd.f32 %v4786_v56, %v3138_v13  ;;  %v6120_v56 = vld [vmem:[#allocation16 + $0x78] sm:$0xff]  }
 0x6a5   : > { %v3169_v14 = vsel %vm3163_vm15, %v3152_v62, 0.0  ;;  %v4807_v19 = vpack.c.bf16 %v3152_v62, %v3152_v62 }
 0x6a6   : > { %v3151_v3 = vmax.f32 %v3148_v17, 0.0  ;;  %v3167_v16 = vsel %vm3158_vm11, %v3150_v15, 0.0  ;;  %v3171_v61 = vpack.c.bf16 %v3169_v14, %v3169_v14  ;;  %v4817_v17 = vld [vmem:[#allocation28] ss:$0 sm:$0xff] }
 0x6a8   : > { %v4804_v44 = vpack.c.bf16 %v3151_v3, %v3150_v15  ;;  %v3170_v18 = vpack.c.bf16 %v3151_v3, %v3167_v16  ;;  %v3213_v43 = vshll.u32 %v3171_v61, 16  ;;  %v3434_v22 = vrot.slane %v3171_v61, 1 }
 0x6a9   : > { %v3217_v28 = vshrl.u32 %v3171_v61, 16 }
 0x6aa   : > { %5539 = vmatprep.mubr.msk.bf16.mxu1 %vm4803_vm12, %v4804_v44  ;;  %v3208_v20 = vshll.u32 %v3170_v18, 16  ;;  %v3433_v21 = vrot.slane %v3170_v18, 1  ;;  %v3206_v23 = vshrl.u32 %v3170_v18, 16  ;;  %v3215_v25 = vrot.slane %v3213_v43, 1 }
 0x6ab   : > { %5540 = vmatmul.mubr.msk.bf16.vlgmr.msra.gmra.mrb[36].mxu1 %vm4806_vm13, %v4807_v19 }
 0x6ac   : > { %v3210_v24 = vrot.slane %v3208_v20, 1  ;;  %v3435_v26 = vsel %vm1384_vm2, %v3433_v21, %v3434_v22  ;;  %v3219_v31 = vor.u32 %v3217_v28, %v3215_v25  ;;  %5564 = vmatpush3.bf16.msra.mxu1 %v6107_v39  ;;  %v6124_v39 = vld [vmem:[#allocation16 + $0x98] sm:$0xff]  }
 0x6ad   : > { %5565 = vmatprep.subr.bf16.mxu1 %v6109_v40 }
 0x6ae   : > { %v3211_v27 = vor.u32 %v3210_v24, %v3206_v23 }
 0x6b0   : > { %v3216_v29 = vsel %vm1155_vm1, %v3211_v27, %v3215_v25  ;;  %5566 = vmatpush3.bf16.msra.mxu1 %v6109_v40  ;;  %v6125_v40 = vld [vmem:[#allocation16 + $0xa0] sm:$0xff]  }
 0x6b1   : > { %5519 = vmatprep.mubr.bf16.mxu0 %v3216_v29  ;;  %5567 = vmatprep.subr.bf16.mxu1 %v6111_v42 }
 0x6b2   : > { %5520 = vmatmul.mubr.bf16.vlgmr.msra.gmra.mrb[36].mxu0 %v3219_v31 }
 0x6b3   : > { %5544 = vmatpush3.bf16.msra.mxu0 %v7702_v59  ;;  %5559 = vmatprep.mubr.bf16.mxu0 %v3435_v26  ;;  %v6105_v59 = vld [vmem:[#allocation16] sm:$0xff]  }
 0x6b4   : > { %5545 = vmatprep.subr.bf16.mxu0 %v6098_v32  ;;  %5568 = vmatpush3.bf16.msra.mxu1 %v6111_v42  ;;  %v6127_v42 = vld [vmem:[#allocation16 + $0xb0] sm:$0xff]  }
 0x6b5   : > { %5569 = vmatprep.subr.bf16.mxu1 %v6113_v47 }
 0x6b7   : > { %5546 = vmatpush3.bf16.msra.mxu0 %v6098_v32 }
 0x6b8   : > { %5547 = vmatprep.subr.bf16.mxu0 %v6099_v33  ;;  %5570 = vmatpush3.bf16.msra.mxu1 %v6113_v47  ;;  %v6129_v47 = vld [vmem:[#allocation17] sm:$0xff]  }
 0x6b9   : > { %5571 = vmatprep.subr.bf16.mxu1 %v6115_v51 }
 0x6bb   : > { %5548 = vmatpush3.bf16.msra.mxu0 %v6099_v33 }
 0x6bc   : > { %5549 = vmatprep.subr.bf16.mxu0 %v6100_v34  ;;  %5572 = vmatpush3.bf16.msra.mxu1 %v6115_v51  ;;  %v6133_v51 = vld [vmem:[#allocation17 + $0x48] sm:$0xff]  }
 0x6bd   : > { %5573 = vmatprep.subr.bf16.mxu1 %v6117_v46 }
 0x6bf   : > { %5550 = vmatpush3.bf16.msra.mxu0 %v6100_v34 }
 0x6c0   : > { %5551 = vmatprep.subr.bf16.mxu0 %v6101_v35  ;;  %5574 = vmatpush3.bf16.msra.mxu1 %v6117_v46  ;;  %v6135_v46 = vld [vmem:[#allocation17 + $0x50] sm:$0xff]  }
 0x6c1   : > { %5575 = vmatprep.subr.bf16.mxu1 %v6119_v55 }
 0x6c3   : > { %5552 = vmatpush3.bf16.msra.mxu0 %v6101_v35 }
 0x6c4   : > { %5553 = vmatprep.subr.bf16.mxu0 %v6102_v2  ;;  %5576 = vmatpush3.bf16.msra.mxu1 %v6119_v55  ;;  %v6137_v55 = vld [vmem:[#allocation17 + $0x58] sm:$0xff]  }
 0x6c5   : > { %5577 = vmatprep.subr.bf16.mxu1 %v6120_v56 }
 0x6c7   : > { %5554 = vmatpush3.bf16.msra.mxu0 %v6102_v2 }
 0x6c8   : > { %5555 = vmatprep.subr.bf16.mxu0 %v6103_v36  ;;  %5578 = vmatpush3.bf16.msra.mxu1 %v6120_v56  ;;  %v6136_v56 = vld [vmem:[#allocation17 + $0x20] sm:$0xff]  }
 0x6c9   : > { %5603 = vmatprep.subr.bf16.mxu1 %v6121_v57 }
 0x6cb   : > { %5556 = vmatpush3.bf16.msra.mxu0 %v6103_v36 }
 0x6cc   : > { %5557 = vmatprep.subr.bf16.mxu0 %v6104_v37 }
 0x6cf   : > { %5558 = vmatpush3.bf16.msra.mxu0 %v6104_v37 }
 0x6d0   : > { %5583 = vmatprep.subr.bf16.mxu0 %v6105_v59 }
 0x6d2   : > { %5560 = vmatmul.mubr.bf16.vlgmr.msra.gmra.mrb[40].mxu0 %v3434_v22 }
 0x6d3   : > { %5584 = vmatpush3.bf16.msra.mxu0 %v6105_v59 }
 0x6d4   : > { %5585 = vmatprep.subr.bf16.mxu0 %v6106_v38 }
 0x6d7   : > { %5586 = vmatpush3.bf16.msra.mxu0 %v6106_v38  ;;  %v6122_v38 = vld [vmem:[#allocation16 + $0x88] sm:$0xff]  }
 0x6d8   : > { %5587 = vmatprep.subr.bf16.mxu0 %v6108_v41 }
 0x6db   : > { %5588 = vmatpush3.bf16.msra.mxu0 %v6108_v41  ;;  %v6126_v41 = vld [vmem:[#allocation16 + $0xa8] sm:$0xff]  }
 0x6dc   : > { %5589 = vmatprep.subr.bf16.mxu0 %v6110_v45 }
 0x6df   : > { %5590 = vmatpush3.bf16.msra.mxu0 %v6110_v45  ;;  %v6128_v45 = vld [vmem:[#allocation16 + $0xb8] sm:$0xff]  }
 0x6e0   : > { %5591 = vmatprep.subr.bf16.mxu0 %v6112_v48 }
 0x6e3   : > { %5592 = vmatpush3.bf16.msra.mxu0 %v6112_v48  ;;  %v6131_v48 = vld [vmem:[#allocation17 + $0x40] sm:$0xff]  }
 0x6e4   : > { %5593 = vmatprep.subr.bf16.mxu0 %v6114_v50 }
 0x6e7   : > { %5594 = vmatpush3.bf16.msra.mxu0 %v6114_v50  ;;  %v6130_v50 = vld [vmem:[#allocation17 + $0x8] sm:$0xff]  }
 0x6e8   : > { %5595 = vmatprep.subr.bf16.mxu0 %v6116_v52 }
 0x6eb   : > { %5596 = vmatpush3.bf16.msra.mxu0 %v6116_v52  ;;  %v6132_v52 = vld [vmem:[#allocation17 + $0x10] sm:$0xff]  }
 0x6ec   : > { %5597 = vmatprep.subr.bf16.mxu0 %v6118_v53 }
 0x6ef   : > { %5598 = vmatpush3.bf16.msra.mxu0 %v6118_v53  ;;  %v6134_v53 = vld [vmem:[#allocation17 + $0x18] sm:$0xff]  }
 0x6f0   : > { %5623 = vmatprep.subr.bf16.mxu0 %v6830_v0 }
 0x77e   : > { %v5541_v58 = vpop.f32.mrb[36].mxu1 }
 0x77f   : > { %v3400_v60 = vpop.f32.mrb[37].mxu1 }
 0x780   : > { %v5542_v63 = vpop.f32.mrb[38].mxu1 }
 0x781   : > { %v3403_v1 = vpop.f32.mrb[39].mxu1  ;;  %v6141_v63 = vld [vmem:[#allocation17 + $0x68] sm:$0xff]  }
 0x785   : > { %v5521_v5 = vpop.f32.mrb[36].mxu0 }
 0x786   : > { %v3409_v6 = vadd.f32 %v5541_v58, %v5521_v5  ;;  %v3304_v9 = vpop.f32.mrb[37].mxu0  ;;  %v6139_v58 = vld [vmem:[#allocation17 + $0x60] sm:$0xff]   ;;  %v6143_v5 = vld [vmem:[#allocation17 + $0x70] sm:$0xff]  }
 0x787   : > { %v3401_v10 = vadd.f32 %v3400_v60, %v3304_v9  ;;  %v5522_v12 = vpop.f32.mrb[38].mxu0  ;;  %v6140_v60 = vld [vmem:[#allocation17 + $0x30] sm:$0xff]  }
 0x788   : > { %v3307_v13 = vpop.f32.mrb[39].mxu0 }
 0x789   : > { %v3404_v62 = vadd.f32 %v3403_v1, %v3307_v13  ;;  %v6142_v1 = vld [vmem:[#allocation17 + $0x38] sm:$0xff]  }
 0x7a5   : > { %v5561_v15 = vpop.f32.mrb[40].mxu0 }
 0x7a6   : > { %v3536_v14 = vadd.f32 %v5561_v15, %v3409_v6  ;;  %v3520_v3 = vpop.f32.mrb[41].mxu0  ;;  %v6144_v6 = vld [vmem:[#allocation17 + $0x78] sm:$0xff]  }
 0x7a7   : > { %v3534_v16 = vadd.f32 %v3520_v3, %v3401_v10  ;;  %v5562_v61 = vpop.f32.mrb[42].mxu0 }
 0x7a8   : > { %v3546_v44 = vadd.f32 %v4817_v17, %v3536_v14  ;;  %v3523_v18 = vpop.f32.mrb[43].mxu0 }
 0x7a9   : > { %v3544_v43 = vadd.f32 %v4817_v17, %v3534_v16  ;;  %v3535_v19 = vadd.f32 %v3523_v18, %v3404_v62  ;;  %v4848_v18 = vld [vmem:[#allocation29] ss:$0 sm:$0xff] }
 0x7aa   : > { %v3549_v20 = vmax.f32 %v3546_v44, 0.0 }
 0x7ab   : > { %v3547_v21 = vmax.f32 %v3544_v43, 0.0  ;;  %v3545_v22 = vadd.f32 %v4817_v17, %v3535_v19 }
 0x7ac   : > { %v3552_v23 = vsel %vm1516_vm3, %v3549_v20, 0.0  ;;  %v4838_v31 = vpack.c.bf16 %v3549_v20, %v3549_v20 }
 0x7ad   : > { %v3554_v24 = vpack.c.bf16 %v3552_v23, %v3552_v23  ;;  %v3550_v25 = vsel %vm1511_vm4, %v3547_v21, 0.0  ;;  %v3548_v26 = vmax.f32 %v3545_v22, 0.0 }
 0x7af   : > { %v3553_v27 = vpack.c.bf16 %v3548_v26, %v3550_v25  ;;  %v4835_v28 = vpack.c.bf16 %v3548_v26, %v3547_v21  ;;  %v3596_v29 = vshll.u32 %v3554_v24, 16  ;;  %v3817_v34 = vrot.slane %v3554_v24, 1 }
 0x7b0   : > { %v3600_v37 = vshrl.u32 %v3554_v24, 16 }
 0x7b1   : > { %5599 = vmatprep.mubr.msk.bf16.mxu0 %vm7567_vm6, %v4835_v28  ;;  %v3591_v32 = vshll.u32 %v3553_v27, 16  ;;  %v3816_v33 = vrot.slane %v3553_v27, 1  ;;  %v3589_v49 = vshrl.u32 %v3553_v27, 16  ;;  %v3598_v2 = vrot.slane %v3596_v29, 1 }
 0x7b2   : > { %5600 = vmatmul.mubr.msk.bf16.vlgmr.msra.gmra.mrb[44].mxu0 %vm7574_vm7, %v4838_v31 }
 0x7b3   : > { %v3593_v35 = vrot.slane %v3591_v32, 1  ;;  %v3818_v54 = vsel %vm1384_vm2, %v3816_v33, %v3817_v34  ;;  %5639 = vmatprep.mubr.msk.bf16.mxu0 %vm6831_vm0, %v6830_v0  ;;  %v3602_v4 = vor.u32 %v3600_v37, %v3598_v2  ;;  %5624 = vmatpush3.bf16.msra.mxu0 %v6131_v48 }
 0x7b4   : > { %5625 = vmatprep.subr.bf16.mxu0 %v6830_v0 }
 0x7b5   : > { %v3594_v36 = vor.u32 %v3593_v35, %v3589_v49 }
 0x7b7   : > { %v3599_v59 = vsel %vm1155_vm1, %v3594_v36, %v3598_v2  ;;  %5626 = vmatpush3.bf16.msra.mxu0 %v6133_v51 }
 0x7b8   : > { %5579 = vmatprep.mubr.bf16.mxu1 %v3599_v59  ;;  %5627 = vmatprep.subr.bf16.mxu0 %v6830_v0 }
 0x7b9   : > { %5580 = vmatmul.mubr.bf16.vlgmr.msra.gmra.mrb[40].mxu1 %v3602_v4 }
 0x7ba   : > { %5604 = vmatpush3.bf16.msra.mxu1 %v6121_v57  ;;  %5619 = vmatprep.mubr.bf16.mxu1 %v3818_v54  ;;  %v6138_v57 = vld [vmem:[#allocation17 + $0x28] sm:$0xff]  }
 0x7bb   : > { %5605 = vmatprep.subr.bf16.mxu1 %v6122_v38  ;;  %5628 = vmatpush3.bf16.msra.mxu0 %v6135_v46 }
 0x7bc   : > { %5629 = vmatprep.subr.bf16.mxu0 %v6830_v0 }
 0x7be   : > { %5606 = vmatpush3.bf16.msra.mxu1 %v6122_v38 }
 0x7bf   : > { %5607 = vmatprep.subr.bf16.mxu1 %v6123_v7  ;;  %5630 = vmatpush3.bf16.msra.mxu0 %v6137_v55 }
 0x7c0   : > { %5631 = vmatprep.subr.bf16.mxu0 %v6830_v0 }
 0x7c2   : > { %5608 = vmatpush3.bf16.msra.mxu1 %v6123_v7  ;;  %v6145_v7 = vld [vmem:[#allocation17 + $0x80] sm:$0xff]  }
 0x7c3   : > { %5609 = vmatprep.subr.bf16.mxu1 %v6124_v39  ;;  %5632 = vmatpush3.bf16.msra.mxu0 %v6139_v58 }
 0x7c4   : > { %5633 = vmatprep.subr.bf16.mxu0 %v6830_v0 }
 0x7c6   : > { %5610 = vmatpush3.bf16.msra.mxu1 %v6124_v39  ;;  %v6146_v39 = vld [vmem:[#allocation17 + $0x88] sm:$0xff]  }
 0x7c7   : > { %5611 = vmatprep.subr.bf16.mxu1 %v6125_v40  ;;  %5634 = vmatpush3.bf16.msra.mxu0 %v6141_v63  ;;  %v4876_v63 = vld [vmem:[#allocation31] ss:$0 sm:$0xff] }
 0x7c8   : > { %5635 = vmatprep.subr.bf16.mxu0 %v6830_v0 }
 0x7ca   : > { %5612 = vmatpush3.bf16.msra.mxu1 %v6125_v40  ;;  %v6148_v40 = vld [vmem:[#allocation17 + $0x98] sm:$0xff]  }
 0x7cb   : > { %5613 = vmatprep.subr.bf16.mxu1 %v6126_v41  ;;  %5636 = vmatpush3.bf16.msra.mxu0 %v6143_v5 }
 0x7cc   : > { %5637 = vmatprep.subr.bf16.mxu0 %v6830_v0 }
 0x7ce   : > { %5614 = vmatpush3.bf16.msra.mxu1 %v6126_v41  ;;  %v6149_v41 = vld [vmem:[#allocation17 + $0xa0] sm:$0xff]  }
 0x7cf   : > { %5615 = vmatprep.subr.bf16.mxu1 %v6127_v42  ;;  %5638 = vmatpush3.bf16.msra.mxu0 %v6144_v6 }
 0x7d0   : > { %5663 = vmatprep.subr.bf16.mxu0 %v6830_v0 }
 0x7d2   : > { %5616 = vmatpush3.bf16.msra.mxu1 %v6127_v42  ;;  %v6150_v42 = vld [vmem:[#allocation17 + $0xa8] sm:$0xff]  }
 0x7d3   : > { %5617 = vmatprep.subr.bf16.mxu1 %v6128_v45 }
 0x7d6   : > { %5618 = vmatpush3.bf16.msra.mxu1 %v6128_v45  ;;  %v6151_v45 = vld [vmem:[#allocation17 + $0xb0] sm:$0xff]  }
 0x7d7   : > { %5643 = vmatprep.subr.bf16.mxu1 %v6830_v0 }
 0x7d9   : > { %5620 = vmatmul.mubr.bf16.vlgmr.msra.gmra.mrb[44].mxu1 %v3817_v34 }
 0x7da   : > { %5659 = vmatprep.mubr.msk.bf16.mxu1 %vm6831_vm0, %v6830_v0  ;;  %5644 = vmatpush3.bf16.msra.mxu1 %v6129_v47  ;;  %v6152_v47 = vld [vmem:[#allocation17 + $0xb8] sm:$0xff]  }
 0x7db   : > { %5645 = vmatprep.subr.bf16.mxu1 %v6830_v0 }
 0x7de   : > { %5646 = vmatpush3.bf16.msra.mxu1 %v6130_v50 }
 0x7df   : > { %5647 = vmatprep.subr.bf16.mxu1 %v6830_v0 }
 0x7e2   : > { %5648 = vmatpush3.bf16.msra.mxu1 %v6132_v52 }
 0x7e3   : > { %5649 = vmatprep.subr.bf16.mxu1 %v6830_v0 }
 0x7e6   : > { %5650 = vmatpush3.bf16.msra.mxu1 %v6134_v53 }
 0x7e7   : > { %5651 = vmatprep.subr.bf16.mxu1 %v6830_v0 }
 0x7ea   : > { %5652 = vmatpush3.bf16.msra.mxu1 %v6136_v56 }
 0x7eb   : > { %5653 = vmatprep.subr.bf16.mxu1 %v6830_v0 }
 0x7ee   : > { %5654 = vmatpush3.bf16.msra.mxu1 %v6138_v57 }
 0x7ef   : > { %5655 = vmatprep.subr.bf16.mxu1 %v6830_v0 }
 0x7f2   : > { %5656 = vmatpush3.bf16.msra.mxu1 %v6140_v60 }
 0x7f3   : > { %5657 = vmatprep.subr.bf16.mxu1 %v6830_v0 }
 0x7f6   : > { %5658 = vmatpush3.bf16.msra.mxu1 %v6142_v1 }
 0x885   : > { %v5601_v9 = vpop.f32.mrb[44].mxu0 }
 0x886   : > { %v3783_v10 = vpop.f32.mrb[45].mxu0 }
 0x887   : > { %v5602_v12 = vpop.f32.mrb[46].mxu0 }
 0x888   : > { %v3786_v13 = vpop.f32.mrb[47].mxu0 }
 0x88c   : > { %v5581_v62 = vpop.f32.mrb[40].mxu1 }
 0x88d   : > { %v3792_v15 = vadd.f32 %v5601_v9, %v5581_v62  ;;  %v3687_v17 = vpop.f32.mrb[41].mxu1 }
 0x88e   : > { %v3784_v14 = vadd.f32 %v3783_v10, %v3687_v17  ;;  %v5582_v3 = vpop.f32.mrb[42].mxu1 }
 0x88f   : > { %v3690_v16 = vpop.f32.mrb[43].mxu1 }
 0x890   : > { %v3787_v61 = vadd.f32 %v3786_v13, %v3690_v16 }
 0x8ac   : > { %v5621_v44 = vpop.f32.mrb[44].mxu1 }
 0x8ad   : > { %v3919_v43 = vadd.f32 %v5621_v44, %v3792_v15  ;;  %v3903_v19 = vpop.f32.mrb[45].mxu1 }
 0x8ae   : > { %v3917_v20 = vadd.f32 %v3903_v19, %v3784_v14  ;;  %v5622_v21 = vpop.f32.mrb[46].mxu1 }
 0x8af   : > { %v3929_v22 = vadd.f32 %v4848_v18, %v3919_v43  ;;  %v3906_v23 = vpop.f32.mrb[47].mxu1 }
 0x8b0   : > { %v3927_v24 = vadd.f32 %v4848_v18, %v3917_v20  ;;  %v3918_v25 = vadd.f32 %v3906_v23, %v3787_v61 }
 0x8b1   : > { %v3932_v26 = vmax.f32 %v3929_v22, 0.0 }
 0x8b2   : > { %v3930_v27 = vmax.f32 %v3927_v24, 0.0  ;;  %v3928_v28 = vadd.f32 %v4848_v18, %v3918_v25 }
 0x8b3   : > { %v3935_v29 = vsel %vm1913_vm8, %v3932_v26, 0.0 }
 0x8b4   : > { %v3937_v31 = vpack.c.bf16 %v3935_v29, %v3935_v29  ;;  %v3933_v32 = vsel %vm1908_vm9, %v3930_v27, 0.0  ;;  %v3931_v33 = vmax.f32 %v3928_v28, 0.0 }
 0x8b6   : > { %v3936_v34 = vpack.c.bf16 %v3931_v33, %v3933_v32  ;;  %v4866_v49 = vpack.c.bf16 %v3931_v33, %v3930_v27  ;;  %v3979_v35 = vshll.u32 %v3937_v31, 16  ;;  %v4182_v2 = vrot.slane %v3937_v31, 1 }
 0x8b8   : > { %v3974_v54 = vshll.u32 %v3936_v34, 16  ;;  %5660 = vmatmul.mubr.msk.bf16.vlgmr.msra.gmra.mrb[48].mxu1 %vm7640_vm10, %v4866_v49  ;;  %v4181_v36 = vrot.slane %v3936_v34, 1  ;;  %v3972_v37 = vshrl.u32 %v3936_v34, 16  ;;  %v3981_v8 = vrot.slane %v3979_v35, 1 }
 0x8ba   : > { %v3976_v59 = vrot.slane %v3974_v54, 1  ;;  %v4183_v4 = vsel %vm1384_vm2, %v4181_v36, %v4182_v2 }
 0x8bc   : > { %v3977_v38 = vor.u32 %v3976_v59, %v3972_v37 }
 0x8be   : > { %v3982_v11 = vsel %vm1155_vm1, %v3977_v38, %v3981_v8 }
 0x8bf   : > { %5640 = vmatmul.mubr.bf16.vlgmr.msra.gmra.mrb[48].mxu0 %v3982_v11 }
 0x8c0   : > { %5664 = vmatpush3.bf16.msra.mxu0 %v6145_v7  ;;  %5679 = vmatprep.mubr.msk.bf16.mxu0 %vm6831_vm0, %v6830_v0 }
 0x8c1   : > { %5665 = vmatprep.subr.bf16.mxu0 %v6830_v0 }
 0x8c4   : > { %5666 = vmatpush3.bf16.msra.mxu0 %v6146_v39 }
 0x8c5   : > { %5667 = vmatprep.subr.bf16.mxu0 %v6830_v0 }
 0x8c8   : > { %5668 = vmatpush3.bf16.msra.mxu0 %v6147_v30 }
 0x8c9   : > { %5669 = vmatprep.subr.bf16.mxu0 %v6830_v0 }
 0x8cc   : > { %5670 = vmatpush3.bf16.msra.mxu0 %v6148_v40 }
 0x8cd   : > { %5671 = vmatprep.subr.bf16.mxu0 %v6830_v0 }
 0x8d0   : > { %5672 = vmatpush3.bf16.msra.mxu0 %v6149_v41 }
 0x8d1   : > { %5673 = vmatprep.subr.bf16.mxu0 %v6830_v0 }
 0x8d4   : > { %5674 = vmatpush3.bf16.msra.mxu0 %v6150_v42 }
 0x8d5   : > { %5675 = vmatprep.subr.bf16.mxu0 %v6830_v0 }
 0x8d8   : > { %5676 = vmatpush3.bf16.msra.mxu0 %v6151_v45 }
 0x8d9   : > { %5677 = vmatprep.subr.bf16.mxu0 %v6830_v0 }
 0x8dc   : > { %5678 = vmatpush3.bf16.msra.mxu0 %v6152_v47 }
 0x8df   : > { %5680 = vmatmul.mubr.bf16.vlgmr.msra.gmra.mrb[52].mxu0 %v4183_v4 }
 0x98b   : > { %v4155_v48 = vpop.f32.mrb[48].mxu1 }
 0x98c   : > { %v5661_v50 = vpop.f32.mrb[49].mxu1 }
 0x98d   : > { %v4158_v51 = vpop.f32.mrb[50].mxu1 }
 0x98e   : > { %v5662_v52 = vpop.f32.mrb[51].mxu1 }
 0x992   : > { %v4066_v46 = vpop.f32.mrb[48].mxu0 }
 0x993   : > { %v4156_v53 = vadd.f32 %v4155_v48, %v4066_v46  ;;  %v5641_v55 = vpop.f32.mrb[49].mxu0 }
 0x994   : > { %v4069_v56 = vpop.f32.mrb[50].mxu0 }
 0x995   : > { %v4159_v57 = vadd.f32 %v4158_v51, %v4069_v56  ;;  %v5642_v58 = vpop.f32.mrb[51].mxu0 }
 0x9b2   : > { %v4267_v60 = vpop.f32.mrb[52].mxu0 }
 0x9b3   : > { %v4274_v0 = vadd.f32 %v4267_v60, %v4156_v53  ;;  %v5681_v1 = vpop.f32.mrb[53].mxu0 }
 0x9b4   : > { %v4270_v5 = vpop.f32.mrb[54].mxu0 }
 0x9b5   : > { %v4283_v6 = vadd.f32 %v4876_v63, %v4274_v0  ;;  %v4275_v9 = vadd.f32 %v4270_v5, %v4159_v57  ;;  %v5682_v10 = vpop.f32.mrb[55].mxu0 }
 0x9b7   : > { %v4285_v12 = vmax.f32 %v4283_v6, 0.0  ;;  %v4284_v13 = vadd.f32 %v4876_v63, %v4275_v9 }
 0x9b9   : > { %4289 = vst [vmem:[%s7540_s21 + $0x10] sm:$0xff] %v4285_v12  ;;  %v4286_v62 = vmax.f32 %v4284_v13, 0.0 }
 0x9bb   : > { %4292 = vst [vmem:[%s7540_s21 + $0x28] sm:$0xff] %v4286_v62 }
 0x9bc   : > { %6700 = shalt.err (!%p6697_p8)
}
 0x9bd   : > { %s6701_s21 = scalar_lea.hbm %s7768_s0, 768  ;;  %s6705_s20 = scalar_lea.hbm %s7924_s23, 1536 }
 0x9be   : > { %p6702_p3 = scmp.ne.s32.totalorder %s7768_s0, %s6701_s21  ;;  %p6706_p13 = scmp.lt.u32.totalorder %s7768_s0, %s7924_s23 }
 0x9bf   : > { %p6707_p1 = scmp.lt.u32.totalorder %s6705_s20, %s6701_s21  ;;  %p6709_p2 = scmp.lt.u32.totalorder %s6701_s21, %s7768_s0 }
 0x9c0   : > { %p6703_p11 = pnand %p6702_p3, %p7925_p9 }
 0x9c1   : > { %p6708_p4 = por %p6707_p1, %p6706_p13 }
 0x9c2   : > { %p6704_p6 = pneg %p6703_p11 }
 0x9c3   : > { %p6710_p10 = por %p6709_p2, %p6708_p4 }
 0x9c5   : > { %p6711_p12 = pnand %p6710_p10, %p6704_p6 }
 0x9c7   : > { %6714 = shalt.err (!%p6711_p12)
}
 0x9c8   : > { %s6834_s5 = smov 384   ;;  %s6835_s7 = smov 24  }
 0x9c9   : > { %5759 = dma.vmem_to_hbm [thread:$0]  (%p7925_p9), %s7763_s3, 768, %s7768_s0, %s4294_s22, %s6834_s5, %s6834_s5, %s6835_s7  }
 0x9ca PF: > { %s7926_s6 = sld [smem:[#allocation44_spill]]  ;;  %s7927_s26 = sld [smem:[#allocation49_spill]] }
 0x9cb   : > { %p7928_p0 = scmp.ne.s32.totalorder %s7909_s2, 0 }
 0x9d0   : > { %s4325_s28 = sand.u32 1, %s7926_s6   ;;  %p7929_p7 = scmp.ge.s32.totalorder %s7927_s26, 2 }
 0x9d1   : > { %s4326_s21 = scalar_lea.sflag [#allocation4], %s4325_s28 }
 0x9d2   : > { %p5821_p5 = pnand %p7929_p7, %p7928_p0 }
 0x9d4   : > { %6780 = dma.done.wait (!%p5821_p5), %s4326_s21, 768  }
 0x9d5   : > { %6782 = vsyncadd (!%p5821_p5), %s4326_s21, 4294966528  ;;  %s44_s22 = sadd.s32 1, %s7927_s26   ;;  %s7930_s0 = sld [smem:[#allocation45_spill]] }
 0x9d6   : > { %p41_p8 = scmp.ge.s32.totalorder %s44_s22, 4   ;;  %s7931_s20 = sld [smem:[#allocation46_spill]] }
 0x9d7   : > { %s7932_s19 = smov %s7391_s30  ;;  %s7933_s21 = sld [smem:[#allocation48_spill]] }
 0x9d8   : > { %s7936_s1 = smov %s7938_s27  ;;  %43 = sbr.rel (!%p41_p8) target bundleno = 27 (0x1b), region = 234 }
 0x9dc   : > { %s7934_s30 = smov %s7931_s20  ;;  %s7935_s20 = smov %s7932_s19 }
 0x9df   :  { %4331 = vsyncpa [#allocation3], 1 }
 0x9e0   :  { %4333 = vsyncpa [#allocation3 + $0x1], 1 }
 0x9e1   :  { %4334 = vsyncpa [#allocation6], 1 }
 0x9e2   :  { %4335 = vsyncpa [#allocation9], 1 }
 0x9e3   :  { %4336 = vsyncpa [#allocation12], 1 }
 0x9e4   :  { %4337 = vsyncpa [#allocation15], 1 }
 0x9e5   :  { %4338 = vsyncpa [#allocation18], 1 }
 0x9e6   :  { %4339 = vsyncpa [#allocation21], 1 }
 0x9e7   :  { %4340 = vsyncpa [#allocation24], 1 }
 0x9e8   :  { %4341 = vsyncpa [#allocation27], 1 }
 0x9e9   :  { %4342 = vsyncpa [#allocation30], 1 }
 0x9ea   :  { %4343 = vsyncpa [#allocation4], 1 }
 0x9eb   :  { %4345 = vsyncpa [#allocation4 + $0x1], 1 }

</bundles_post_ra>
